<compile_context>
chip_gen: v5e
topology: v5e:2x2
jax: 0.10.0
libtpu: 0.0.40
codegen_flags: <defaults>
</compile_context>

<pallas_src>
import functools

import jax
import jax.numpy as jnp
from jax.experimental import pallas as pl
from jax.experimental.pallas import tpu as pltpu

NEG_SLOPE = 0.2    # GATConv leaky_relu negative_slope (default)
BN_EPS = 1e-5      # BatchNorm1d eps (default)
ROW_TILE = 64      # source/row tile (multiple of 16 for bf16 sublane packing)
DST_TILE = 64      # destination-node tile for the attention kernel

_CPARAMS = pltpu.CompilerParams(
    dimension_semantics=("parallel",),          # dst/row tiles are independent
    vmem_limit_bytes=48 * 1024 * 1024,          # above 16/32 MiB scoped default,
)                                               # below v7x's 64 MiB physical


# ----------------------------------------------------------------------------
# Pallas kernels
# ----------------------------------------------------------------------------
def gat_src_kernel(x_ref, gamma_ref, beta_ref, mean_ref, var_ref,
                   w_cat_ref, a_cat_ref,
                   feat_ref, res_ref, sc_ref, *, hf, use_bn):
    """Per row-tile: (optional BN+ReLU) -> [feat | res] = x @ [W_fc | W_res]
    (bf16 MXU, f32 acc) -> attention logits [el | er] = feat @ A_cat (f32)."""
    x = x_ref[...]                                                  # (TR, Din)
    if use_bn:
        inv = jax.lax.rsqrt(var_ref[...] + BN_EPS)
        x = jnp.maximum(
            (x - mean_ref[...]) * inv * gamma_ref[...] + beta_ref[...], 0.0)
    fr = jnp.dot(x.astype(jnp.bfloat16), w_cat_ref[...],
                 preferred_element_type=jnp.float32)                # (TR, 2*hf)
    feat = fr[:, :hf]                                               # (TR, hf)
    res = fr[:, hf:]                                                # (TR, hf)
    # attention logits on the MXU; keep the logit math in f32 for softmax.
    sc = jnp.dot(feat, a_cat_ref[...],
                 preferred_element_type=jnp.float32)                # (TR, 2H)
    feat_ref[...] = feat.astype(jnp.bfloat16)
    res_ref[...] = res
    sc_ref[...] = sc


def gat_attn_kernel(*refs, num_heads, out_feats, has_extra):
    """Per dst tile: masked edge softmax (f32, deferred normalization) +
    per-head bf16 aggregation matmul + fused residual epilogue."""
    if has_extra:
        adj_ref, el_t_ref, er_ref, feat_ref, res_ref, extra_ref, out_ref = refs
    else:
        adj_ref, el_t_ref, er_ref, feat_ref, res_ref, out_ref = refs
        extra_ref = None

    adj = adj_ref[...].astype(jnp.float32)                          # (TD, N)
    mask = adj > 0.0
    feat = feat_ref[...]                                            # (N, H*F) bf16

    parts = []
    for h in range(num_heads):                                      # static loop
        el = el_t_ref[h:h + 1, :]                                   # (1, N)  src
        er = er_ref[:, h:h + 1]                                     # (TD, 1) dst
        e = er + el                                                 # (TD, N)
        e = jnp.where(e > 0.0, e, NEG_SLOPE * e)                    # LeakyReLU
        e = jnp.where(mask, e, -1e30)                               # real edges only
        e_max = jnp.max(e, axis=-1, keepdims=True)
        p = jnp.exp(e - e_max)
        p = jnp.where(mask, p, 0.0)
        denom = jnp.sum(p, axis=-1, keepdims=True)                  # (TD, 1)
        fh = feat[:, h * out_feats:(h + 1) * out_feats]             # (N, F) bf16
        num = jnp.dot(p.astype(jnp.bfloat16), fh,
                      preferred_element_type=jnp.float32)           # (TD, F)
        # deferred softmax normalization: one EUP reciprocal, O(TD*F) multiply
        parts.append(num * pl.reciprocal(denom, approx=True))

    out = jnp.concatenate(parts, axis=-1) + res_ref[...]            # res_fc residual
    if has_extra:
        out = out + extra_ref[...]                                  # coupling residual
    out_ref[...] = out                                              # single block store


# ----------------------------------------------------------------------------
# Wrappers
# ----------------------------------------------------------------------------
def _full_spec(shape):
    nd = len(shape)
    return pl.BlockSpec(shape, lambda i: (0,) * nd)


def _pick_tile(n, pref):
    return pref if (n % pref == 0 and n >= pref) else n


def gat_conv(x, adj_bf16, p, *, num_heads, out_feats, bn=None, extra=None):
    """One GATConv (learned res_fc residual, per the spec), optionally preceded
    by a fused BatchNorm1d+ReLU and followed by a fused extra residual add."""
    n, din = x.shape
    hf = num_heads * out_feats

    # fused fc weights and block-diagonal attention matrix (tiny, built per call)
    w_cat = jnp.concatenate([p["w_fc"], p["w_res"]], axis=1).astype(jnp.bfloat16)
    eye = jnp.eye(num_heads, dtype=jnp.float32)
    a_l = (p["attn_l"][:, :, None] * eye[:, None, :]).reshape(hf, num_heads)
    a_r = (p["attn_r"][:, :, None] * eye[:, None, :]).reshape(hf, num_heads)
    a_cat = jnp.concatenate([a_l, a_r], axis=1)                     # (hf, 2H)

    if bn is None:
        gamma = jnp.ones((1, din), jnp.float32)
        beta = jnp.zeros((1, din), jnp.float32)
        mean = jnp.zeros((1, din), jnp.float32)
        var = jnp.ones((1, din), jnp.float32)
        use_bn = False
    else:
        gamma, beta, mean, var = bn["gamma"], bn["beta"], bn["mean"], bn["var"]
        use_bn = True

    # ---- stage 1: row-tiled prologue + fc + attention logits -------------
    tr = _pick_tile(n, ROW_TILE)
    feat, res, scores = pl.pallas_call(
        functools.partial(gat_src_kernel, hf=hf, use_bn=use_bn),
        grid=(n // tr,),
        in_specs=[
            pl.BlockSpec((tr, din), lambda i: (i, 0)),
            _full_spec((1, din)), _full_spec((1, din)),
            _full_spec((1, din)), _full_spec((1, din)),
            _full_spec((din, 2 * hf)),
            _full_spec((hf, 2 * num_heads)),
        ],
        out_specs=[
            pl.BlockSpec((tr, hf), lambda i: (i, 0)),
            pl.BlockSpec((tr, hf), lambda i: (i, 0)),
            pl.BlockSpec((tr, 2 * num_heads), lambda i: (i, 0)),
        ],
        out_shape=[
            jax.ShapeDtypeStruct((n, hf), jnp.bfloat16),            # feat (src side)
            jax.ShapeDtypeStruct((n, hf), jnp.float32),             # res_fc residual
            jax.ShapeDtypeStruct((n, 2 * num_heads), jnp.float32),  # [el | er]
        ],
        compiler_params=_CPARAMS,
    )(x, gamma, beta, mean, var, w_cat, a_cat)

    # glue: split logits; transpose the (tiny) src part once instead of per tile
    el_t = jnp.transpose(scores[:, :num_heads])                     # (H, N)
    er = scores[:, num_heads:]                                      # (N, H)

    # ---- stage 2: dst-tiled masked softmax + aggregation ------------------
    td = _pick_tile(n, DST_TILE)
    has_extra = extra is not None
    inputs = [adj_bf16, el_t, er, feat, res]
    in_specs = [
        pl.BlockSpec((td, n), lambda i: (i, 0)),                    # adj dst tile
        _full_spec((num_heads, n)),                                 # el (all src)
        pl.BlockSpec((td, num_heads), lambda i: (i, 0)),            # er dst tile
        _full_spec((n, hf)),                                        # feat (all src)
        pl.BlockSpec((td, hf), lambda i: (i, 0)),                   # res dst tile
    ]
    if has_extra:
        inputs.append(extra)
        in_specs.append(pl.BlockSpec((td, hf), lambda i: (i, 0)))

    # TODO(synk): for very small hf / n_classes (<128 lanes) the output store is
    # partially masked; padding to 128 lanes would help but is model-determined.
    out = pl.pallas_call(
        functools.partial(gat_attn_kernel, num_heads=num_heads,
                          out_feats=out_feats, has_extra=has_extra),
        grid=(n // td,),
        in_specs=in_specs,
        out_specs=pl.BlockSpec((td, hf), lambda i: (i, 0)),
        out_shape=jax.ShapeDtypeStruct((n, hf), jnp.float32),
        compiler_params=_CPARAMS,
    )(*inputs)
    return out


# ----------------------------------------------------------------------------
# Parameter init (deterministic, xavier_normal with gain('relu') = sqrt(2))
# ----------------------------------------------------------------------------
def _xavier(key, shape, fan_in, fan_out, gain=2.0 ** 0.5):
    std = gain * (2.0 / (fan_in + fan_out)) ** 0.5
    return std * jax.random.normal(key, shape, dtype=jnp.float32)


def init_revgat_params(key, in_feats, n_classes, n_hidden, n_heads, group):
    keys = iter(jax.random.split(key, 32))

    def gat_params(din, dout, heads):
        return dict(
            w_fc=_xavier(next(keys), (din, heads * dout), din, heads * dout),
            w_res=_xavier(next(keys), (din, heads * dout), din, heads * dout),
            attn_l=_xavier(next(keys), (heads, dout), heads * dout, dout),
            attn_r=_xavier(next(keys), (heads, dout), heads * dout, dout),
        )

    def bn_params(c):
        # BatchNorm1d default init / running stats (eval mode)
        return dict(gamma=jnp.ones((1, c), jnp.float32),
                    beta=jnp.zeros((1, c), jnp.float32),
                    mean=jnp.zeros((1, c), jnp.float32),
                    var=jnp.ones((1, c), jnp.float32))

    c_branch = n_heads * n_hidden // group     # per-group feature width
    f_branch = n_hidden // group               # per-group, per-head out_feats

    params = dict(
        conv0=gat_params(in_feats, n_hidden, n_heads),
        # the `group` Fm copies are deepcopies -> identical initial weights,
        # so a single parameter set is shared across groups.
        rev_fm=dict(bn=bn_params(n_heads * f_branch),
                    conv=gat_params(c_branch, f_branch, n_heads)),
        norm=bn_params(n_heads * n_hidden),
        conv_last=gat_params(n_heads * n_hidden, n_classes, 1),
        bias_last=jnp.zeros((1, n_classes), jnp.float32),
    )
    return params


# ----------------------------------------------------------------------------
# RevGAT forward (eval mode: input_drop / SharedDropout / dp_last / edge_drop
# are identities since all dropout probabilities are 0.0)
# ----------------------------------------------------------------------------
def revgat_forward(params, adj_bf16, feat, *, n_layers, n_heads, n_hidden,
                   n_classes, group):
    h = feat  # input_drop (p=0) -> identity

    # --- convs[0]: GATConv + flatten(1, -1) ---
    h = gat_conv(h, adj_bf16, params["conv0"],
                 num_heads=n_heads, out_feats=n_hidden)          # (N, H*hidden)

    # TODO(synk): torch.randperm / bernoulli dropout-mask sampling is training-
    # only stochasticity; with dropout == 0 the mask is all-ones (identity).

    # --- reversible middle layers: GroupAdditiveCoupling ---
    for _ in range(1, n_layers - 1):
        c = h.shape[1] // group
        xs = [h[:, g * c:(g + 1) * c] for g in range(group)]
        fm = params["rev_fm"]
        y_in = xs[1]
        for g in range(2, group):
            y_in = y_in + xs[g]
        ys = []
        for g in range(group):
            # fused in-kernel: BN+ReLU prologue, GATConv, res_fc residual and
            # the coupling residual xs[g] in the epilogue.
            y = gat_conv(y_in, adj_bf16, fm["conv"],
                         num_heads=n_heads, out_feats=n_hidden // group,
                         bn=fm["bn"], extra=xs[g])
            y_in = y
            ys.append(y)
        h = jnp.concatenate(ys, axis=-1)

    # --- top norm + ReLU fused into conv_last's prologue; dp_last identity ---
    h = gat_conv(h, adj_bf16, params["conv_last"],
                 num_heads=1, out_feats=n_classes,
                 bn=params["norm"])                              # (N, n_classes)

    # h.mean(1) over a single head dim is the identity on (N, 1, C);
    # bias_last (zeros) added in plain JAX (glue).
    h = h + params["bias_last"]
    return h


# ----------------------------------------------------------------------------
# Demo
# ----------------------------------------------------------------------------
if __name__ == "__main__":
    # Small, deterministic configuration
    N = 128           # number of graph nodes (multiple of the 64-row tiles)
    IN_FEATS = 32
    N_HIDDEN = 16
    N_HEADS = 2
    N_CLASSES = 8
    N_LAYERS = 3      # conv0 + 1 reversible block + conv_last
    GROUP = 2

    key = jax.random.PRNGKey(0)
    k_feat, k_adj, k_params = jax.random.split(key, 3)

    feat = jax.random.normal(k_feat, (N, IN_FEATS), dtype=jnp.float32)
    # random sparse graph + self-loops (no zero in-degree); adj[dst, src]
    rand_adj = (jax.random.uniform(k_adj, (N, N)) < 0.1).astype(jnp.float32)
    adj = jnp.maximum(rand_adj, jnp.eye(N, dtype=jnp.float32))
    adj_bf16 = adj.astype(jnp.bfloat16)   # 0/1 exact in bf16; halves O(N^2) HBM traffic

    params = init_revgat_params(k_params, IN_FEATS, N_CLASSES, N_HIDDEN,
                                N_HEADS, GROUP)

    fwd = jax.jit(functools.partial(
        revgat_forward, n_layers=N_LAYERS, n_heads=N_HEADS,
        n_hidden=N_HIDDEN, n_classes=N_CLASSES, group=GROUP))

    out = fwd(params, adj_bf16, feat)
    out = jax.block_until_ready(out)

    assert out.shape == (N, N_CLASSES)
    assert bool(jnp.all(jnp.isfinite(out)))
    print("KERNEL_OK")
</pallas_src>

<mosaic_0001>
module attributes {stable_mosaic.version = 11 : i64} {
  func.func @gat_src_kernel(%arg0: i32, %arg1: memref<64x32xf32, #tpu.memory_space<vmem>>, %arg2: memref<1x32xf32, #tpu.memory_space<vmem>>, %arg3: memref<1x32xf32, #tpu.memory_space<vmem>>, %arg4: memref<1x32xf32, #tpu.memory_space<vmem>>, %arg5: memref<1x32xf32, #tpu.memory_space<vmem>>, %arg6: memref<32x64xbf16, #tpu.memory_space<vmem>>, %arg7: memref<32x4xf32, #tpu.memory_space<vmem>>, %arg8: memref<64x32xbf16, #tpu.memory_space<vmem>>, %arg9: memref<64x32xf32, #tpu.memory_space<vmem>>, %arg10: memref<64x4xf32, #tpu.memory_space<vmem>>) attributes {dimension_semantics = [#tpu.dimension_semantics<parallel>], iteration_bounds = array<i64: 2>, scalar_prefetch = 0 : i64, scratch_operands = 0 : i64, tpu.core_type = #tpu.core_type<tc>, window_params = [{transform_indices = @transform_0, window_bounds = array<i64: 64, 32>}, {pipeline_mode = #tpu.pipeline_mode<synchronous>, transform_indices = @transform_1, window_bounds = array<i64: 1, 32>}, {pipeline_mode = #tpu.pipeline_mode<synchronous>, transform_indices = @transform_2, window_bounds = array<i64: 1, 32>}, {pipeline_mode = #tpu.pipeline_mode<synchronous>, transform_indices = @transform_3, window_bounds = array<i64: 1, 32>}, {pipeline_mode = #tpu.pipeline_mode<synchronous>, transform_indices = @transform_4, window_bounds = array<i64: 1, 32>}, {pipeline_mode = #tpu.pipeline_mode<synchronous>, transform_indices = @transform_5, window_bounds = array<i64: 32, 64>}, {pipeline_mode = #tpu.pipeline_mode<synchronous>, transform_indices = @transform_6, window_bounds = array<i64: 32, 4>}, {transform_indices = @transform_7, window_bounds = array<i64: 64, 32>}, {transform_indices = @transform_8, window_bounds = array<i64: 64, 32>}, {transform_indices = @transform_9, window_bounds = array<i64: 64, 4>}]} {
    %c0 = arith.constant 0 : index
    %c0_0 = arith.constant 0 : index
    %0 = vector.load %arg1[%c0, %c0_0] : memref<64x32xf32, #tpu.memory_space<vmem>>, vector<64x32xf32>
    %1 = arith.truncf %0 : vector<64x32xf32> to vector<64x32xbf16>
    %c0_1 = arith.constant 0 : index
    %c0_2 = arith.constant 0 : index
    %2 = vector.load %arg6[%c0_1, %c0_2] : memref<32x64xbf16, #tpu.memory_space<vmem>>, vector<32x64xbf16>
    %cst = arith.constant dense<0.000000e+00> : vector<64x64xf32>
    %3 = tpu.matmul %1, %2, %cst {dimension_numbers = #tpu.dot_dimension_numbers<[1], [0], [0], [1], [0, 0, 1, 1], [], []>} : vector<64x32xbf16>, vector<32x64xbf16>, vector<64x64xf32> -> vector<64x64xf32>
    %4 = vector.extract_strided_slice %3 {offsets = [0, 0], sizes = [64, 32], strides = [1, 1]} : vector<64x64xf32> to vector<64x32xf32>
    %5 = vector.extract_strided_slice %3 {offsets = [0, 32], sizes = [64, 32], strides = [1, 1]} : vector<64x64xf32> to vector<64x32xf32>
    %c0_3 = arith.constant 0 : index
    %c0_4 = arith.constant 0 : index
    %6 = vector.load %arg7[%c0_3, %c0_4] : memref<32x4xf32, #tpu.memory_space<vmem>>, vector<32x4xf32>
    %cst_5 = arith.constant dense<0.000000e+00> : vector<64x4xf32>
    %7 = tpu.matmul %4, %6, %cst_5 {dimension_numbers = #tpu.dot_dimension_numbers<[1], [0], [0], [1], [0, 0, 1, 1], [], []>} : vector<64x32xf32>, vector<32x4xf32>, vector<64x4xf32> -> vector<64x4xf32>
    %8 = arith.truncf %4 : vector<64x32xf32> to vector<64x32xbf16>
    %c0_6 = arith.constant 0 : index
    %c0_7 = arith.constant 0 : index
    %9 = vector.load %arg8[%c0_6, %c0_7] : memref<64x32xbf16, #tpu.memory_space<vmem>>, vector<64x32xbf16>
    tpu.vector_store %arg8[%c0_6, %c0_7], %8 {strides = array<i32>} : memref<64x32xbf16, #tpu.memory_space<vmem>>, vector<64x32xbf16>,
    %c0_8 = arith.constant 0 : index
    %c0_9 = arith.constant 0 : index
    %10 = vector.load %arg9[%c0_8, %c0_9] : memref<64x32xf32, #tpu.memory_space<vmem>>, vector<64x32xf32>
    tpu.vector_store %arg9[%c0_8, %c0_9], %5 {strides = array<i32>} : memref<64x32xf32, #tpu.memory_space<vmem>>, vector<64x32xf32>,
    %c0_10 = arith.constant 0 : index
    %c0_11 = arith.constant 0 : index
    %11 = vector.load %arg10[%c0_10, %c0_11] : memref<64x4xf32, #tpu.memory_space<vmem>>, vector<64x4xf32>
    tpu.vector_store %arg10[%c0_10, %c0_11], %7 {strides = array<i32>} : memref<64x4xf32, #tpu.memory_space<vmem>>, vector<64x4xf32>,
    return
  }
  func.func @transform_0(%arg0: i32) -> (i32, i32) {
    %c0_i32 = arith.constant 0 : i32
    %c0_i32_0 = arith.constant 0 : i32
    return %arg0, %c0_i32 : i32, i32
  }
  func.func @transform_1(%arg0: i32) -> (i32, i32) {
    %c0_i32 = arith.constant 0 : i32
    %c0_i32_0 = arith.constant 0 : i32
    %c0_i32_1 = arith.constant 0 : i32
    return %c0_i32, %c0_i32_0 : i32, i32
  }
  func.func @transform_2(%arg0: i32) -> (i32, i32) {
    %c0_i32 = arith.constant 0 : i32
    %c0_i32_0 = arith.constant 0 : i32
    %c0_i32_1 = arith.constant 0 : i32
    return %c0_i32, %c0_i32_0 : i32, i32
  }
  func.func @transform_3(%arg0: i32) -> (i32, i32) {
    %c0_i32 = arith.constant 0 : i32
    %c0_i32_0 = arith.constant 0 : i32
    %c0_i32_1 = arith.constant 0 : i32
    return %c0_i32, %c0_i32_0 : i32, i32
  }
  func.func @transform_4(%arg0: i32) -> (i32, i32) {
    %c0_i32 = arith.constant 0 : i32
    %c0_i32_0 = arith.constant 0 : i32
    %c0_i32_1 = arith.constant 0 : i32
    return %c0_i32, %c0_i32_0 : i32, i32
  }
  func.func @transform_5(%arg0: i32) -> (i32, i32) {
    %c0_i32 = arith.constant 0 : i32
    %c0_i32_0 = arith.constant 0 : i32
    %c0_i32_1 = arith.constant 0 : i32
    return %c0_i32, %c0_i32_0 : i32, i32
  }
  func.func @transform_6(%arg0: i32) -> (i32, i32) {
    %c0_i32 = arith.constant 0 : i32
    %c0_i32_0 = arith.constant 0 : i32
    %c0_i32_1 = arith.constant 0 : i32
    return %c0_i32, %c0_i32_0 : i32, i32
  }
  func.func @transform_7(%arg0: i32) -> (i32, i32) {
    %c0_i32 = arith.constant 0 : i32
    %c0_i32_0 = arith.constant 0 : i32
    return %arg0, %c0_i32 : i32, i32
  }
  func.func @transform_8(%arg0: i32) -> (i32, i32) {
    %c0_i32 = arith.constant 0 : i32
    %c0_i32_0 = arith.constant 0 : i32
    return %arg0, %c0_i32 : i32, i32
  }
  func.func @transform_9(%arg0: i32) -> (i32, i32) {
    %c0_i32 = arith.constant 0 : i32
    %c0_i32_0 = arith.constant 0 : i32
    return %arg0, %c0_i32 : i32, i32
  }
}

module attributes {stable_mosaic.version = 11 : i64} {
  func.func @gat_attn_kernel(%arg0: i32, %arg1: memref<64x128xbf16, #tpu.memory_space<vmem>>, %arg2: memref<2x128xf32, #tpu.memory_space<vmem>>, %arg3: memref<64x2xf32, #tpu.memory_space<vmem>>, %arg4: memref<128x32xbf16, #tpu.memory_space<vmem>>, %arg5: memref<64x32xf32, #tpu.memory_space<vmem>>, %arg6: memref<64x32xf32, #tpu.memory_space<vmem>>) attributes {dimension_semantics = [#tpu.dimension_semantics<parallel>], iteration_bounds = array<i64: 2>, scalar_prefetch = 0 : i64, scratch_operands = 0 : i64, tpu.core_type = #tpu.core_type<tc>, window_params = [{transform_indices = @transform_0, window_bounds = array<i64: 64, 128>}, {pipeline_mode = #tpu.pipeline_mode<synchronous>, transform_indices = @transform_1, window_bounds = array<i64: 2, 128>}, {transform_indices = @transform_2, window_bounds = array<i64: 64, 2>}, {pipeline_mode = #tpu.pipeline_mode<synchronous>, transform_indices = @transform_3, window_bounds = array<i64: 128, 32>}, {transform_indices = @transform_4, window_bounds = array<i64: 64, 32>}, {transform_indices = @transform_5, window_bounds = array<i64: 64, 32>}]} {
    %c0 = arith.constant 0 : index
    %c0_0 = arith.constant 0 : index
    %0 = vector.load %arg1[%c0, %c0_0] : memref<64x128xbf16, #tpu.memory_space<vmem>>, vector<64x128xbf16>
    %1 = arith.extf %0 : vector<64x128xbf16> to vector<64x128xf32>
    %cst = arith.constant 0.000000e+00 : f32
    %2 = vector.broadcast %cst : f32 to vector<64x128xf32>
    %3 = arith.cmpf ogt, %1, %2 : vector<64x128xf32>
    %c0_1 = arith.constant 0 : index
    %c0_2 = arith.constant 0 : index
    %4 = vector.load %arg4[%c0_1, %c0_2] : memref<128x32xbf16, #tpu.memory_space<vmem>>, vector<128x32xbf16>
    %c0_3 = arith.constant 0 : index
    %c0_4 = arith.constant 0 : index
    %5 = vector.load %arg2[%c0_3, %c0_4] : memref<2x128xf32, #tpu.memory_space<vmem>>, vector<1x128xf32>
    %c0_5 = arith.constant 0 : index
    %c0_6 = arith.constant 0 : index
    %6 = vector.load %arg3[%c0_5, %c0_6] : memref<64x2xf32, #tpu.memory_space<vmem>>, vector<64x1xf32>
    %7 = vector.broadcast %6 : vector<64x1xf32> to vector<64x128xf32>
    %8 = vector.broadcast %5 : vector<1x128xf32> to vector<64x128xf32>
    %9 = arith.addf %7, %8 : vector<64x128xf32>
    %cst_7 = arith.constant 0.000000e+00 : f32
    %10 = vector.broadcast %cst_7 : f32 to vector<64x128xf32>
    %11 = arith.cmpf ogt, %9, %10 : vector<64x128xf32>
    %cst_8 = arith.constant 2.000000e-01 : f32
    %12 = vector.broadcast %cst_8 : f32 to vector<64x128xf32>
    %13 = arith.mulf %12, %9 : vector<64x128xf32>
    %14 = arith.select %11, %9, %13 : vector<64x128xi1>, vector<64x128xf32>
    %cst_9 = arith.constant -1.000000e+30 : f32
    %15 = vector.broadcast %cst_9 : f32 to vector<64x128xf32>
    %16 = arith.select %3, %14, %15 : vector<64x128xi1>, vector<64x128xf32>
    %cst_10 = arith.constant dense<0xFF800000> : vector<64xf32>
    %17 = vector.multi_reduction <maximumf>, %16, %cst_10 [1] : vector<64x128xf32> to vector<64xf32>
    %18 = vector.shape_cast %17 : vector<64xf32> to vector<64x1xf32>
    %19 = vector.broadcast %18 : vector<64x1xf32> to vector<64x128xf32>
    %20 = arith.subf %16, %19 : vector<64x128xf32>
    %21 = math.exp %20 : vector<64x128xf32>
    %cst_11 = arith.constant 0.000000e+00 : f32
    %22 = vector.broadcast %cst_11 : f32 to vector<64x128xf32>
    %23 = arith.select %3, %21, %22 : vector<64x128xi1>, vector<64x128xf32>
    %cst_12 = arith.constant dense<0.000000e+00> : vector<64xf32>
    %24 = vector.multi_reduction <add>, %23, %cst_12 [1] : vector<64x128xf32> to vector<64xf32>
    %25 = vector.shape_cast %24 : vector<64xf32> to vector<64x1xf32>
    %26 = vector.extract_strided_slice %4 {offsets = [0, 0], sizes = [128, 16], strides = [1, 1]} : vector<128x32xbf16> to vector<128x16xbf16>
    %27 = arith.truncf %23 : vector<64x128xf32> to vector<64x128xbf16>
    %cst_13 = arith.constant dense<0.000000e+00> : vector<64x16xf32>
    %28 = tpu.matmul %27, %26, %cst_13 {dimension_numbers = #tpu.dot_dimension_numbers<[1], [0], [0], [1], [0, 0, 1, 1], [], []>} : vector<64x128xbf16>, vector<128x16xbf16>, vector<64x16xf32> -> vector<64x16xf32>
    %29 = tpu.reciprocal %25 {approx = true} : vector<64x1xf32> -> vector<64x1xf32>
    %30 = vector.broadcast %29 : vector<64x1xf32> to vector<64x16xf32>
    %31 = arith.mulf %28, %30 : vector<64x16xf32>
    %c1 = arith.constant 1 : index
    %c0_14 = arith.constant 0 : index
    %32 = vector.load %arg2[%c1, %c0_14] : memref<2x128xf32, #tpu.memory_space<vmem>>, vector<1x128xf32>
    %c0_15 = arith.constant 0 : index
    %c1_16 = arith.constant 1 : index
    %33 = vector.load %arg3[%c0_15, %c1_16] : memref<64x2xf32, #tpu.memory_space<vmem>>, vector<64x1xf32>
    %34 = vector.broadcast %33 : vector<64x1xf32> to vector<64x128xf32>
    %35 = vector.broadcast %32 : vector<1x128xf32> to vector<64x128xf32>
    %36 = arith.addf %34, %35 : vector<64x128xf32>
    %cst_17 = arith.constant 0.000000e+00 : f32
    %37 = vector.broadcast %cst_17 : f32 to vector<64x128xf32>
    %38 = arith.cmpf ogt, %36, %37 : vector<64x128xf32>
    %cst_18 = arith.constant 2.000000e-01 : f32
    %39 = vector.broadcast %cst_18 : f32 to vector<64x128xf32>
    %40 = arith.mulf %39, %36 : vector<64x128xf32>
    %41 = arith.select %38, %36, %40 : vector<64x128xi1>, vector<64x128xf32>
    %cst_19 = arith.constant -1.000000e+30 : f32
    %42 = vector.broadcast %cst_19 : f32 to vector<64x128xf32>
    %43 = arith.select %3, %41, %42 : vector<64x128xi1>, vector<64x128xf32>
    %cst_20 = arith.constant dense<0xFF800000> : vector<64xf32>
    %44 = vector.multi_reduction <maximumf>, %43, %cst_20 [1] : vector<64x128xf32> to vector<64xf32>
    %45 = vector.shape_cast %44 : vector<64xf32> to vector<64x1xf32>
    %46 = vector.broadcast %45 : vector<64x1xf32> to vector<64x128xf32>
    %47 = arith.subf %43, %46 : vector<64x128xf32>
    %48 = math.exp %47 : vector<64x128xf32>
    %cst_21 = arith.constant 0.000000e+00 : f32
    %49 = vector.broadcast %cst_21 : f32 to vector<64x128xf32>
    %50 = arith.select %3, %48, %49 : vector<64x128xi1>, vector<64x128xf32>
    %cst_22 = arith.constant dense<0.000000e+00> : vector<64xf32>
    %51 = vector.multi_reduction <add>, %50, %cst_22 [1] : vector<64x128xf32> to vector<64xf32>
    %52 = vector.shape_cast %51 : vector<64xf32> to vector<64x1xf32>
    %53 = vector.extract_strided_slice %4 {offsets = [0, 16], sizes = [128, 16], strides = [1, 1]} : vector<128x32xbf16> to vector<128x16xbf16>
    %54 = arith.truncf %50 : vector<64x128xf32> to vector<64x128xbf16>
    %cst_23 = arith.constant dense<0.000000e+00> : vector<64x16xf32>
    %55 = tpu.matmul %54, %53, %cst_23 {dimension_numbers = #tpu.dot_dimension_numbers<[1], [0], [0], [1], [0, 0, 1, 1], [], []>} : vector<64x128xbf16>, vector<128x16xbf16>, vector<64x16xf32> -> vector<64x16xf32>
    %56 = tpu.reciprocal %52 {approx = true} : vector<64x1xf32> -> vector<64x1xf32>
    %57 = vector.broadcast %56 : vector<64x1xf32> to vector<64x16xf32>
    %58 = arith.mulf %55, %57 : vector<64x16xf32>
    %59 = tpu.concatenate %31, %58 in 1 : vector<64x16xf32>, vector<64x16xf32> -> vector<64x32xf32>
    %c0_24 = arith.constant 0 : index
    %c0_25 = arith.constant 0 : index
    %60 = vector.load %arg5[%c0_24, %c0_25] : memref<64x32xf32, #tpu.memory_space<vmem>>, vector<64x32xf32>
    %61 = arith.addf %59, %60 : vector<64x32xf32>
    %c0_26 = arith.constant 0 : index
    %c0_27 = arith.constant 0 : index
    %62 = vector.load %arg6[%c0_26, %c0_27] : memref<64x32xf32, #tpu.memory_space<vmem>>, vector<64x32xf32>
    tpu.vector_store %arg6[%c0_26, %c0_27], %61 {strides = array<i32>} : memref<64x32xf32, #tpu.memory_space<vmem>>, vector<64x32xf32>,
    return
  }
  func.func @transform_0(%arg0: i32) -> (i32, i32) {
    %c0_i32 = arith.constant 0 : i32
    %c0_i32_0 = arith.constant 0 : i32
    return %arg0, %c0_i32 : i32, i32
  }
  func.func @transform_1(%arg0: i32) -> (i32, i32) {
    %c0_i32 = arith.constant 0 : i32
    %c0_i32_0 = arith.constant 0 : i32
    %c0_i32_1 = arith.constant 0 : i32
    return %c0_i32, %c0_i32_0 : i32, i32
  }
  func.func @transform_2(%arg0: i32) -> (i32, i32) {
    %c0_i32 = arith.constant 0 : i32
    %c0_i32_0 = arith.constant 0 : i32
    return %arg0, %c0_i32 : i32, i32
  }
  func.func @transform_3(%arg0: i32) -> (i32, i32) {
    %c0_i32 = arith.constant 0 : i32
    %c0_i32_0 = arith.constant 0 : i32
    %c0_i32_1 = arith.constant 0 : i32
    return %c0_i32, %c0_i32_0 : i32, i32
  }
  func.func @transform_4(%arg0: i32) -> (i32, i32) {
    %c0_i32 = arith.constant 0 : i32
    %c0_i32_0 = arith.constant 0 : i32
    return %arg0, %c0_i32 : i32, i32
  }
  func.func @transform_5(%arg0: i32) -> (i32, i32) {
    %c0_i32 = arith.constant 0 : i32
    %c0_i32_0 = arith.constant 0 : i32
    return %arg0, %c0_i32 : i32, i32
  }
}

module attributes {stable_mosaic.version = 11 : i64} {
  func.func @gat_src_kernel(%arg0: i32, %arg1: memref<64x16xf32, #tpu.memory_space<vmem>>, %arg2: memref<1x16xf32, #tpu.memory_space<vmem>>, %arg3: memref<1x16xf32, #tpu.memory_space<vmem>>, %arg4: memref<1x16xf32, #tpu.memory_space<vmem>>, %arg5: memref<1x16xf32, #tpu.memory_space<vmem>>, %arg6: memref<16x32xbf16, #tpu.memory_space<vmem>>, %arg7: memref<16x4xf32, #tpu.memory_space<vmem>>, %arg8: memref<64x16xbf16, #tpu.memory_space<vmem>>, %arg9: memref<64x16xf32, #tpu.memory_space<vmem>>, %arg10: memref<64x4xf32, #tpu.memory_space<vmem>>) attributes {dimension_semantics = [#tpu.dimension_semantics<parallel>], iteration_bounds = array<i64: 2>, scalar_prefetch = 0 : i64, scratch_operands = 0 : i64, tpu.core_type = #tpu.core_type<tc>, window_params = [{transform_indices = @transform_0, window_bounds = array<i64: 64, 16>}, {pipeline_mode = #tpu.pipeline_mode<synchronous>, transform_indices = @transform_1, window_bounds = array<i64: 1, 16>}, {pipeline_mode = #tpu.pipeline_mode<synchronous>, transform_indices = @transform_2, window_bounds = array<i64: 1, 16>}, {pipeline_mode = #tpu.pipeline_mode<synchronous>, transform_indices = @transform_3, window_bounds = array<i64: 1, 16>}, {pipeline_mode = #tpu.pipeline_mode<synchronous>, transform_indices = @transform_4, window_bounds = array<i64: 1, 16>}, {pipeline_mode = #tpu.pipeline_mode<synchronous>, transform_indices = @transform_5, window_bounds = array<i64: 16, 32>}, {pipeline_mode = #tpu.pipeline_mode<synchronous>, transform_indices = @transform_6, window_bounds = array<i64: 16, 4>}, {transform_indices = @transform_7, window_bounds = array<i64: 64, 16>}, {transform_indices = @transform_8, window_bounds = array<i64: 64, 16>}, {transform_indices = @transform_9, window_bounds = array<i64: 64, 4>}]} {
    %c0 = arith.constant 0 : index
    %c0_0 = arith.constant 0 : index
    %0 = vector.load %arg1[%c0, %c0_0] : memref<64x16xf32, #tpu.memory_space<vmem>>, vector<64x16xf32>
    %c0_1 = arith.constant 0 : index
    %c0_2 = arith.constant 0 : index
    %1 = vector.load %arg5[%c0_1, %c0_2] : memref<1x16xf32, #tpu.memory_space<vmem>>, vector<1x16xf32>
    %cst = arith.constant 9.99999974E-6 : f32
    %2 = vector.broadcast %cst : f32 to vector<1x16xf32>
    %3 = arith.addf %1, %2 : vector<1x16xf32>
    %4 = math.rsqrt %3 : vector<1x16xf32>
    %c0_3 = arith.constant 0 : index
    %c0_4 = arith.constant 0 : index
    %5 = vector.load %arg4[%c0_3, %c0_4] : memref<1x16xf32, #tpu.memory_space<vmem>>, vector<1x16xf32>
    %6 = vector.broadcast %5 : vector<1x16xf32> to vector<64x16xf32>
    %7 = arith.subf %0, %6 : vector<64x16xf32>
    %8 = vector.broadcast %4 : vector<1x16xf32> to vector<64x16xf32>
    %9 = arith.mulf %7, %8 : vector<64x16xf32>
    %c0_5 = arith.constant 0 : index
    %c0_6 = arith.constant 0 : index
    %10 = vector.load %arg2[%c0_5, %c0_6] : memref<1x16xf32, #tpu.memory_space<vmem>>, vector<1x16xf32>
    %11 = vector.broadcast %10 : vector<1x16xf32> to vector<64x16xf32>
    %12 = arith.mulf %9, %11 : vector<64x16xf32>
    %c0_7 = arith.constant 0 : index
    %c0_8 = arith.constant 0 : index
    %13 = vector.load %arg3[%c0_7, %c0_8] : memref<1x16xf32, #tpu.memory_space<vmem>>, vector<1x16xf32>
    %14 = vector.broadcast %13 : vector<1x16xf32> to vector<64x16xf32>
    %15 = arith.addf %12, %14 : vector<64x16xf32>
    %cst_9 = arith.constant 0.000000e+00 : f32
    %16 = vector.broadcast %cst_9 : f32 to vector<64x16xf32>
    %17 = arith.maximumf %15, %16 : vector<64x16xf32>
    %18 = arith.truncf %17 : vector<64x16xf32> to vector<64x16xbf16>
    %c0_10 = arith.constant 0 : index
    %c0_11 = arith.constant 0 : index
    %19 = vector.load %arg6[%c0_10, %c0_11] : memref<16x32xbf16, #tpu.memory_space<vmem>>, vector<16x32xbf16>
    %cst_12 = arith.constant dense<0.000000e+00> : vector<64x32xf32>
    %20 = tpu.matmul %18, %19, %cst_12 {dimension_numbers = #tpu.dot_dimension_numbers<[1], [0], [0], [1], [0, 0, 1, 1], [], []>} : vector<64x16xbf16>, vector<16x32xbf16>, vector<64x32xf32> -> vector<64x32xf32>
    %21 = vector.extract_strided_slice %20 {offsets = [0, 0], sizes = [64, 16], strides = [1, 1]} : vector<64x32xf32> to vector<64x16xf32>
    %22 = vector.extract_strided_slice %20 {offsets = [0, 16], sizes = [64, 16], strides = [1, 1]} : vector<64x32xf32> to vector<64x16xf32>
    %c0_13 = arith.constant 0 : index
    %c0_14 = arith.constant 0 : index
    %23 = vector.load %arg7[%c0_13, %c0_14] : memref<16x4xf32, #tpu.memory_space<vmem>>, vector<16x4xf32>
    %cst_15 = arith.constant dense<0.000000e+00> : vector<64x4xf32>
    %24 = tpu.matmul %21, %23, %cst_15 {dimension_numbers = #tpu.dot_dimension_numbers<[1], [0], [0], [1], [0, 0, 1, 1], [], []>} : vector<64x16xf32>, vector<16x4xf32>, vector<64x4xf32> -> vector<64x4xf32>
    %25 = arith.truncf %21 : vector<64x16xf32> to vector<64x16xbf16>
    %c0_16 = arith.constant 0 : index
    %c0_17 = arith.constant 0 : index
    %26 = vector.load %arg8[%c0_16, %c0_17] : memref<64x16xbf16, #tpu.memory_space<vmem>>, vector<64x16xbf16>
    tpu.vector_store %arg8[%c0_16, %c0_17], %25 {strides = array<i32>} : memref<64x16xbf16, #tpu.memory_space<vmem>>, vector<64x16xbf16>,
    %c0_18 = arith.constant 0 : index
    %c0_19 = arith.constant 0 : index
    %27 = vector.load %arg9[%c0_18, %c0_19] : memref<64x16xf32, #tpu.memory_space<vmem>>, vector<64x16xf32>
    tpu.vector_store %arg9[%c0_18, %c0_19], %22 {strides = array<i32>} : memref<64x16xf32, #tpu.memory_space<vmem>>, vector<64x16xf32>,
    %c0_20 = arith.constant 0 : index
    %c0_21 = arith.constant 0 : index
    %28 = vector.load %arg10[%c0_20, %c0_21] : memref<64x4xf32, #tpu.memory_space<vmem>>, vector<64x4xf32>
    tpu.vector_store %arg10[%c0_20, %c0_21], %24 {strides = array<i32>} : memref<64x4xf32, #tpu.memory_space<vmem>>, vector<64x4xf32>,
    return
  }
  func.func @transform_0(%arg0: i32) -> (i32, i32) {
    %c0_i32 = arith.constant 0 : i32
    %c0_i32_0 = arith.constant 0 : i32
    return %arg0, %c0_i32 : i32, i32
  }
  func.func @transform_1(%arg0: i32) -> (i32, i32) {
    %c0_i32 = arith.constant 0 : i32
    %c0_i32_0 = arith.constant 0 : i32
    %c0_i32_1 = arith.constant 0 : i32
    return %c0_i32, %c0_i32_0 : i32, i32
  }
  func.func @transform_2(%arg0: i32) -> (i32, i32) {
    %c0_i32 = arith.constant 0 : i32
    %c0_i32_0 = arith.constant 0 : i32
    %c0_i32_1 = arith.constant 0 : i32
    return %c0_i32, %c0_i32_0 : i32, i32
  }
  func.func @transform_3(%arg0: i32) -> (i32, i32) {
    %c0_i32 = arith.constant 0 : i32
    %c0_i32_0 = arith.constant 0 : i32
    %c0_i32_1 = arith.constant 0 : i32
    return %c0_i32, %c0_i32_0 : i32, i32
  }
  func.func @transform_4(%arg0: i32) -> (i32, i32) {
    %c0_i32 = arith.constant 0 : i32
    %c0_i32_0 = arith.constant 0 : i32
    %c0_i32_1 = arith.constant 0 : i32
    return %c0_i32, %c0_i32_0 : i32, i32
  }
  func.func @transform_5(%arg0: i32) -> (i32, i32) {
    %c0_i32 = arith.constant 0 : i32
    %c0_i32_0 = arith.constant 0 : i32
    %c0_i32_1 = arith.constant 0 : i32
    return %c0_i32, %c0_i32_0 : i32, i32
  }
  func.func @transform_6(%arg0: i32) -> (i32, i32) {
    %c0_i32 = arith.constant 0 : i32
    %c0_i32_0 = arith.constant 0 : i32
    %c0_i32_1 = arith.constant 0 : i32
    return %c0_i32, %c0_i32_0 : i32, i32
  }
  func.func @transform_7(%arg0: i32) -> (i32, i32) {
    %c0_i32 = arith.constant 0 : i32
    %c0_i32_0 = arith.constant 0 : i32
    return %arg0, %c0_i32 : i32, i32
  }
  func.func @transform_8(%arg0: i32) -> (i32, i32) {
    %c0_i32 = arith.constant 0 : i32
    %c0_i32_0 = arith.constant 0 : i32
    return %arg0, %c0_i32 : i32, i32
  }
  func.func @transform_9(%arg0: i32) -> (i32, i32) {
    %c0_i32 = arith.constant 0 : i32
    %c0_i32_0 = arith.constant 0 : i32
    return %arg0, %c0_i32 : i32, i32
  }
}

module attributes {stable_mosaic.version = 11 : i64} {
  func.func @gat_attn_kernel(%arg0: i32, %arg1: memref<64x128xbf16, #tpu.memory_space<vmem>>, %arg2: memref<2x128xf32, #tpu.memory_space<vmem>>, %arg3: memref<64x2xf32, #tpu.memory_space<vmem>>, %arg4: memref<128x16xbf16, #tpu.memory_space<vmem>>, %arg5: memref<64x16xf32, #tpu.memory_space<vmem>>, %arg6: memref<64x16xf32, #tpu.memory_space<vmem>>, %arg7: memref<64x16xf32, #tpu.memory_space<vmem>>) attributes {dimension_semantics = [#tpu.dimension_semantics<parallel>], iteration_bounds = array<i64: 2>, scalar_prefetch = 0 : i64, scratch_operands = 0 : i64, tpu.core_type = #tpu.core_type<tc>, window_params = [{transform_indices = @transform_0, window_bounds = array<i64: 64, 128>}, {pipeline_mode = #tpu.pipeline_mode<synchronous>, transform_indices = @transform_1, window_bounds = array<i64: 2, 128>}, {transform_indices = @transform_2, window_bounds = array<i64: 64, 2>}, {pipeline_mode = #tpu.pipeline_mode<synchronous>, transform_indices = @transform_3, window_bounds = array<i64: 128, 16>}, {transform_indices = @transform_4, window_bounds = array<i64: 64, 16>}, {transform_indices = @transform_5, window_bounds = array<i64: 64, 16>}, {transform_indices = @transform_6, window_bounds = array<i64: 64, 16>}]} {
    %c0 = arith.constant 0 : index
    %c0_0 = arith.constant 0 : index
    %0 = vector.load %arg1[%c0, %c0_0] : memref<64x128xbf16, #tpu.memory_space<vmem>>, vector<64x128xbf16>
    %1 = arith.extf %0 : vector<64x128xbf16> to vector<64x128xf32>
    %cst = arith.constant 0.000000e+00 : f32
    %2 = vector.broadcast %cst : f32 to vector<64x128xf32>
    %3 = arith.cmpf ogt, %1, %2 : vector<64x128xf32>
    %c0_1 = arith.constant 0 : index
    %c0_2 = arith.constant 0 : index
    %4 = vector.load %arg4[%c0_1, %c0_2] : memref<128x16xbf16, #tpu.memory_space<vmem>>, vector<128x16xbf16>
    %c0_3 = arith.constant 0 : index
    %c0_4 = arith.constant 0 : index
    %5 = vector.load %arg2[%c0_3, %c0_4] : memref<2x128xf32, #tpu.memory_space<vmem>>, vector<1x128xf32>
    %c0_5 = arith.constant 0 : index
    %c0_6 = arith.constant 0 : index
    %6 = vector.load %arg3[%c0_5, %c0_6] : memref<64x2xf32, #tpu.memory_space<vmem>>, vector<64x1xf32>
    %7 = vector.broadcast %6 : vector<64x1xf32> to vector<64x128xf32>
    %8 = vector.broadcast %5 : vector<1x128xf32> to vector<64x128xf32>
    %9 = arith.addf %7, %8 : vector<64x128xf32>
    %cst_7 = arith.constant 0.000000e+00 : f32
    %10 = vector.broadcast %cst_7 : f32 to vector<64x128xf32>
    %11 = arith.cmpf ogt, %9, %10 : vector<64x128xf32>
    %cst_8 = arith.constant 2.000000e-01 : f32
    %12 = vector.broadcast %cst_8 : f32 to vector<64x128xf32>
    %13 = arith.mulf %12, %9 : vector<64x128xf32>
    %14 = arith.select %11, %9, %13 : vector<64x128xi1>, vector<64x128xf32>
    %cst_9 = arith.constant -1.000000e+30 : f32
    %15 = vector.broadcast %cst_9 : f32 to vector<64x128xf32>
    %16 = arith.select %3, %14, %15 : vector<64x128xi1>, vector<64x128xf32>
    %cst_10 = arith.constant dense<0xFF800000> : vector<64xf32>
    %17 = vector.multi_reduction <maximumf>, %16, %cst_10 [1] : vector<64x128xf32> to vector<64xf32>
    %18 = vector.shape_cast %17 : vector<64xf32> to vector<64x1xf32>
    %19 = vector.broadcast %18 : vector<64x1xf32> to vector<64x128xf32>
    %20 = arith.subf %16, %19 : vector<64x128xf32>
    %21 = math.exp %20 : vector<64x128xf32>
    %cst_11 = arith.constant 0.000000e+00 : f32
    %22 = vector.broadcast %cst_11 : f32 to vector<64x128xf32>
    %23 = arith.select %3, %21, %22 : vector<64x128xi1>, vector<64x128xf32>
    %cst_12 = arith.constant dense<0.000000e+00> : vector<64xf32>
    %24 = vector.multi_reduction <add>, %23, %cst_12 [1] : vector<64x128xf32> to vector<64xf32>
    %25 = vector.shape_cast %24 : vector<64xf32> to vector<64x1xf32>
    %26 = vector.extract_strided_slice %4 {offsets = [0, 0], sizes = [128, 8], strides = [1, 1]} : vector<128x16xbf16> to vector<128x8xbf16>
    %27 = arith.truncf %23 : vector<64x128xf32> to vector<64x128xbf16>
    %cst_13 = arith.constant dense<0.000000e+00> : vector<64x8xf32>
    %28 = tpu.matmul %27, %26, %cst_13 {dimension_numbers = #tpu.dot_dimension_numbers<[1], [0], [0], [1], [0, 0, 1, 1], [], []>} : vector<64x128xbf16>, vector<128x8xbf16>, vector<64x8xf32> -> vector<64x8xf32>
    %29 = tpu.reciprocal %25 {approx = true} : vector<64x1xf32> -> vector<64x1xf32>
    %30 = vector.broadcast %29 : vector<64x1xf32> to vector<64x8xf32>
    %31 = arith.mulf %28, %30 : vector<64x8xf32>
    %c1 = arith.constant 1 : index
    %c0_14 = arith.constant 0 : index
    %32 = vector.load %arg2[%c1, %c0_14] : memref<2x128xf32, #tpu.memory_space<vmem>>, vector<1x128xf32>
    %c0_15 = arith.constant 0 : index
    %c1_16 = arith.constant 1 : index
    %33 = vector.load %arg3[%c0_15, %c1_16] : memref<64x2xf32, #tpu.memory_space<vmem>>, vector<64x1xf32>
    %34 = vector.broadcast %33 : vector<64x1xf32> to vector<64x128xf32>
    %35 = vector.broadcast %32 : vector<1x128xf32> to vector<64x128xf32>
    %36 = arith.addf %34, %35 : vector<64x128xf32>
    %cst_17 = arith.constant 0.000000e+00 : f32
    %37 = vector.broadcast %cst_17 : f32 to vector<64x128xf32>
    %38 = arith.cmpf ogt, %36, %37 : vector<64x128xf32>
    %cst_18 = arith.constant 2.000000e-01 : f32
    %39 = vector.broadcast %cst_18 : f32 to vector<64x128xf32>
    %40 = arith.mulf %39, %36 : vector<64x128xf32>
    %41 = arith.select %38, %36, %40 : vector<64x128xi1>, vector<64x128xf32>
    %cst_19 = arith.constant -1.000000e+30 : f32
    %42 = vector.broadcast %cst_19 : f32 to vector<64x128xf32>
    %43 = arith.select %3, %41, %42 : vector<64x128xi1>, vector<64x128xf32>
    %cst_20 = arith.constant dense<0xFF800000> : vector<64xf32>
    %44 = vector.multi_reduction <maximumf>, %43, %cst_20 [1] : vector<64x128xf32> to vector<64xf32>
    %45 = vector.shape_cast %44 : vector<64xf32> to vector<64x1xf32>
    %46 = vector.broadcast %45 : vector<64x1xf32> to vector<64x128xf32>
    %47 = arith.subf %43, %46 : vector<64x128xf32>
    %48 = math.exp %47 : vector<64x128xf32>
    %cst_21 = arith.constant 0.000000e+00 : f32
    %49 = vector.broadcast %cst_21 : f32 to vector<64x128xf32>
    %50 = arith.select %3, %48, %49 : vector<64x128xi1>, vector<64x128xf32>
    %cst_22 = arith.constant dense<0.000000e+00> : vector<64xf32>
    %51 = vector.multi_reduction <add>, %50, %cst_22 [1] : vector<64x128xf32> to vector<64xf32>
    %52 = vector.shape_cast %51 : vector<64xf32> to vector<64x1xf32>
    %53 = vector.extract_strided_slice %4 {offsets = [0, 8], sizes = [128, 8], strides = [1, 1]} : vector<128x16xbf16> to vector<128x8xbf16>
    %54 = arith.truncf %50 : vector<64x128xf32> to vector<64x128xbf16>
    %cst_23 = arith.constant dense<0.000000e+00> : vector<64x8xf32>
    %55 = tpu.matmul %54, %53, %cst_23 {dimension_numbers = #tpu.dot_dimension_numbers<[1], [0], [0], [1], [0, 0, 1, 1], [], []>} : vector<64x128xbf16>, vector<128x8xbf16>, vector<64x8xf32> -> vector<64x8xf32>
    %56 = tpu.reciprocal %52 {approx = true} : vector<64x1xf32> -> vector<64x1xf32>
    %57 = vector.broadcast %56 : vector<64x1xf32> to vector<64x8xf32>
    %58 = arith.mulf %55, %57 : vector<64x8xf32>
    %59 = tpu.concatenate %31, %58 in 1 : vector<64x8xf32>, vector<64x8xf32> -> vector<64x16xf32>
    %c0_24 = arith.constant 0 : index
    %c0_25 = arith.constant 0 : index
    %60 = vector.load %arg5[%c0_24, %c0_25] : memref<64x16xf32, #tpu.memory_space<vmem>>, vector<64x16xf32>
    %61 = arith.addf %59, %60 : vector<64x16xf32>
    %c0_26 = arith.constant 0 : index
    %c0_27 = arith.constant 0 : index
    %62 = vector.load %arg6[%c0_26, %c0_27] : memref<64x16xf32, #tpu.memory_space<vmem>>, vector<64x16xf32>
    %63 = arith.addf %61, %62 : vector<64x16xf32>
    %c0_28 = arith.constant 0 : index
    %c0_29 = arith.constant 0 : index
    %64 = vector.load %arg7[%c0_28, %c0_29] : memref<64x16xf32, #tpu.memory_space<vmem>>, vector<64x16xf32>
    tpu.vector_store %arg7[%c0_28, %c0_29], %63 {strides = array<i32>} : memref<64x16xf32, #tpu.memory_space<vmem>>, vector<64x16xf32>,
    return
  }
  func.func @transform_0(%arg0: i32) -> (i32, i32) {
    %c0_i32 = arith.constant 0 : i32
    %c0_i32_0 = arith.constant 0 : i32
    return %arg0, %c0_i32 : i32, i32
  }
  func.func @transform_1(%arg0: i32) -> (i32, i32) {
    %c0_i32 = arith.constant 0 : i32
    %c0_i32_0 = arith.constant 0 : i32
    %c0_i32_1 = arith.constant 0 : i32
    return %c0_i32, %c0_i32_0 : i32, i32
  }
  func.func @transform_2(%arg0: i32) -> (i32, i32) {
    %c0_i32 = arith.constant 0 : i32
    %c0_i32_0 = arith.constant 0 : i32
    return %arg0, %c0_i32 : i32, i32
  }
  func.func @transform_3(%arg0: i32) -> (i32, i32) {
    %c0_i32 = arith.constant 0 : i32
    %c0_i32_0 = arith.constant 0 : i32
    %c0_i32_1 = arith.constant 0 : i32
    return %c0_i32, %c0_i32_0 : i32, i32
  }
  func.func @transform_4(%arg0: i32) -> (i32, i32) {
    %c0_i32 = arith.constant 0 : i32
    %c0_i32_0 = arith.constant 0 : i32
    return %arg0, %c0_i32 : i32, i32
  }
  func.func @transform_5(%arg0: i32) -> (i32, i32) {
    %c0_i32 = arith.constant 0 : i32
    %c0_i32_0 = arith.constant 0 : i32
    return %arg0, %c0_i32 : i32, i32
  }
  func.func @transform_6(%arg0: i32) -> (i32, i32) {
    %c0_i32 = arith.constant 0 : i32
    %c0_i32_0 = arith.constant 0 : i32
    return %arg0, %c0_i32 : i32, i32
  }
}

module attributes {stable_mosaic.version = 11 : i64} {
  func.func @gat_src_kernel(%arg0: i32, %arg1: memref<64x32xf32, #tpu.memory_space<vmem>>, %arg2: memref<1x32xf32, #tpu.memory_space<vmem>>, %arg3: memref<1x32xf32, #tpu.memory_space<vmem>>, %arg4: memref<1x32xf32, #tpu.memory_space<vmem>>, %arg5: memref<1x32xf32, #tpu.memory_space<vmem>>, %arg6: memref<32x16xbf16, #tpu.memory_space<vmem>>, %arg7: memref<8x2xf32, #tpu.memory_space<vmem>>, %arg8: memref<64x8xbf16, #tpu.memory_space<vmem>>, %arg9: memref<64x8xf32, #tpu.memory_space<vmem>>, %arg10: memref<64x2xf32, #tpu.memory_space<vmem>>) attributes {dimension_semantics = [#tpu.dimension_semantics<parallel>], iteration_bounds = array<i64: 2>, scalar_prefetch = 0 : i64, scratch_operands = 0 : i64, tpu.core_type = #tpu.core_type<tc>, window_params = [{transform_indices = @transform_0, window_bounds = array<i64: 64, 32>}, {pipeline_mode = #tpu.pipeline_mode<synchronous>, transform_indices = @transform_1, window_bounds = array<i64: 1, 32>}, {pipeline_mode = #tpu.pipeline_mode<synchronous>, transform_indices = @transform_2, window_bounds = array<i64: 1, 32>}, {pipeline_mode = #tpu.pipeline_mode<synchronous>, transform_indices = @transform_3, window_bounds = array<i64: 1, 32>}, {pipeline_mode = #tpu.pipeline_mode<synchronous>, transform_indices = @transform_4, window_bounds = array<i64: 1, 32>}, {pipeline_mode = #tpu.pipeline_mode<synchronous>, transform_indices = @transform_5, window_bounds = array<i64: 32, 16>}, {pipeline_mode = #tpu.pipeline_mode<synchronous>, transform_indices = @transform_6, window_bounds = array<i64: 8, 2>}, {transform_indices = @transform_7, window_bounds = array<i64: 64, 8>}, {transform_indices = @transform_8, window_bounds = array<i64: 64, 8>}, {transform_indices = @transform_9, window_bounds = array<i64: 64, 2>}]} {
    %c0 = arith.constant 0 : index
    %c0_0 = arith.constant 0 : index
    %0 = vector.load %arg1[%c0, %c0_0] : memref<64x32xf32, #tpu.memory_space<vmem>>, vector<64x32xf32>
    %c0_1 = arith.constant 0 : index
    %c0_2 = arith.constant 0 : index
    %1 = vector.load %arg5[%c0_1, %c0_2] : memref<1x32xf32, #tpu.memory_space<vmem>>, vector<1x32xf32>
    %cst = arith.constant 9.99999974E-6 : f32
    %2 = vector.broadcast %cst : f32 to vector<1x32xf32>
    %3 = arith.addf %1, %2 : vector<1x32xf32>
    %4 = math.rsqrt %3 : vector<1x32xf32>
    %c0_3 = arith.constant 0 : index
    %c0_4 = arith.constant 0 : index
    %5 = vector.load %arg4[%c0_3, %c0_4] : memref<1x32xf32, #tpu.memory_space<vmem>>, vector<1x32xf32>
    %6 = vector.broadcast %5 : vector<1x32xf32> to vector<64x32xf32>
    %7 = arith.subf %0, %6 : vector<64x32xf32>
    %8 = vector.broadcast %4 : vector<1x32xf32> to vector<64x32xf32>
    %9 = arith.mulf %7, %8 : vector<64x32xf32>
    %c0_5 = arith.constant 0 : index
    %c0_6 = arith.constant 0 : index
    %10 = vector.load %arg2[%c0_5, %c0_6] : memref<1x32xf32, #tpu.memory_space<vmem>>, vector<1x32xf32>
    %11 = vector.broadcast %10 : vector<1x32xf32> to vector<64x32xf32>
    %12 = arith.mulf %9, %11 : vector<64x32xf32>
    %c0_7 = arith.constant 0 : index
    %c0_8 = arith.constant 0 : index
    %13 = vector.load %arg3[%c0_7, %c0_8] : memref<1x32xf32, #tpu.memory_space<vmem>>, vector<1x32xf32>
    %14 = vector.broadcast %13 : vector<1x32xf32> to vector<64x32xf32>
    %15 = arith.addf %12, %14 : vector<64x32xf32>
    %cst_9 = arith.constant 0.000000e+00 : f32
    %16 = vector.broadcast %cst_9 : f32 to vector<64x32xf32>
    %17 = arith.maximumf %15, %16 : vector<64x32xf32>
    %18 = arith.truncf %17 : vector<64x32xf32> to vector<64x32xbf16>
    %c0_10 = arith.constant 0 : index
    %c0_11 = arith.constant 0 : index
    %19 = vector.load %arg6[%c0_10, %c0_11] : memref<32x16xbf16, #tpu.memory_space<vmem>>, vector<32x16xbf16>
    %cst_12 = arith.constant dense<0.000000e+00> : vector<64x16xf32>
    %20 = tpu.matmul %18, %19, %cst_12 {dimension_numbers = #tpu.dot_dimension_numbers<[1], [0], [0], [1], [0, 0, 1, 1], [], []>} : vector<64x32xbf16>, vector<32x16xbf16>, vector<64x16xf32> -> vector<64x16xf32>
    %21 = vector.extract_strided_slice %20 {offsets = [0, 0], sizes = [64, 8], strides = [1, 1]} : vector<64x16xf32> to vector<64x8xf32>
    %22 = vector.extract_strided_slice %20 {offsets = [0, 8], sizes = [64, 8], strides = [1, 1]} : vector<64x16xf32> to vector<64x8xf32>
    %c0_13 = arith.constant 0 : index
    %c0_14 = arith.constant 0 : index
    %23 = vector.load %arg7[%c0_13, %c0_14] : memref<8x2xf32, #tpu.memory_space<vmem>>, vector<8x2xf32>
    %cst_15 = arith.constant dense<0.000000e+00> : vector<64x2xf32>
    %24 = tpu.matmul %21, %23, %cst_15 {dimension_numbers = #tpu.dot_dimension_numbers<[1], [0], [0], [1], [0, 0, 1, 1], [], []>} : vector<64x8xf32>, vector<8x2xf32>, vector<64x2xf32> -> vector<64x2xf32>
    %25 = arith.truncf %21 : vector<64x8xf32> to vector<64x8xbf16>
    %c0_16 = arith.constant 0 : index
    %c0_17 = arith.constant 0 : index
    %26 = vector.load %arg8[%c0_16, %c0_17] : memref<64x8xbf16, #tpu.memory_space<vmem>>, vector<64x8xbf16>
    tpu.vector_store %arg8[%c0_16, %c0_17], %25 {strides = array<i32>} : memref<64x8xbf16, #tpu.memory_space<vmem>>, vector<64x8xbf16>,
    %c0_18 = arith.constant 0 : index
    %c0_19 = arith.constant 0 : index
    %27 = vector.load %arg9[%c0_18, %c0_19] : memref<64x8xf32, #tpu.memory_space<vmem>>, vector<64x8xf32>
    tpu.vector_store %arg9[%c0_18, %c0_19], %22 {strides = array<i32>} : memref<64x8xf32, #tpu.memory_space<vmem>>, vector<64x8xf32>,
    %c0_20 = arith.constant 0 : index
    %c0_21 = arith.constant 0 : index
    %28 = vector.load %arg10[%c0_20, %c0_21] : memref<64x2xf32, #tpu.memory_space<vmem>>, vector<64x2xf32>
    tpu.vector_store %arg10[%c0_20, %c0_21], %24 {strides = array<i32>} : memref<64x2xf32, #tpu.memory_space<vmem>>, vector<64x2xf32>,
    return
  }
  func.func @transform_0(%arg0: i32) -> (i32, i32) {
    %c0_i32 = arith.constant 0 : i32
    %c0_i32_0 = arith.constant 0 : i32
    return %arg0, %c0_i32 : i32, i32
  }
  func.func @transform_1(%arg0: i32) -> (i32, i32) {
    %c0_i32 = arith.constant 0 : i32
    %c0_i32_0 = arith.constant 0 : i32
    %c0_i32_1 = arith.constant 0 : i32
    return %c0_i32, %c0_i32_0 : i32, i32
  }
  func.func @transform_2(%arg0: i32) -> (i32, i32) {
    %c0_i32 = arith.constant 0 : i32
    %c0_i32_0 = arith.constant 0 : i32
    %c0_i32_1 = arith.constant 0 : i32
    return %c0_i32, %c0_i32_0 : i32, i32
  }
  func.func @transform_3(%arg0: i32) -> (i32, i32) {
    %c0_i32 = arith.constant 0 : i32
    %c0_i32_0 = arith.constant 0 : i32
    %c0_i32_1 = arith.constant 0 : i32
    return %c0_i32, %c0_i32_0 : i32, i32
  }
  func.func @transform_4(%arg0: i32) -> (i32, i32) {
    %c0_i32 = arith.constant 0 : i32
    %c0_i32_0 = arith.constant 0 : i32
    %c0_i32_1 = arith.constant 0 : i32
    return %c0_i32, %c0_i32_0 : i32, i32
  }
  func.func @transform_5(%arg0: i32) -> (i32, i32) {
    %c0_i32 = arith.constant 0 : i32
    %c0_i32_0 = arith.constant 0 : i32
    %c0_i32_1 = arith.constant 0 : i32
    return %c0_i32, %c0_i32_0 : i32, i32
  }
  func.func @transform_6(%arg0: i32) -> (i32, i32) {
    %c0_i32 = arith.constant 0 : i32
    %c0_i32_0 = arith.constant 0 : i32
    %c0_i32_1 = arith.constant 0 : i32
    return %c0_i32, %c0_i32_0 : i32, i32
  }
  func.func @transform_7(%arg0: i32) -> (i32, i32) {
    %c0_i32 = arith.constant 0 : i32
    %c0_i32_0 = arith.constant 0 : i32
    return %arg0, %c0_i32 : i32, i32
  }
  func.func @transform_8(%arg0: i32) -> (i32, i32) {
    %c0_i32 = arith.constant 0 : i32
    %c0_i32_0 = arith.constant 0 : i32
    return %arg0, %c0_i32 : i32, i32
  }
  func.func @transform_9(%arg0: i32) -> (i32, i32) {
    %c0_i32 = arith.constant 0 : i32
    %c0_i32_0 = arith.constant 0 : i32
    return %arg0, %c0_i32 : i32, i32
  }
}

module attributes {stable_mosaic.version = 11 : i64} {
  func.func @gat_attn_kernel(%arg0: i32, %arg1: memref<64x128xbf16, #tpu.memory_space<vmem>>, %arg2: memref<1x128xf32, #tpu.memory_space<vmem>>, %arg3: memref<64x1xf32, #tpu.memory_space<vmem>>, %arg4: memref<128x8xbf16, #tpu.memory_space<vmem>>, %arg5: memref<64x8xf32, #tpu.memory_space<vmem>>, %arg6: memref<64x8xf32, #tpu.memory_space<vmem>>) attributes {dimension_semantics = [#tpu.dimension_semantics<parallel>], iteration_bounds = array<i64: 2>, scalar_prefetch = 0 : i64, scratch_operands = 0 : i64, tpu.core_type = #tpu.core_type<tc>, window_params = [{transform_indices = @transform_0, window_bounds = array<i64: 64, 128>}, {pipeline_mode = #tpu.pipeline_mode<synchronous>, transform_indices = @transform_1, window_bounds = array<i64: 1, 128>}, {transform_indices = @transform_2, window_bounds = array<i64: 64, 1>}, {pipeline_mode = #tpu.pipeline_mode<synchronous>, transform_indices = @transform_3, window_bounds = array<i64: 128, 8>}, {transform_indices = @transform_4, window_bounds = array<i64: 64, 8>}, {transform_indices = @transform_5, window_bounds = array<i64: 64, 8>}]} {
    %c0 = arith.constant 0 : index
    %c0_0 = arith.constant 0 : index
    %0 = vector.load %arg1[%c0, %c0_0] : memref<64x128xbf16, #tpu.memory_space<vmem>>, vector<64x128xbf16>
    %1 = arith.extf %0 : vector<64x128xbf16> to vector<64x128xf32>
    %cst = arith.constant 0.000000e+00 : f32
    %2 = vector.broadcast %cst : f32 to vector<64x128xf32>
    %3 = arith.cmpf ogt, %1, %2 : vector<64x128xf32>
    %c0_1 = arith.constant 0 : index
    %c0_2 = arith.constant 0 : index
    %4 = vector.load %arg4[%c0_1, %c0_2] : memref<128x8xbf16, #tpu.memory_space<vmem>>, vector<128x8xbf16>
    %c0_3 = arith.constant 0 : index
    %c0_4 = arith.constant 0 : index
    %5 = vector.load %arg2[%c0_3, %c0_4] : memref<1x128xf32, #tpu.memory_space<vmem>>, vector<1x128xf32>
    %c0_5 = arith.constant 0 : index
    %c0_6 = arith.constant 0 : index
    %6 = vector.load %arg3[%c0_5, %c0_6] : memref<64x1xf32, #tpu.memory_space<vmem>>, vector<64x1xf32>
    %7 = vector.broadcast %6 : vector<64x1xf32> to vector<64x128xf32>
    %8 = vector.broadcast %5 : vector<1x128xf32> to vector<64x128xf32>
    %9 = arith.addf %7, %8 : vector<64x128xf32>
    %cst_7 = arith.constant 0.000000e+00 : f32
    %10 = vector.broadcast %cst_7 : f32 to vector<64x128xf32>
    %11 = arith.cmpf ogt, %9, %10 : vector<64x128xf32>
    %cst_8 = arith.constant 2.000000e-01 : f32
    %12 = vector.broadcast %cst_8 : f32 to vector<64x128xf32>
    %13 = arith.mulf %12, %9 : vector<64x128xf32>
    %14 = arith.select %11, %9, %13 : vector<64x128xi1>, vector<64x128xf32>
    %cst_9 = arith.constant -1.000000e+30 : f32
    %15 = vector.broadcast %cst_9 : f32 to vector<64x128xf32>
    %16 = arith.select %3, %14, %15 : vector<64x128xi1>, vector<64x128xf32>
    %cst_10 = arith.constant dense<0xFF800000> : vector<64xf32>
    %17 = vector.multi_reduction <maximumf>, %16, %cst_10 [1] : vector<64x128xf32> to vector<64xf32>
    %18 = vector.shape_cast %17 : vector<64xf32> to vector<64x1xf32>
    %19 = vector.broadcast %18 : vector<64x1xf32> to vector<64x128xf32>
    %20 = arith.subf %16, %19 : vector<64x128xf32>
    %21 = math.exp %20 : vector<64x128xf32>
    %cst_11 = arith.constant 0.000000e+00 : f32
    %22 = vector.broadcast %cst_11 : f32 to vector<64x128xf32>
    %23 = arith.select %3, %21, %22 : vector<64x128xi1>, vector<64x128xf32>
    %cst_12 = arith.constant dense<0.000000e+00> : vector<64xf32>
    %24 = vector.multi_reduction <add>, %23, %cst_12 [1] : vector<64x128xf32> to vector<64xf32>
    %25 = vector.shape_cast %24 : vector<64xf32> to vector<64x1xf32>
    %26 = arith.truncf %23 : vector<64x128xf32> to vector<64x128xbf16>
    %cst_13 = arith.constant dense<0.000000e+00> : vector<64x8xf32>
    %27 = tpu.matmul %26, %4, %cst_13 {dimension_numbers = #tpu.dot_dimension_numbers<[1], [0], [0], [1], [0, 0, 1, 1], [], []>} : vector<64x128xbf16>, vector<128x8xbf16>, vector<64x8xf32> -> vector<64x8xf32>
    %28 = tpu.reciprocal %25 {approx = true} : vector<64x1xf32> -> vector<64x1xf32>
    %29 = vector.broadcast %28 : vector<64x1xf32> to vector<64x8xf32>
    %30 = arith.mulf %27, %29 : vector<64x8xf32>
    %c0_14 = arith.constant 0 : index
    %c0_15 = arith.constant 0 : index
    %31 = vector.load %arg5[%c0_14, %c0_15] : memref<64x8xf32, #tpu.memory_space<vmem>>, vector<64x8xf32>
    %32 = arith.addf %30, %31 : vector<64x8xf32>
    %c0_16 = arith.constant 0 : index
    %c0_17 = arith.constant 0 : index
    %33 = vector.load %arg6[%c0_16, %c0_17] : memref<64x8xf32, #tpu.memory_space<vmem>>, vector<64x8xf32>
    tpu.vector_store %arg6[%c0_16, %c0_17], %32 {strides = array<i32>} : memref<64x8xf32, #tpu.memory_space<vmem>>, vector<64x8xf32>,
    return
  }
  func.func @transform_0(%arg0: i32) -> (i32, i32) {
    %c0_i32 = arith.constant 0 : i32
    %c0_i32_0 = arith.constant 0 : i32
    return %arg0, %c0_i32 : i32, i32
  }
  func.func @transform_1(%arg0: i32) -> (i32, i32) {
    %c0_i32 = arith.constant 0 : i32
    %c0_i32_0 = arith.constant 0 : i32
    %c0_i32_1 = arith.constant 0 : i32
    return %c0_i32, %c0_i32_0 : i32, i32
  }
  func.func @transform_2(%arg0: i32) -> (i32, i32) {
    %c0_i32 = arith.constant 0 : i32
    %c0_i32_0 = arith.constant 0 : i32
    return %arg0, %c0_i32 : i32, i32
  }
  func.func @transform_3(%arg0: i32) -> (i32, i32) {
    %c0_i32 = arith.constant 0 : i32
    %c0_i32_0 = arith.constant 0 : i32
    %c0_i32_1 = arith.constant 0 : i32
    return %c0_i32, %c0_i32_0 : i32, i32
  }
  func.func @transform_4(%arg0: i32) -> (i32, i32) {
    %c0_i32 = arith.constant 0 : i32
    %c0_i32_0 = arith.constant 0 : i32
    return %arg0, %c0_i32 : i32, i32
  }
  func.func @transform_5(%arg0: i32) -> (i32, i32) {
    %c0_i32 = arith.constant 0 : i32
    %c0_i32_0 = arith.constant 0 : i32
    return %arg0, %c0_i32 : i32, i32
  }
}

</mosaic_0001>

<bundles_post_ra>
// kernel: revgat_forward.8
= control target key start
LH: loop header
LB: loop body
LE: loop exit
PB: predicated region body
PF: predicated region fallthrough
CT: control target
= control target key end

     0   :  { %s796_s28 = smov 0   ;;  %s900_s0 = inlined_call_operand.vmem [shape: f32[128,32], index: 0, kind: input, shape index: {}]   ;;  %s901_s1 = inlined_call_operand.vmem [shape: f32[1,32], index: 1, kind: input, shape index: {}, may-alias: {1,4}]   ;;  %s902_s2 = inlined_call_operand.vmem [shape: f32[1,32], index: 2, kind: input, shape index: {}, may-alias: {2,3}]   ;;  %s903_s3 = inlined_call_operand.vmem [shape: f32[1,32], index: 3, kind: input, shape index: {}, may-alias: {2,3}]   ;;  %s904_s4 = inlined_call_operand.vmem [shape: f32[1,32], index: 4, kind: input, shape index: {}, may-alias: {1,4}]   ;;  %s905_s5 = inlined_call_operand.vmem [shape: bf16[32,64], index: 5, kind: input, shape index: {}]   ;;  %s906_s6 = inlined_call_operand.vmem [shape: f32[32,4], index: 6, kind: input, shape index: {}]   ;;  %s907_s7 = inlined_call_operand.vmem [shape: bf16[128,32], index: 7, kind: output, shape index: {0}]   ;;  %s908_s8 = inlined_call_operand.vmem [shape: f32[128,32], index: 8, kind: output, shape index: {1}]   ;;  %s909_s9 = inlined_call_operand.vmem [shape: f32[128,4], index: 9, kind: output, shape index: {2}]  }
   0x1 LB: > { %s685_s3 = sadd.s32 4294967295, %s743_s28   ;;  %p689_p0 = scmp.ge.s32.totalorder %s743_s28, 1  ;;  %s743_s28 = sphi %s796_s28, %s20_s28  }
   0x2   : > { %p293_p1 = scmp.lt.s32.totalorder %s743_s28, 3 }
   0x4   : > { %p294_p2 = pnand %p689_p0, %p293_p1 }
   0x5   : > { %s690_s30 = sshll.u32 (!%p294_p2), %s685_s3, 3  ;;  %s745_s25 = smov (!%p294_p2), 96  }
   0x6   : > { %297 = sbr.rel (%p294_p2) target bundleno = 309 (0x135), region = 48  ;;  %p340_p3 = scmp.lt.s32.totalorder (!%p294_p2), %s690_s30, 15 }
   0xb   : > { %v721_v0 = vld [vmem:[%s905_s5 + $0x8] sm:$0xff]  ;;  %v437_v1 = vld [vmem:[%s906_s6 + $0x18] sm:$0xff]  ;;  %v720_v2 = vld [vmem:[%s905_s5] sm:$0xff]  ;;  %s911_s30 = smov (!%p340_p3, %s690_s30), 15  ;;  %vm392_vm0 = vcmask 261120   ;;  %vm511_vm1 = vcmask 257024  }
   0xc   : > { %474 = vmatpush.msra.mxu1 %v437_v1  ;;  %724 = vmatpush.msra.mxu3 %v437_v1  ;;  %s816_s14 = sshll.u32 %s911_s30, 3  ;;  %v436_v15 = vld [vmem:[%s906_s6 + $0x10] sm:$0xff]  ;;  %v435_v16 = vld [vmem:[%s906_s6 + $0x8] sm:$0xff]  ;;  %v434_v17 = vld [vmem:[%s906_s6] sm:$0xff]  ;;  %s693_s24 = sshll.u32 %s911_s30, 2  ;;  %vm552_vm2 = vcmask 31744  }
   0xd   : > { %411 = vmatpush.bf16.msra.mxu0 %v721_v0  ;;  %722 = vmatpush.bf16.msra.mxu2 %v721_v0  ;;  %s343_s17 = scalar_lea.vmem %s900_s0, %s816_s14  ;;  %s841_s27 = scalar_lea.vmem %s907_s7, %s693_s24 }
   0xe   : > { %v364_v3 = vld [vmem:[%s343_s17] sm:$0xff]  ;;  %v365_v4 = vld [vmem:[%s343_s17 + $0x8] sm:$0xff]  ;;  %v366_v9 = vld [vmem:[%s343_s17 + $0x10] sm:$0xff]  ;;  %475 = vmatpush.msra.mxu1 %v436_v15  ;;  %725 = vmatpush.msra.mxu3 %v436_v15  ;;  %s355_s4 = scalar_lea.vmem %s908_s8, %s816_s14  ;;  %s361_s10 = scalar_lea.vmem %s909_s9, %s816_s14 }
   0xf   : > { %v368_v5 = vld [vmem:[%s343_s17 + $0x20] sm:$0xff]  ;;  %v372_v6 = vpack.c.bf16 %v365_v4, %v364_v3  ;;  %v369_v7 = vld [vmem:[%s343_s17 + $0x28] sm:$0xff]  ;;  %v367_v10 = vld [vmem:[%s343_s17 + $0x18] sm:$0xff] }
  0x10   : > { %v374_v8 = vpack.c.bf16 %v369_v7, %v368_v5  ;;  %v370_v11 = vld [vmem:[%s343_s17 + $0x30] sm:$0xff]  ;;  %v371_v12 = vld [vmem:[%s343_s17 + $0x38] sm:$0xff]  ;;  %v373_v13 = vpack.c.bf16 %v367_v10, %v366_v9  ;;  %476 = vmatpush.msra.mxu1 %v435_v16  ;;  %726 = vmatpush.msra.mxu3 %v435_v16 }
  0x11   : > { %412 = vmatpush.bf16.msra.mxu0 %v720_v2  ;;  %723 = vmatpush.bf16.msra.mxu2 %v720_v2  ;;  %v375_v14 = vpack.c.bf16 %v371_v12, %v370_v11 }
  0x12   : > { %477 = vmatpush.msra.mxu1 %v434_v17  ;;  %727 = vmatpush.msra.mxu3 %v434_v17 }
  0x14   : > { %706 = vmatmul.msk.bf16.vlgmr.msra.gmra.mxu0 %vm392_vm0, %v372_v6  ;;  %708 = vmatmul.msk.bf16.vlgmr.msra.gmra.mxu2 %vm392_vm0, %v374_v8 }
  0x24   : > { %707 = vmatmul.msk.bf16.gmra.mxu0 %vm392_vm0, %v373_v13  ;;  %709 = vmatmul.msk.bf16.gmra.mxu2 %vm392_vm0, %v375_v14 }
  0x91   : > { %v414_v18 = vpop.f32.mrf.mxu0 }
  0x92   : > { %v503_v19 = vpack.c.bf16 %v414_v18, %v414_v18  ;;  %520 = vrot.lane.b32.xlu0 %v414_v18, %s745_s25  ;;  %710 = vmatmul.msk.f32.vlgmr.msra.gmra.mxu1 %vm392_vm0, %v414_v18 }
  0x94   : > { %512 = vst.msk [vmem:[%s841_s27] sm:$0xf] %vm511_vm1, %v503_v19 }
  0x97   : > { %v424_v20 = vpop.f32.mrf.mxu2 }
  0x98   : > { %v507_v21 = vpack.c.bf16 %v424_v20, %v424_v20  ;;  %528 = vrot.lane.b32.xlu2 %v424_v20, %s745_s25  ;;  %714 = vmatmul.msk.f32.vlgmr.msra.gmra.mxu3 %vm392_vm0, %v424_v20 }
  0x99   : > { %v416_v22 = vpop.f32.mrf.mxu0 }
  0x9a   : > { %v504_v23 = vpack.c.bf16 %v416_v22, %v416_v22  ;;  %522 = vrot.lane.b32.xlu0 %v416_v22, %s745_s25  ;;  %711 = vmatmul.msk.f32.gmra.mxu1 %vm392_vm0, %v416_v22  ;;  %516 = vst.msk [vmem:[%s841_s27 + $0x10] sm:$0xf] %vm511_vm1, %v507_v21 }
  0x9c   : > { %513 = vst.msk [vmem:[%s841_s27 + $0x4] sm:$0xf] %vm511_vm1, %v504_v23 }
  0x9f   : > { %v426_v24 = vpop.f32.mrf.mxu2 }
  0xa0   : > { %v508_v25 = vpack.c.bf16 %v426_v24, %v426_v24  ;;  %530 = vrot.lane.b32.xlu2 %v426_v24, %s745_s25  ;;  %715 = vmatmul.msk.f32.gmra.mxu3 %vm392_vm0, %v426_v24 }
  0xa1   : > { %v419_v26 = vpop.f32.mrf.mxu0 }
  0xa2   : > { %v505_v27 = vpack.c.bf16 %v419_v26, %v419_v26  ;;  %524 = vrot.lane.b32.xlu1 %v419_v26, %s745_s25  ;;  %712 = vmatmul.msk.f32.gmra.mxu1 %vm392_vm0, %v419_v26  ;;  %517 = vst.msk [vmem:[%s841_s27 + $0x14] sm:$0xf] %vm511_vm1, %v508_v25 }
  0xa4   : > { %514 = vst.msk [vmem:[%s841_s27 + $0x8] sm:$0xf] %vm511_vm1, %v505_v27 }
  0xa7   : > { %v429_v28 = vpop.f32.mrf.mxu2 }
  0xa8   : > { %v509_v29 = vpack.c.bf16 %v429_v28, %v429_v28  ;;  %716 = vmatmul.msk.f32.gmra.mxu3 %vm392_vm0, %v429_v28  ;;  %532 = vrot.lane.b32.xlu0 %v429_v28, %s745_s25 }
  0xa9   : > { %v421_v30 = vpop.f32.mrf.mxu0 }
  0xaa   : > { %v506_v31 = vpack.c.bf16 %v421_v30, %v421_v30  ;;  %526 = vrot.lane.b32.xlu1 %v421_v30, %s745_s25  ;;  %713 = vmatmul.msk.f32.gmra.mxu1 %vm392_vm0, %v421_v30  ;;  %518 = vst.msk [vmem:[%s841_s27 + $0x18] sm:$0xf] %vm511_vm1, %v509_v29 }
  0xac   : > { %515 = vst.msk [vmem:[%s841_s27 + $0xc] sm:$0xf] %vm511_vm1, %v506_v31 }
  0xaf   : > { %v431_v32 = vpop.f32.mrf.mxu2 }
  0xb0   : > { %v510_v33 = vpack.c.bf16 %v431_v32, %v431_v32  ;;  %717 = vmatmul.msk.f32.gmra.mxu3 %vm392_vm0, %v431_v32 }
  0xb2   : > { %534 = vrot.lane.b32.xlu1 %v431_v32, %s745_s25  ;;  %519 = vst.msk [vmem:[%s841_s27 + $0x1c] sm:$0xf] %vm511_vm1, %v510_v33 }
  0xf2   : > { %v529_v34 = vpop.permute.xlu2 %528 }
  0xf3   : > { %548 = vst.msk [vmem:[%s355_s4 + $0x20] sm:$0xff] %vm392_vm0, %v529_v34 }
  0xfa   : > { %v531_v35 = vpop.permute.xlu2 %530 }
  0xfb   : > { %549 = vst.msk [vmem:[%s355_s4 + $0x28] sm:$0xff] %vm392_vm0, %v531_v35 }
 0x104   : > { %v521_v36 = vpop.permute.xlu0 %520 }
 0x105   : > { %544 = vst.msk [vmem:[%s355_s4] sm:$0xff] %vm392_vm0, %v521_v36 }
 0x10c   : > { %v523_v37 = vpop.permute.xlu0 %522 }
 0x10d   : > { %545 = vst.msk [vmem:[%s355_s4 + $0x8] sm:$0xff] %vm392_vm0, %v523_v37 }
 0x10f   : > { %v479_v38 = vpop.f32.mrf.mxu1 }
 0x110   : > { %553 = vst.msk [vmem:[%s361_s10] sm:$0xff] %vm552_vm2, %v479_v38 }
 0x114   : > { %v525_v39 = vpop.permute.xlu1 %524 }
 0x115   : > { %546 = vst.msk [vmem:[%s355_s4 + $0x10] sm:$0xff] %vm392_vm0, %v525_v39 }
 0x117   : > { %v482_v40 = vpop.f32.mrf.mxu1 }
 0x118   : > { %554 = vst.msk [vmem:[%s361_s10 + $0x8] sm:$0xff] %vm552_vm2, %v482_v40 }
 0x11a   : > { %v533_v41 = vpop.permute.xlu0 %532 }
 0x11b   : > { %550 = vst.msk [vmem:[%s355_s4 + $0x30] sm:$0xff] %vm392_vm0, %v533_v41  ;;  %v491_v42 = vpop.f32.mrf.mxu3 }
 0x11c   : > { %v527_v43 = vpop.permute.xlu1 %526  ;;  %557 = vst.msk [vmem:[%s361_s10 + $0x20] sm:$0xff] %vm552_vm2, %v491_v42 }
 0x11d   : > { %547 = vst.msk [vmem:[%s355_s4 + $0x18] sm:$0xff] %vm392_vm0, %v527_v43 }
 0x11f   : > { %v485_v44 = vpop.f32.mrf.mxu1 }
 0x120   : > { %555 = vst.msk [vmem:[%s361_s10 + $0x10] sm:$0xff] %vm552_vm2, %v485_v44 }
 0x123   : > { %v494_v45 = vpop.f32.mrf.mxu3 }
 0x124   : > { %v535_v46 = vpop.permute.xlu1 %534  ;;  %558 = vst.msk [vmem:[%s361_s10 + $0x28] sm:$0xff] %vm552_vm2, %v494_v45 }
 0x125   : > { %551 = vst.msk [vmem:[%s355_s4 + $0x38] sm:$0xff] %vm392_vm0, %v535_v46 }
 0x127   : > { %v488_v47 = vpop.f32.mrf.mxu1 }
 0x128   : > { %556 = vst.msk [vmem:[%s361_s10 + $0x18] sm:$0xff] %vm552_vm2, %v488_v47 }
 0x12b   : > { %v497_v48 = vpop.f32.mrf.mxu3 }
 0x12c   : > { %559 = vst.msk [vmem:[%s361_s10 + $0x30] sm:$0xff] %vm552_vm2, %v497_v48 }
 0x133   : > { %v500_v49 = vpop.f32.mrf.mxu3 }
 0x134   : > { %560 = vst.msk [vmem:[%s361_s10 + $0x38] sm:$0xff] %vm552_vm2, %v500_v49 }
 0x135 PF: > { %s20_s28 = sadd.s32 1, %s743_s28  }
 0x136   : > { %p17_p4 = scmp.ge.s32.totalorder %s20_s28, 4  }
 0x138   :  { %19 = sbr.rel (!%p17_p4) target bundleno = 1 (0x1), region = 102 }

// kernel: revgat_forward.9
= control target key start
LH: loop header
LB: loop body
LE: loop exit
PB: predicated region body
PF: predicated region fallthrough
CT: control target
= control target key end

     0   :  { %s1161_s18 = smov 0   ;;  %s1548_s0 = inlined_call_operand.vmem [shape: bf16[128,128], index: 0, kind: input, shape index: {}]   ;;  %s1549_s1 = inlined_call_operand.vmem [shape: f32[2,128], index: 1, kind: input, shape index: {}]   ;;  %s1550_s2 = inlined_call_operand.vmem [shape: f32[128,2], index: 2, kind: input, shape index: {}]   ;;  %s1551_s3 = inlined_call_operand.vmem [shape: bf16[128,32], index: 3, kind: input, shape index: {}]   ;;  %s1552_s4 = inlined_call_operand.vmem [shape: f32[128,32], index: 4, kind: input, shape index: {}]   ;;  %s1553_s5 = inlined_call_operand.vmem [shape: f32[128,32], index: 5, kind: output, shape index: {}]  }
   0x1 LB: > { %s920_s19 = sadd.s32 4294967295, %s1125_s18   ;;  %p924_p0 = scmp.ge.s32.totalorder %s1125_s18, 1  ;;  %s1125_s18 = sphi %s1161_s18, %s15_s18  }
   0x2   : > { %p210_p1 = scmp.lt.s32.totalorder %s1125_s18, 3 }
   0x4   : > { %p211_p2 = pnand %p924_p0, %p210_p1 }
   0x5   : > { %s925_s20 = sshll.u32 (!%p211_p2), %s920_s19, 3  ;;  %s1128_s12 = smov (!%p211_p2), 112  }
   0x6   : > { %214 = sbr.rel (%p211_p2) target bundleno = 611 (0x263), region = 40  ;;  %p249_p3 = scmp.lt.s32.totalorder (!%p211_p2), %s925_s20, 15 }
   0x7   : > { %s1130_s27 = smov (!%p211_p2), 16  }
   0xb   : > { %v998_v0 = vld [vmem:[%s1551_s3 + $0x38] sm:$0xff]  ;;  %v1127_v1 = vmov 1   ;;  %s1571_s20 = smov (!%p249_p3, %s925_s20), 15  ;;  %v997_v2 = vld [vmem:[%s1551_s3 + $0x30] sm:$0xff]  ;;  %v996_v6 = vld [vmem:[%s1551_s3 + $0x28] sm:$0xff]  ;;  %v1129_v15 = vmov 0  }
   0xc   : > { %1047 = vset.pattern.permute.xlu1 %v1127_v1  ;;  %1046 = vset.pattern.permute.xlu0 %v1127_v1  ;;  %s1181_s25 = sshll.u32 %s1571_s20, 3  ;;  %v995_v7 = vld [vmem:[%s1551_s3 + $0x20] sm:$0xff]  ;;  %v994_v11 = vld [vmem:[%s1551_s3 + $0x18] sm:$0xff]  ;;  %v993_v12 = vld [vmem:[%s1551_s3 + $0x10] sm:$0xff]  ;;  %s926_s17 = sshll.u32 %s1571_s20, 2 }
   0xd   : > { %1048 = vset.pattern.permute.xlu2 %v1127_v1  ;;  %1018 = vmatpush.bf16.msra.mxu2 %v998_v0  ;;  %s258_s28 = scalar_lea.vmem %s1550_s2, %s1181_s25  ;;  %v992_v16 = vld [vmem:[%s1551_s3 + $0x8] sm:$0xff]  ;;  %v1218_v17 = vld [vmem:[%s1549_s1 + $0x1] ss:$0 sm:$0xff]  ;;  %s1230_s22 = scalar_lea.vmem %s1548_s0, %s926_s17 }
   0xe   : > { %518 = vmatpush.bf16.msra.mxu0 %v998_v0  ;;  %v317_v3 = vld [vmem:[%s258_s28 + $0x20] sm:$0xff]  ;;  %v319_v5 = vld [vmem:[%s258_s28 + $0x30] sm:$0xff]  ;;  %v318_v8 = vld [vmem:[%s258_s28 + $0x28] sm:$0xff]  ;;  %s1505_s30 = scalar_lea.vmem %s1552_s4, %s1181_s25  ;;  %s1512_s8 = scalar_lea.vmem %s1553_s5, %s1181_s25 }
   0xf   : > { %v313_v4 = vld [vmem:[%s258_s28] sm:$0xff]  ;;  %581 = vperm.xlu0 %1046, %v317_v3   ;;  %589 = vperm.xlu2 %1048, %v319_v5   ;;  %v314_v9 = vld [vmem:[%s258_s28 + $0x8] sm:$0xff]  ;;  %v320_v10 = vld [vmem:[%s258_s28 + $0x38] sm:$0xff] }
  0x10   : > { %565 = vperm.xlu1 %1047, %v313_v4   ;;  %v1199_v13 = vld [vmem:[%s258_s28 + $0x10] sm:$0xff]  ;;  %v1201_v14 = vld [vmem:[%s258_s28 + $0x18] sm:$0xff]  ;;  %v1000_v24 = vld [vmem:[%s1230_s22] sm:$0xff]  }
  0x11   : > { %1019 = vmatpush.bf16.msra.mxu2 %v997_v2  ;;  %v1016_v23 = vld [vmem:[%s1230_s22 + $0x10] sm:$0xff]   ;;  %v1001_v26 = vunpack.c.l.bf16 %v1000_v24  ;;  %v991_v35 = vld [vmem:[%s1551_s3] sm:$0xff]  ;;  %v1002_v41 = vunpack.c.h.bf16 %v1000_v24 }
  0x12   : > { %519 = vmatpush.bf16.msra.mxu0 %v997_v2  ;;  %v1009_v25 = vunpack.c.l.bf16 %v1016_v23  ;;  %v1010_v40 = vunpack.c.h.bf16 %v1016_v23 }
  0x13   : > { %vm1240_vm1 = vcmp.gt.f32.partialorder %v1001_v26, 0.0  ;;  %vm1263_vm5 = vcmp.gt.f32.partialorder %v1002_v41, 0.0 }
  0x14   : > { %vm1236_vm0 = vcmp.gt.f32.partialorder %v1009_v25, 0.0  ;;  %vm1259_vm4 = vcmp.gt.f32.partialorder %v1010_v40, 0.0 }
  0x15   : > { %1020 = vmatpush.bf16.msra.mxu2 %v996_v6 }
  0x16   : > { %520 = vmatpush.bf16.msra.mxu0 %v996_v6 }
  0x17   : > { %585 = vperm.xlu0 %1046, %v318_v8   ;;  %593 = vperm.xlu2 %1048, %v320_v10  }
  0x18   : > { %569 = vperm.xlu1 %1047, %v314_v9  }
  0x19   : > { %1021 = vmatpush.bf16.msra.mxu2 %v995_v7 }
  0x1a   : > { %521 = vmatpush.bf16.msra.mxu0 %v995_v7 }
  0x1d   : > { %1022 = vmatpush.bf16.msra.mxu2 %v994_v11 }
  0x1e   : > { %522 = vmatpush.bf16.msra.mxu0 %v994_v11 }
  0x1f   : > { %573 = vperm.xlu0 %1046, %v1199_v13   ;;  %719 = vrot.lane.b32.xlu2 %v998_v0, %s1128_s12 }
  0x20   : > { %577 = vperm.xlu1 %1047, %v1201_v14   ;;  %1049 = vset.pattern.permute.xlu2 %v1129_v15 }
  0x21   : > { %1023 = vmatpush.bf16.msra.mxu2 %v993_v12 }
  0x22   : > { %523 = vmatpush.bf16.msra.mxu0 %v993_v12 }
  0x25   : > { %1024 = vmatpush.bf16.msra.mxu2 %v992_v16 }
  0x26   : > { %524 = vmatpush.bf16.msra.mxu0 %v992_v16 }
  0x27   : > { %717 = vrot.lane.b32.xlu0 %v997_v2, %s1128_s12  ;;  %343 = vperm.xlu2 %1049, %v317_v3  }
  0x28   : > { %715 = vrot.lane.b32.xlu1 %v996_v6, %s1128_s12  ;;  %1050 = vset.pattern.permute.xlu0 %v1129_v15  ;;  %v1289_v6 = vld [vmem:[%s1549_s1] ss:$0 sm:$0xff] }
  0x29   : > { %1051 = vset.pattern.permute.xlu1 %v1129_v15  ;;  %1025 = vmatpush.bf16.msra.mxu2 %v991_v35 }
  0x2a   : > { %525 = vmatpush.bf16.msra.mxu0 %v991_v35 }
  0x2f   : > { %348 = vperm.xlu0 %1050, %v318_v8   ;;  %711 = vrot.lane.b32.xlu2 %v994_v11, %s1128_s12 }
  0x30   : > { %713 = vrot.lane.b32.xlu1 %v995_v7, %s1128_s12 }
  0x37   : > { %358 = vperm.xlu0 %1050, %v320_v10   ;;  %328 = vperm.xlu2 %1049, %v314_v9   ;;  %v1017_v10 = vld [vmem:[%s1230_s22 + $0x18] sm:$0xff]  }
  0x38   : > { %323 = vperm.xlu1 %1051, %v313_v4   ;;  %v1015_v4 = vld [vmem:[%s1230_s22 + $0x8] sm:$0xff]   ;;  %v1013_v24 = vunpack.c.l.bf16 %v1017_v10 }
  0x39   : > { %v1005_v8 = vunpack.c.l.bf16 %v1015_v4 }
  0x3a   : > { %vm1322_vm14 = vcmp.gt.f32.partialorder %v1013_v24, 0.0 }
  0x3b   : > { %vm1293_vm9 = vcmp.gt.f32.partialorder %v1005_v8, 0.0 }
  0x3f   : > { %709 = vrot.lane.b32.xlu2 %v993_v12, %s1128_s12 }
  0x40   : > { %707 = vrot.lane.b32.xlu1 %v992_v16, %s1128_s12 }
  0x47   : > { %353 = vperm.xlu2 %1049, %v319_v5  }
  0x69   : > { %v590_v18 = vpop.permute.xlu2 %589 }
  0x6a   : > { %v1221_v19 = vadd.f32 %v1218_v17, %v590_v18 }
  0x6c   : > { %vm611_vm13 = vcmp.gt.f32.partialorder %v1221_v19, 0.0 }
  0x71   : > { %v594_v20 = vpop.permute.xlu2 %593 }
  0x72   : > { %v1224_v21 = vadd.f32 %v1218_v17, %v594_v20 }
  0x74   : > { %v620_v12 = vmul.f32 0.2, %v1224_v21  ;;  %vm612_vm10 = vcmp.gt.f32.partialorder %v1224_v21, 0.0 }
  0x76   : > { %v628_v20 = vsel %vm612_vm10, %v1224_v21, %v620_v12 }
  0x79   : > { %v720_v22 = vpop.permute.xlu2 %719 }
  0x7a   : > { %729 = vmatpush.bf16.msra.mxu1 %v720_v22  ;;  %1026 = vmatpush.bf16.msra.mxu3 %v720_v22  ;;  %v619_v22 = vmul.f32 0.2, %v1221_v19 }
  0x81   : > { %v582_v27 = vpop.permute.xlu0 %581  ;;  %v344_v46 = vpop.permute.xlu2 %343 }
  0x82   : > { %v566_v28 = vpop.permute.xlu1 %565  ;;  %v601_v29 = vadd.f32 %v1218_v17, %v582_v27  ;;  %v366_v16 = vadd.f32 %v1289_v6, %v344_v46 }
  0x83   : > { %v597_v30 = vadd.f32 %v1218_v17, %v566_v28 }
  0x84   : > { %v617_v33 = vmul.f32 0.2, %v601_v29  ;;  %vm609_vm2 = vcmp.gt.f32.partialorder %v601_v29, 0.0  ;;  %v382_v27 = vmul.f32 0.2, %v366_v16  ;;  %vm374_vm15 = vcmp.gt.f32.partialorder %v366_v16, 0.0 }
  0x85   : > { %v613_v34 = vmul.f32 0.2, %v597_v30  ;;  %vm605_vm3 = vcmp.gt.f32.partialorder %v597_v30, 0.0 }
  0x86   : > { %v625_v36 = vsel %vm609_vm2, %v601_v29, %v617_v33  ;;  %v627_v29 = vsel %vm611_vm13, %v1221_v19, %v619_v22 }
  0x87   : > { %v621_v37 = vsel %vm605_vm3, %v597_v30, %v613_v34  ;;  %v1249_v38 = vsel %vm1236_vm0, %v625_v36, -1e+30  ;;  %v1331_v34 = vsel %vm1322_vm14, %v627_v29, -1e+30 }
  0x88   : > { %v1253_v39 = vsel %vm1240_vm1, %v621_v37, -1e+30  ;;  %645 = vmax.xlane.f32.xlu0 %v1249_v38  ;;  %v1006_v37 = vunpack.c.h.bf16 %v1015_v4 }
  0x89   : > { %637 = vmax.xlane.f32.xlu2 %v1253_v39  ;;  %v586_v42 = vpop.permute.xlu0 %585  ;;  %v712_v58 = vpop.permute.xlu2 %711 }
  0x8a   : > { %v570_v43 = vpop.permute.xlu1 %569  ;;  %v602_v44 = vadd.f32 %v1218_v17, %v586_v42 }
  0x8b   : > { %v598_v45 = vadd.f32 %v1218_v17, %v570_v43 }
  0x8c   : > { %v618_v49 = vmul.f32 0.2, %v602_v44  ;;  %vm610_vm6 = vcmp.gt.f32.partialorder %v602_v44, 0.0 }
  0x8d   : > { %v614_v50 = vmul.f32 0.2, %v598_v45  ;;  %vm606_vm7 = vcmp.gt.f32.partialorder %v598_v45, 0.0 }
  0x8e   : > { %v626_v51 = vsel %vm610_vm6, %v602_v44, %v618_v49  ;;  %vm1342_vm6 = vcmp.gt.f32.partialorder %v1006_v37, 0.0 }
  0x8f   : > { %v622_v52 = vsel %vm606_vm7, %v598_v45, %v614_v50  ;;  %v1269_v53 = vsel %vm1259_vm4, %v626_v51, -1e+30 }
  0x90   : > { %v1273_v54 = vsel %vm1263_vm5, %v622_v52, -1e+30  ;;  %647 = vmax.xlane.f32.xlu1 %v1269_v53 }
  0x91   : > { %639 = vmax.xlane.f32.xlu0 %v1273_v54  ;;  %v574_v55 = vpop.permute.xlu0 %573  ;;  %v329_v61 = vpop.permute.xlu2 %328 }
  0x92   : > { %v578_v56 = vpop.permute.xlu1 %577  ;;  %v599_v3 = vadd.f32 %v1218_v17, %v574_v55  ;;  %v363_v33 = vadd.f32 %v1289_v6, %v329_v61 }
  0x93   : > { %v1278_v57 = vadd.f32 %v1218_v17, %v578_v56 }
  0x94   : > { %v615_v7 = vmul.f32 0.2, %v599_v3  ;;  %vm607_vm8 = vcmp.gt.f32.partialorder %v599_v3, 0.0  ;;  %v379_v41 = vmul.f32 0.2, %v363_v33  ;;  %vm371_vm7 = vcmp.gt.f32.partialorder %v363_v33, 0.0 }
  0x95   : > { %v616_v36 = vmul.f32 0.2, %v1278_v57  ;;  %vm608_vm3 = vcmp.gt.f32.partialorder %v1278_v57, 0.0 }
  0x96   : > { %v623_v11 = vsel %vm607_vm8, %v599_v3, %v615_v7  ;;  %v387_v49 = vsel %vm371_vm7, %v363_v33, %v379_v41  ;;  %vm968_vm7 = vmpackc.low %vm1342_vm6, %vm1293_vm9 }
  0x97   : > { %v1301_v15 = vsel %vm1293_vm9, %v623_v11, -1e+30  ;;  %v624_v44 = vsel %vm608_vm3, %v1278_v57, %v616_v36  ;;  %v1359_v52 = vsel %vm1263_vm5, %v387_v49, -1e+30 }
  0x98   : > { %v1354_v46 = vsel %vm1342_vm6, %v624_v44, -1e+30 }
  0x99   : > { %v718_v59 = vpop.permute.xlu0 %717  ;;  %v710_v63 = vpop.permute.xlu2 %709 }
  0x9a   : > { %v716_v60 = vpop.permute.xlu1 %715  ;;  %730 = vmatpush.bf16.msra.mxu1 %v718_v59  ;;  %1027 = vmatpush.bf16.msra.mxu3 %v718_v59 }
  0x9e   : > { %731 = vmatpush.bf16.msra.mxu1 %v716_v60  ;;  %1028 = vmatpush.bf16.msra.mxu3 %v716_v60 }
  0xa1   : > { %338 = vperm.xlu2 %1049, %v1201_v14   ;;  %v349_v5 = vpop.permute.xlu0 %348  ;;  %v354_v17 = vpop.permute.xlu2 %353 }
  0xa2   : > { %v714_v62 = vpop.permute.xlu1 %713  ;;  %v367_v9 = vadd.f32 %v1289_v6, %v349_v5  ;;  %v368_v25 = vadd.f32 %v1289_v6, %v354_v17 }
  0xa3   : > { %732 = vmatpush.bf16.msra.mxu1 %v714_v62  ;;  %1029 = vmatpush.bf16.msra.mxu3 %v714_v62 }
  0xa4   : > { %v383_v14 = vmul.f32 0.2, %v367_v9  ;;  %vm375_vm11 = vcmp.gt.f32.partialorder %v367_v9, 0.0  ;;  %v384_v30 = vmul.f32 0.2, %v368_v25  ;;  %vm376_vm2 = vcmp.gt.f32.partialorder %v368_v25, 0.0 }
  0xa5   : > { %333 = vperm.xlu0 %1050, %v1199_v13   ;;  %v1014_v13 = vunpack.c.h.bf16 %v1017_v10 }
  0xa6   : > { %v391_v23 = vsel %vm375_vm11, %v367_v9, %v383_v14  ;;  %v392_v40 = vsel %vm376_vm2, %v368_v25, %v384_v30  ;;  %vm971_vm2 = vmpackc.low %vm1259_vm4, %vm1236_vm0 }
  0xa7   : > { %733 = vmatpush.bf16.msra.mxu1 %v712_v58  ;;  %1030 = vmatpush.bf16.msra.mxu3 %v712_v58  ;;  %vm1305_vm12 = vcmp.gt.f32.partialorder %v1014_v13, 0.0  ;;  %v1320_v28 = vsel %vm1259_vm4, %v391_v23, -1e+30  ;;  %v1349_v45 = vsel %vm1322_vm14, %v392_v40, -1e+30 }
  0xa8   : > { %v1315_v26 = vsel %vm1305_vm12, %v628_v20, -1e+30  ;;  %vm974_vm3 = vmpackc.low %vm1305_vm12, %vm1322_vm14 }
  0xa9   : > { %705 = vrot.lane.b32.xlu1 %v991_v35, %s1128_s12  ;;  %v390_v35 = vsel %vm374_vm15, %v366_v16, %v382_v27  ;;  %v359_v51 = vpop.permute.xlu0 %358  ;;  %vm965_vm15 = vmpackc.low %vm1263_vm5, %vm1240_vm1 }
  0xaa   : > { %v324_v0 = vpop.permute.xlu1 %323  ;;  %v1338_v19 = vsel %vm1236_vm0, %v390_v35, -1e+30  ;;  %v369_v55 = vadd.f32 %v1289_v6, %v359_v51 }
  0xab   : > { %734 = vmatpush.bf16.msra.mxu1 %v710_v63  ;;  %1031 = vmatpush.bf16.msra.mxu3 %v710_v63  ;;  %v362_v42 = vadd.f32 %v1289_v6, %v324_v0 }
  0xac   : > { %v385_v58 = vmul.f32 0.2, %v369_v55  ;;  %vm377_vm10 = vcmp.gt.f32.partialorder %v369_v55, 0.0 }
  0xad   : > { %1052 = vset.pattern.permute.xlu0 %v1127_v1  ;;  %v378_v50 = vmul.f32 0.2, %v362_v42  ;;  %vm370_vm8 = vcmp.gt.f32.partialorder %v362_v42, 0.0 }
  0xae   : > { %v393_v59 = vsel %vm377_vm10, %v369_v55, %v385_v58 }
  0xaf   : > { %v386_v56 = vsel %vm370_vm8, %v362_v42, %v378_v50  ;;  %v1370_v60 = vsel %vm1305_vm12, %v393_v59, -1e+30 }
  0xb0   : > { %v1365_v57 = vsel %vm1240_vm1, %v386_v56, -1e+30 }
  0xb2   : > { %v708_v2 = vpop.permute.xlu1 %707 }
  0xb3   : > { %735 = vmatpush.bf16.msra.mxu1 %v708_v2  ;;  %1032 = vmatpush.bf16.msra.mxu3 %v708_v2 }
  0xca   : > { %641 = vmax.xlane.f32.xlu2 %v1301_v15 }
  0xcf   : > { %651 = vmax.xlane.f32.xlu0 %v1315_v26 }
  0xd2   : > { %412 = vmax.xlane.f32.xlu2 %v1320_v28 }
  0xd3   : > { %649 = vmax.xlane.f32.xlu1 %v1331_v34 }
  0xd7   : > { %410 = vmax.xlane.f32.xlu0 %v1338_v19 }
  0xda   : > { %414 = vmax.xlane.f32.xlu2 %v1349_v45 }
  0xdb   : > { %643 = vmax.xlane.f32.xlu1 %v1354_v46 }
  0xdf   : > { %404 = vmax.xlane.f32.xlu0 %v1359_v52 }
  0xe3   : > { %402 = vmax.xlane.f32.xlu1 %v1365_v57 }
  0xeb   : > { %416 = vmax.xlane.f32.xlu1 %v1370_v60 }
  0xfb   : > { %v646_v0 = vpop.xlane.xlu0 %645 }
  0xfc   : > { %v638_v61 = vpop.xlane.xlu2 %637  ;;  %v657_v13 = vsub.f32 %v1249_v38, %v646_v0 }
  0xfd   : > { %v653_v62 = vsub.f32 %v1253_v39, %v638_v61 }
  0xfe   : > { %v669_v17 = vmul.f32 1.442695, %v657_v13 }
  0xff   : > { %v661_v63 = vmul.f32 1.442695, %v653_v62 }
 0x101   : > { %1055 = vpow2.f32 %v661_v63 }
 0x103   : > { %v648_v7 = vpop.xlane.xlu1 %647 }
 0x104   : > { %v339_v2 = vpop.permute.xlu2 %338  ;;  %v640_v9 = vpop.xlane.xlu0 %639  ;;  %v658_v39 = vsub.f32 %v1269_v53, %v648_v7 }
 0x105   : > { %v365_v3 = vadd.f32 %v1289_v6, %v339_v2  ;;  %v654_v12 = vsub.f32 %v1273_v54, %v640_v9 }
 0x106   : > { %v671_v14 = vmul.f32 1.442695, %v658_v39 }
 0x107   : > { %v1056_v4 = vpop.eup %1055  ;;  %v381_v5 = vmul.f32 0.2, %v365_v3  ;;  %vm373_vm11 = vcmp.gt.f32.partialorder %v365_v3, 0.0  ;;  %v663_v16 = vmul.f32 1.442695, %v654_v12 }
 0x108   : > { %v677_v8 = vsel %vm1240_vm1, %v1056_v4, 0.0  ;;  %1057 = vpow2.f32 %v671_v14 }
 0x109   : > { %685 = vadd.xlane.f32.xlu1 %v677_v8  ;;  %v389_v10 = vsel %vm373_vm11, %v365_v3, %v381_v5  ;;  %1059 = vpow2.f32 %v663_v16 }
 0x10a   : > { %v1379_v11 = vsel %vm1342_vm6, %v389_v10, -1e+30  ;;  %1061 = vpow2.f32 %v669_v17 }
 0x10b   : > { %408 = vmax.xlane.f32.xlu2 %v1379_v11 }
 0x10e   : > { %v1058_v23 = vpop.eup %1057 }
 0x10f   : > { %v1060_v25 = vpop.eup %1059  ;;  %v682_v0 = vsel %vm1259_vm4, %v1058_v23, 0.0 }
 0x110   : > { %v1062_v38 = vpop.eup %1061  ;;  %v678_v30 = vsel %vm1263_vm5, %v1060_v25, 0.0 }
 0x111   : > { %v984_v29 = vpack.c.bf16 %v1058_v23, %v1062_v38  ;;  %v681_v33 = vsel %vm1236_vm0, %v1062_v38, 0.0 }
 0x117   : > { %v334_v20 = vpop.permute.xlu0 %333 }
 0x118   : > { %v364_v22 = vadd.f32 %v1289_v6, %v334_v20  ;;  %v978_v6 = vpack.c.bf16 %v1060_v25, %v1056_v4 }
 0x11a   : > { %v380_v24 = vmul.f32 0.2, %v364_v22  ;;  %vm372_vm13 = vcmp.gt.f32.partialorder %v364_v22, 0.0 }
 0x11b   : > { %v706_v53 = vpop.permute.xlu1 %705 }
 0x11c   : > { %v388_v27 = vsel %vm372_vm13, %v364_v22, %v380_v24  ;;  %736 = vmatpush.bf16.msra.mxu1 %v706_v53  ;;  %1033 = vmatpush.bf16.msra.mxu3 %v706_v53 }
 0x11d   : > { %v1392_v54 = vsel %vm1293_vm9, %v388_v27, -1e+30 }
 0x11e   : > { %406 = vmax.xlane.f32.xlu0 %v1392_v54 }
 0x11f   : > { %979 = vmatmul.msk.bf16.vlgmr.msra.gmra.mxu1 %vm965_vm15, %v978_v6  ;;  %985 = vmatmul.msk.bf16.vlgmr.msra.gmra.mxu3 %vm971_vm2, %v984_v29 }
 0x126   : > { %687 = vadd.xlane.f32.xlu0 %v678_v30 }
 0x12e   : > { %693 = vadd.xlane.f32.xlu0 %v681_v33 }
 0x13d   : > { %v642_v35 = vpop.xlane.xlu2 %641 }
 0x13e   : > { %v655_v36 = vsub.f32 %v1301_v15, %v642_v35 }
 0x140   : > { %v665_v37 = vmul.f32 1.442695, %v655_v36 }
 0x142   : > { %1063 = vpow2.f32 %v665_v37  ;;  %v652_v40 = vpop.xlane.xlu0 %651 }
 0x143   : > { %v660_v41 = vsub.f32 %v1315_v26, %v652_v40 }
 0x145   : > { %v675_v42 = vmul.f32 1.442695, %v660_v41  ;;  %v413_v44 = vpop.xlane.xlu2 %412 }
 0x146   : > { %v423_v49 = vsub.f32 %v1320_v28, %v413_v44  ;;  %v650_v50 = vpop.xlane.xlu1 %649 }
 0x147   : > { %1065 = vpow2.f32 %v675_v42  ;;  %v659_v55 = vsub.f32 %v1331_v34, %v650_v50 }
 0x148   : > { %v1064_v51 = vpop.eup %1063  ;;  %v436_v58 = vmul.f32 1.442695, %v423_v49 }
 0x149   : > { %v679_v56 = vsel %vm1293_vm9, %v1064_v51, 0.0  ;;  %v673_v59 = vmul.f32 1.442695, %v659_v55 }
 0x14a   : > { %v411_v15 = vpop.xlane.xlu0 %410  ;;  %689 = vadd.xlane.f32.xlu2 %v679_v56 }
 0x14b   : > { %v422_v61 = vsub.f32 %v1338_v19, %v411_v15  ;;  %1067 = vpow2.f32 %v673_v59 }
 0x14c   : > { %1069 = vpow2.f32 %v436_v58 }
 0x14d   : > { %v1066_v26 = vpop.eup %1065  ;;  %v434_v62 = vmul.f32 1.442695, %v422_v61  ;;  %v415_v39 = vpop.xlane.xlu2 %414 }
 0x14e   : > { %v684_v28 = vsel %vm1305_vm12, %v1066_v26, 0.0  ;;  %v644_v63 = vpop.xlane.xlu1 %643  ;;  %v424_v14 = vsub.f32 %v1349_v45, %v415_v39 }
 0x14f   : > { %1071 = vpow2.f32 %v434_v62  ;;  %699 = vadd.xlane.f32.xlu0 %v684_v28  ;;  %v656_v34 = vsub.f32 %v1354_v46, %v644_v63 }
 0x150   : > { %v438_v17 = vmul.f32 1.442695, %v424_v14 }
 0x151   : > { %v1068_v2 = vpop.eup %1067  ;;  %v667_v3 = vmul.f32 1.442695, %v656_v34 }
 0x152   : > { %v405_v4 = vpop.xlane.xlu0 %404  ;;  %695 = vadd.xlane.f32.xlu2 %v682_v0  ;;  %v987_v5 = vpack.c.bf16 %v1066_v26, %v1068_v2  ;;  %v1430_v7 = vpop.eup %1069  ;;  %v683_v25 = vsel %vm1322_vm14, %v1068_v2, 0.0 }
 0x153   : > { %v419_v19 = vsub.f32 %v1359_v52, %v405_v4  ;;  %1073 = vpow2.f32 %v667_v3  ;;  %v447_v50 = vsel %vm1259_vm4, %v1430_v7, 0.0 }
 0x154   : > { %988 = vmatmul.msk.bf16.gmra.mxu3 %vm974_vm3, %v987_v5 }
 0x155   : > { %v1072_v8 = vpop.eup %1071  ;;  %v428_v9 = vmul.f32 1.442695, %v419_v19 }
 0x156   : > { %v972_v46 = vpack.c.bf16 %v1430_v7, %v1072_v8  ;;  %v403_v10 = vpop.xlane.xlu1 %402  ;;  %v446_v30 = vsel %vm1236_vm0, %v1072_v8, 0.0  ;;  %vm806_vm0 = vcmask 130048  }
 0x157   : > { %v418_v12 = vsub.f32 %v1365_v57, %v403_v10  ;;  %1075 = vpow2.f32 %v428_v9 }
 0x158   : > { %973 = vmatmul.msk.bf16.vlgmr.msra.gmra.mxu2 %vm971_vm2, %v972_v46 }
 0x159   : > { %v1074_v52 = vpop.eup %1073  ;;  %v426_v13 = vmul.f32 1.442695, %v418_v12 }
 0x15a   : > { %v680_v16 = vsel %vm1342_vm6, %v1074_v52, 0.0  ;;  %v981_v57 = vpack.c.bf16 %v1074_v52, %v1064_v51 }
 0x15b   : > { %1077 = vpow2.f32 %v426_v13  ;;  %691 = vadd.xlane.f32.xlu1 %v680_v16 }
 0x15c   : > { %982 = vmatmul.msk.bf16.gmra.mxu1 %vm968_vm7, %v981_v57  ;;  %1079 = vpow2.f32 %v438_v17 }
 0x15d   : > { %v1076_v23 = vpop.eup %1075 }
 0x15e   : > { %v417_v20 = vpop.xlane.xlu1 %416  ;;  %v443_v6 = vsel %vm1263_vm5, %v1076_v23, 0.0 }
 0x15f   : > { %v425_v22 = vsub.f32 %v1370_v60, %v417_v20 }
 0x161   : > { %v1078_v24 = vpop.eup %1077  ;;  %v440_v45 = vmul.f32 1.442695, %v425_v22 }
 0x162   : > { %v442_v53 = vsel %vm1240_vm1, %v1078_v24, 0.0  ;;  %v966_v27 = vpack.c.bf16 %v1076_v23, %v1078_v24  ;;  %v1080_v60 = vpop.eup %1079  ;;  %v819_v24 = vld [vmem:[%s1505_s30 + $0x20] sm:$0xff]  ;;  %vm831_vm1 = vcmask 261120  }
 0x163   : > { %1081 = vpow2.f32 %v440_v45  ;;  %697 = vadd.xlane.f32.xlu1 %v683_v25  ;;  %450 = vadd.xlane.f32.xlu2 %v442_v53  ;;  %v448_v31 = vsel %vm1322_vm14, %v1080_v60, 0.0 }
 0x164   : > { %967 = vmatmul.msk.bf16.vlgmr.msra.gmra.mxu0 %vm965_vm15, %v966_v27 }
 0x169   : > { %v1082_v38 = vpop.eup %1081 }
 0x16a   : > { %v975_v29 = vpack.c.bf16 %v1082_v38, %v1080_v60  ;;  %v449_v32 = vsel %vm1305_vm12, %v1082_v38, 0.0 }
 0x16b   : > { %452 = vadd.xlane.f32.xlu1 %v443_v6 }
 0x16c   : > { %976 = vmatmul.msk.bf16.gmra.mxu2 %vm974_vm3, %v975_v29  ;;  %v816_v29 = vld [vmem:[%s1505_s30 + $0x8] sm:$0xff] }
 0x173   : > { %458 = vadd.xlane.f32.xlu1 %v446_v30 }
 0x17b   : > { %464 = vadd.xlane.f32.xlu1 %v449_v32 }
 0x17c   : > { %v686_v43 = vpop.xlane.xlu1 %685 }
 0x17e   : > { %v409_v33 = vpop.xlane.xlu2 %408 }
 0x17f   : > { %v421_v48 = vsub.f32 %v1379_v11, %v409_v33 }
 0x181   : > { %v432_v35 = vmul.f32 1.442695, %v421_v48 }
 0x183   : > { %1083 = vpow2.f32 %v432_v35 }
 0x189   : > { %v1084_v36 = vpop.eup %1083 }
 0x18a   : > { %v445_v37 = vsel %vm1342_vm6, %v1084_v36, 0.0 }
 0x18b   : > { %456 = vadd.xlane.f32.xlu2 %v445_v37 }
 0x191   : > { %v407_v40 = vpop.xlane.xlu0 %406 }
 0x192   : > { %v420_v41 = vsub.f32 %v1392_v54, %v407_v40 }
 0x193   : > { %462 = vadd.xlane.f32.xlu2 %v448_v31 }
 0x194   : > { %v430_v42 = vmul.f32 1.442695, %v420_v41  ;;  %v815_v41 = vld [vmem:[%s1505_s30] sm:$0xff] }
 0x196   : > { %1085 = vpow2.f32 %v430_v42 }
 0x199   : > { %v688_v18 = vpop.xlane.xlu0 %687 }
 0x19c   : > { %v1086_v44 = vpop.eup %1085  ;;  %v738_v21 = vpop.f32.mrf.mxu1 }
 0x19d   : > { %v444_v11 = vsel %vm1293_vm9, %v1086_v44, 0.0  ;;  %v969_v49 = vpack.c.bf16 %v1084_v36, %v1086_v44 }
 0x19e   : > { %454 = vadd.xlane.f32.xlu0 %v444_v11 }
 0x19f   : > { %970 = vmatmul.msk.bf16.gmra.mxu0 %vm968_vm7, %v969_v49 }
 0x1a1   : > { %v694_v54 = vpop.xlane.xlu0 %693 }
 0x1a2   : > { %1087 = vrcp.f32 %v694_v54  ;;  %v748_v55 = vpop.f32.mrf.mxu3 }
 0x1a3   : > { %1089 = vrcp.f32 %v688_v18 }
 0x1a4   : > { %v740_v58 = vpop.f32.mrf.mxu1  ;;  %1091 = vrcp.f32 %v686_v43 }
 0x1a6   : > { %460 = vadd.xlane.f32.xlu0 %v447_v50  ;;  %v822_v50 = vld [vmem:[%s1505_s30 + $0x38] sm:$0xff] }
 0x1a8   : > { %v1088_v51 = vpop.eup %1087 }
 0x1a9   : > { %v770_v56 = vmul.f32 %v1088_v51, %v748_v55  ;;  %v1090_v1 = vpop.eup %1089 }
 0x1aa   : > { %v767_v59 = vmul.f32 %v1090_v1, %v740_v58  ;;  %v1092_v15 = vpop.eup %1091  ;;  %v750_v26 = vpop.f32.mrf.mxu3 }
 0x1ab   : > { %790 = vrot.lane.b32.xlu2 %v770_v56, %s1130_s27  ;;  %v766_v61 = vmul.f32 %v1092_v15, %v738_v21 }
 0x1b3   : > { %784 = vrot.lane.b32.xlu2 %v767_v59, %s1130_s27  ;;  %v817_v59 = vld [vmem:[%s1505_s30 + $0x10] sm:$0xff] }
 0x1ba   : > { %782 = vrot.lane.b32.xlu0 %v766_v61, %s1130_s27 }
 0x1bd   : > { %v690_v62 = vpop.xlane.xlu2 %689 }
 0x1be   : > { %1093 = vrcp.f32 %v690_v62 }
 0x1c2   : > { %v700_v28 = vpop.xlane.xlu0 %699 }
 0x1c3   : > { %1095 = vrcp.f32 %v700_v28 }
 0x1c4   : > { %v1094_v0 = vpop.eup %1093 }
 0x1c5   : > { %v696_v19 = vpop.xlane.xlu2 %695 }
 0x1c9   : > { %v1096_v4 = vpop.eup %1095 }
 0x1ce   : > { %v692_v47 = vpop.xlane.xlu1 %691 }
 0x1d6   : > { %v698_v63 = vpop.xlane.xlu1 %697  ;;  %v451_v13 = vpop.xlane.xlu2 %450 }
 0x1d7   : > { %v753_v34 = vpop.f32.mrf.mxu3  ;;  %1097 = vrcp.f32 %v698_v63 }
 0x1d8   : > { %1099 = vrcp.f32 %v692_v47 }
 0x1d9   : > { %v743_v2 = vpop.f32.mrf.mxu1  ;;  %1101 = vrcp.f32 %v696_v19 }
 0x1da   : > { %v768_v3 = vmul.f32 %v1094_v0, %v743_v2  ;;  %v821_v2 = vld [vmem:[%s1505_s30 + $0x30] sm:$0xff] }
 0x1db   : > { %v537_v23 = vpop.f32.mrf.mxu2 }
 0x1dc   : > { %786 = vrot.lane.b32.xlu1 %v768_v3, %s1130_s27 }
 0x1dd   : > { %v1098_v5 = vpop.eup %1097 }
 0x1de   : > { %v1100_v46 = vpop.eup %1099  ;;  %v772_v10 = vmul.f32 %v1098_v5, %v753_v34  ;;  %v453_v14 = vpop.xlane.xlu1 %452  ;;  %v818_v34 = vld [vmem:[%s1505_s30 + $0x18] sm:$0xff] }
 0x1df   : > { %v755_v7 = vpop.f32.mrf.mxu3  ;;  %v1102_v12 = vpop.eup %1101 }
 0x1e0   : > { %v773_v8 = vmul.f32 %v1096_v4, %v755_v7  ;;  %v771_v52 = vmul.f32 %v1102_v12, %v750_v26 }
 0x1e1   : > { %v745_v9 = vpop.f32.mrf.mxu1  ;;  %v527_v20 = vpop.f32.mrf.mxu0 }
 0x1e2   : > { %v769_v39 = vmul.f32 %v1100_v46, %v745_v9  ;;  %796 = vrot.lane.b32.xlu2 %v773_v8, %s1130_s27 }
 0x1e3   : > { %v539_v36 = vpop.f32.mrf.mxu2 }
 0x1e4   : > { %788 = vrot.lane.b32.xlu0 %v769_v39, %s1130_s27  ;;  %794 = vrot.lane.b32.xlu1 %v772_v10, %s1130_s27  ;;  %v820_v10 = vld [vmem:[%s1505_s30 + $0x28] sm:$0xff] }
 0x1e6   : > { %v459_v57 = vpop.xlane.xlu1 %458 }
 0x1e7   : > { %1103 = vrcp.f32 %v459_v57 }
 0x1e8   : > { %1105 = vrcp.f32 %v453_v14 }
 0x1e9   : > { %v529_v60 = vpop.f32.mrf.mxu0  ;;  %1107 = vrcp.f32 %v451_v13 }
 0x1ec   : > { %792 = vrot.lane.b32.xlu0 %v771_v52, %s1130_s27 }
 0x1ed   : > { %v1104_v22 = vpop.eup %1103 }
 0x1ee   : > { %v559_v45 = vmul.f32 %v1104_v22, %v537_v23  ;;  %v1106_v38 = vpop.eup %1105  ;;  %v465_v11 = vpop.xlane.xlu1 %464 }
 0x1ef   : > { %v556_v6 = vmul.f32 %v1106_v38, %v529_v60  ;;  %v1108_v37 = vpop.eup %1107  ;;  %v542_v44 = vpop.f32.mrf.mxu2  ;;  %1109 = vrcp.f32 %v465_v11 }
 0x1f0   : > { %v555_v40 = vmul.f32 %v1108_v37, %v527_v20 }
 0x1f5   : > { %v1110_v54 = vpop.eup %1109 }
 0x1f7   : > { %v544_v49 = vpop.f32.mrf.mxu2 }
 0x1f8   : > { %v562_v21 = vmul.f32 %v1110_v54, %v544_v49 }
 0x1fe   : > { %v457_v16 = vpop.xlane.xlu2 %456 }
 0x206   : > { %v463_v17 = vpop.xlane.xlu2 %462 }
 0x20e   : > { %v791_v25 = vpop.permute.xlu2 %790 }
 0x20f   : > { %v811_v53 = vsel %vm806_vm0, %v559_v45, %v791_v25 }
 0x210   : > { %v827_v27 = vadd.f32 %v819_v24, %v811_v53 }
 0x211   : > { %v455_v48 = vpop.xlane.xlu0 %454 }
 0x212   : > { %836 = vst.msk [vmem:[%s1512_s8 + $0x20] sm:$0xff] %vm831_vm1, %v827_v27  ;;  %1111 = vrcp.f32 %v455_v48 }
 0x213   : > { %1113 = vrcp.f32 %v463_v17 }
 0x214   : > { %1115 = vrcp.f32 %v457_v16 }
 0x216   : > { %v785_v30 = vpop.permute.xlu2 %784 }
 0x217   : > { %v808_v32 = vsel %vm806_vm0, %v556_v6, %v785_v30 }
 0x218   : > { %v824_v33 = vadd.f32 %v816_v29, %v808_v32  ;;  %v1112_v58 = vpop.eup %1111 }
 0x219   : > { %v461_v35 = vpop.xlane.xlu0 %460  ;;  %v1114_v26 = vpop.eup %1113 }
 0x21a   : > { %833 = vst.msk [vmem:[%s1512_s8 + $0x8] sm:$0xff] %vm831_vm1, %v824_v33  ;;  %v1116_v28 = vpop.eup %1115  ;;  %1117 = vrcp.f32 %v461_v35  ;;  %v561_v0 = vmul.f32 %v1114_v26, %v542_v44 }
 0x21c   : > { %v532_v43 = vpop.f32.mrf.mxu0 }
 0x21d   : > { %v557_v1 = vmul.f32 %v1112_v58, %v532_v43 }
 0x220   : > { %v1118_v46 = vpop.eup %1117 }
 0x221   : > { %v560_v9 = vmul.f32 %v1118_v46, %v539_v36 }
 0x224   : > { %v534_v62 = vpop.f32.mrf.mxu0 }
 0x225   : > { %v558_v63 = vmul.f32 %v1116_v28, %v534_v62 }
 0x22c   : > { %v783_v31 = vpop.permute.xlu0 %782 }
 0x22d   : > { %v807_v42 = vsel %vm806_vm0, %v555_v40, %v783_v31 }
 0x22e   : > { %v823_v18 = vadd.f32 %v815_v41, %v807_v42 }
 0x230   : > { %832 = vst.msk [vmem:[%s1512_s8] sm:$0xff] %vm831_vm1, %v823_v18 }
 0x23c   : > { %v797_v51 = vpop.permute.xlu2 %796 }
 0x23d   : > { %v814_v55 = vsel %vm806_vm0, %v562_v21, %v797_v51 }
 0x23e   : > { %v830_v56 = vadd.f32 %v822_v50, %v814_v55 }
 0x240   : > { %839 = vst.msk [vmem:[%s1512_s8 + $0x38] sm:$0xff] %vm831_vm1, %v830_v56 }
 0x24e   : > { %v787_v15 = vpop.permute.xlu1 %786 }
 0x24f   : > { %v809_v61 = vsel %vm806_vm0, %v557_v1, %v787_v15 }
 0x250   : > { %v825_v47 = vadd.f32 %v817_v59, %v809_v61 }
 0x252   : > { %834 = vst.msk [vmem:[%s1512_s8 + $0x10] sm:$0xff] %vm831_vm1, %v825_v47 }
 0x256   : > { %v789_v3 = vpop.permute.xlu0 %788  ;;  %v795_v4 = vpop.permute.xlu1 %794 }
 0x257   : > { %v810_v19 = vsel %vm806_vm0, %v558_v63, %v789_v3  ;;  %v813_v5 = vsel %vm806_vm0, %v561_v0, %v795_v4 }
 0x258   : > { %v826_v7 = vadd.f32 %v818_v34, %v810_v19  ;;  %v829_v8 = vadd.f32 %v821_v2, %v813_v5 }
 0x25a   : > { %835 = vst.msk [vmem:[%s1512_s8 + $0x18] sm:$0xff] %vm831_vm1, %v826_v7 }
 0x25b   : > { %838 = vst.msk [vmem:[%s1512_s8 + $0x30] sm:$0xff] %vm831_vm1, %v829_v8 }
 0x25e   : > { %v793_v39 = vpop.permute.xlu0 %792 }
 0x25f   : > { %v812_v12 = vsel %vm806_vm0, %v560_v9, %v793_v39 }
 0x260   : > { %v828_v52 = vadd.f32 %v820_v10, %v812_v12 }
 0x262   : > { %837 = vst.msk [vmem:[%s1512_s8 + $0x28] sm:$0xff] %vm831_vm1, %v828_v52 }
 0x263 PF: > { %s15_s18 = sadd.s32 1, %s1125_s18  }
 0x264   : > { %p12_p4 = scmp.ge.s32.totalorder %s15_s18, 4  }
 0x266   :  { %14 = sbr.rel (!%p12_p4) target bundleno = 1 (0x1), region = 76 }

// kernel: revgat_forward.10
= control target key start
LH: loop header
LB: loop body
LE: loop exit
PB: predicated region body
PF: predicated region fallthrough
CT: control target
= control target key end

     0   :  { %s850_s30 = smov 0   ;;  %s957_s0 = inlined_call_operand.vmem [shape: f32[128,16], index: 0, kind: input, shape index: {}]   ;;  %s958_s1 = inlined_call_operand.vmem [shape: f32[1,16], index: 1, kind: input, shape index: {}]   ;;  %s959_s2 = inlined_call_operand.vmem [shape: f32[1,16], index: 2, kind: input, shape index: {}]   ;;  %s960_s3 = inlined_call_operand.vmem [shape: f32[1,16], index: 3, kind: input, shape index: {}]   ;;  %s961_s4 = inlined_call_operand.vmem [shape: f32[1,16], index: 4, kind: input, shape index: {}]   ;;  %s962_s5 = inlined_call_operand.vmem [shape: bf16[16,32], index: 5, kind: input, shape index: {}]   ;;  %s963_s6 = inlined_call_operand.vmem [shape: f32[16,4], index: 6, kind: input, shape index: {}]   ;;  %s964_s7 = inlined_call_operand.vmem [shape: bf16[128,16], index: 7, kind: output, shape index: {0}]   ;;  %s965_s8 = inlined_call_operand.vmem [shape: f32[128,16], index: 8, kind: output, shape index: {1}]   ;;  %s966_s9 = inlined_call_operand.vmem [shape: f32[128,4], index: 9, kind: output, shape index: {2}]  }
   0x1 LB: > { %s742_s10 = sadd.s32 4294967295, %s797_s30   ;;  %p746_p0 = scmp.ge.s32.totalorder %s797_s30, 1  ;;  %s797_s30 = sphi %s850_s30, %s20_s30  }
   0x2   : > { %p293_p1 = scmp.lt.s32.totalorder %s797_s30, 3 }
   0x4   : > { %p294_p2 = pnand %p746_p0, %p293_p1 }
   0x5   : > { %s747_s13 = sshll.u32 (!%p294_p2), %s742_s10, 3  ;;  %s799_s11 = smov (!%p294_p2), 112  }
   0x6   : > { %297 = sbr.rel (%p294_p2) target bundleno = 334 (0x14e), region = 48  ;;  %p340_p3 = scmp.lt.s32.totalorder (!%p294_p2), %s747_s13, 15 }
   0xb   : > { %v773_v0 = vld [vmem:[%s962_s5] sm:$0xff]  ;;  %s968_s13 = smov (!%p340_p3, %s747_s13), 15  ;;  %vm451_vm3 = vcmask 130048   ;;  %vm568_vm4 = vcmask 125952   ;;  %vm609_vm5 = vcmask 31744  }
   0xc   : > { %v372_v1 = vld [vmem:[%s961_s4] sm:$0x1]  ;;  %471 = vmatpush.bf16.msra.mxu0 %v773_v0  ;;  %774 = vmatpush.bf16.msra.mxu2 %v773_v0  ;;  %s867_s16 = sshll.u32 %s968_s13, 3  ;;  %s750_s10 = sshll.u32 %s968_s13, 2 }
   0xd   : > { %v373_v2 = vadd.f32 1e-05, %v372_v1  ;;  %s343_s19 = scalar_lea.vmem %s957_s0, %s867_s16  ;;  %v786_v8 = vld [vmem:[%s960_s3] ss:$0 sm:$0xff]  ;;  %s898_s15 = scalar_lea.vmem %s964_s7, %s750_s10 }
   0xe   : > { %v364_v7 = vld [vmem:[%s343_s19] sm:$0xff]  ;;  %v365_v9 = vld [vmem:[%s343_s19 + $0x8] sm:$0xff]  ;;  %v366_v20 = vld [vmem:[%s343_s19 + $0x10] sm:$0xff]  ;;  %s355_s18 = scalar_lea.vmem %s965_s8, %s867_s16  ;;  %s361_s21 = scalar_lea.vmem %s966_s9, %s867_s16 }
   0xf   : > { %789 = vrsqrt.f32 %v373_v2  ;;  %vm380_vm0 = vweird.f32 %v373_v2  ;;  %v368_v11 = vld [vmem:[%s343_s19 + $0x20] sm:$0xff]  ;;  %v369_v12 = vld [vmem:[%s343_s19 + $0x28] sm:$0xff]  ;;  %v388_v14 = vsub.f32 %v364_v7, %v786_v8  ;;  %v389_v15 = vsub.f32 %v365_v9, %v786_v8  ;;  %v367_v22 = vld [vmem:[%s343_s19 + $0x18] sm:$0xff] }
  0x10   : > { %v392_v16 = vsub.f32 %v368_v11, %v786_v8  ;;  %v393_v17 = vsub.f32 %v369_v12, %v786_v8  ;;  %v787_v19 = vld [vmem:[%s958_s1] ss:$0 sm:$0xff]  ;;  %v370_v23 = vld [vmem:[%s343_s19 + $0x30] sm:$0xff]  ;;  %v371_v24 = vld [vmem:[%s343_s19 + $0x38] sm:$0xff]  ;;  %v390_v30 = vsub.f32 %v366_v20, %v786_v8  ;;  %v391_v31 = vsub.f32 %v367_v22, %v786_v8 }
  0x11   : > { %v788_v27 = vld [vmem:[%s959_s2] ss:$0 sm:$0xff]  ;;  %v394_v32 = vsub.f32 %v370_v23, %v786_v8  ;;  %v395_v33 = vsub.f32 %v371_v24, %v786_v8 }
  0x15   : > { %v790_v3 = vpop.eup %789 }
  0x16   : > { %v375_v4 = vmul.f32 %v790_v3, %v373_v2  ;;  %vm381_vm1 = vweird.f32 %v790_v3  ;;  %v494_v2 = vld [vmem:[%s963_s6 + $0x8] sm:$0xff] }
  0x17   : > { %vm382_vm2 = vmor %vm380_vm0, %vm381_vm1  ;;  %533 = vmatpush.msra.mxu1 %v494_v2  ;;  %775 = vmatpush.msra.mxu3 %v494_v2 }
  0x18   : > { %v376_v5 = vmul.f32 %v790_v3, %v375_v4 }
  0x1a   : > { %v377_v6 = vmul.f32 0.5, %v376_v5 }
  0x1c   : > { %v378_v10 = vsub.f32 1.5, %v377_v6 }
  0x1e   : > { %v379_v13 = vmul.f32 %v790_v3, %v378_v10 }
  0x20   : > { %v383_v18 = vsel %vm382_vm2, %v790_v3, %v379_v13  ;;  %v493_v3 = vld [vmem:[%s963_s6] sm:$0xff] }
  0x21   : > { %v397_v21 = vperm.slane %v383_v18, 0  ;;  %534 = vmatpush.msra.mxu1 %v493_v3  ;;  %776 = vmatpush.msra.mxu3 %v493_v3 }
  0x23   : > { %v399_v25 = vmul.f32 %v397_v21, %v388_v14  ;;  %v400_v26 = vmul.f32 %v397_v21, %v389_v15  ;;  %v403_v28 = vmul.f32 %v397_v21, %v392_v16  ;;  %v404_v29 = vmul.f32 %v397_v21, %v393_v17 }
  0x24   : > { %v401_v42 = vmul.f32 %v397_v21, %v390_v30  ;;  %v402_v43 = vmul.f32 %v397_v21, %v391_v31  ;;  %v405_v44 = vmul.f32 %v397_v21, %v394_v32  ;;  %v406_v45 = vmul.f32 %v397_v21, %v395_v33 }
  0x25   : > { %v411_v34 = vmul.f32 %v787_v19, %v399_v25  ;;  %v412_v35 = vmul.f32 %v787_v19, %v400_v26  ;;  %v415_v36 = vmul.f32 %v787_v19, %v403_v28  ;;  %v416_v37 = vmul.f32 %v787_v19, %v404_v29 }
  0x26   : > { %v413_v52 = vmul.f32 %v787_v19, %v401_v42  ;;  %v414_v53 = vmul.f32 %v787_v19, %v402_v43  ;;  %v417_v54 = vmul.f32 %v787_v19, %v405_v44  ;;  %v418_v55 = vmul.f32 %v787_v19, %v406_v45 }
  0x27   : > { %v423_v38 = vadd.f32 %v788_v27, %v411_v34  ;;  %v424_v39 = vadd.f32 %v788_v27, %v412_v35  ;;  %v427_v40 = vadd.f32 %v788_v27, %v415_v36  ;;  %v428_v41 = vadd.f32 %v788_v27, %v416_v37 }
  0x28   : > { %v425_v56 = vadd.f32 %v788_v27, %v413_v52  ;;  %v426_v57 = vadd.f32 %v788_v27, %v414_v53  ;;  %v429_v58 = vadd.f32 %v788_v27, %v417_v54  ;;  %v430_v59 = vadd.f32 %v788_v27, %v418_v55 }
  0x29   : > { %v431_v46 = vmax.f32 %v423_v38, 0.0  ;;  %v432_v47 = vmax.f32 %v424_v39, 0.0  ;;  %v435_v48 = vmax.f32 %v427_v40, 0.0  ;;  %v436_v49 = vmax.f32 %v428_v41, 0.0 }
  0x2a   : > { %v433_v60 = vmax.f32 %v425_v56, 0.0  ;;  %v434_v61 = vmax.f32 %v426_v57, 0.0  ;;  %v437_v62 = vmax.f32 %v429_v58, 0.0  ;;  %v438_v63 = vmax.f32 %v430_v59, 0.0 }
  0x2b   : > { %v439_v50 = vpack.c.bf16 %v432_v47, %v431_v46  ;;  %v441_v51 = vpack.c.bf16 %v436_v49, %v435_v48 }
  0x2c   : > { %v440_v0 = vpack.c.bf16 %v434_v61, %v433_v60  ;;  %v442_v1 = vpack.c.bf16 %v438_v63, %v437_v62 }
  0x2d   : > { %759 = vmatmul.msk.bf16.vlgmr.msra.gmra.mxu0 %vm451_vm3, %v439_v50  ;;  %761 = vmatmul.msk.bf16.vlgmr.msra.gmra.mxu2 %vm451_vm3, %v441_v51 }
  0x3d   : > { %760 = vmatmul.msk.bf16.gmra.mxu0 %vm451_vm3, %v440_v0  ;;  %762 = vmatmul.msk.bf16.gmra.mxu2 %vm451_vm3, %v442_v1 }
  0xaa   : > { %v473_v4 = vpop.f32.mrf.mxu0 }
  0xab   : > { %v560_v5 = vpack.c.bf16 %v473_v4, %v473_v4  ;;  %577 = vrot.lane.b32.xlu0 %v473_v4, %s799_s11  ;;  %763 = vmatmul.msk.f32.vlgmr.msra.gmra.mxu1 %vm451_vm3, %v473_v4 }
  0xad   : > { %569 = vst.msk [vmem:[%s898_s15] sm:$0xf] %vm568_vm4, %v560_v5 }
  0xb0   : > { %v483_v6 = vpop.f32.mrf.mxu2 }
  0xb1   : > { %v564_v7 = vpack.c.bf16 %v483_v6, %v483_v6  ;;  %585 = vrot.lane.b32.xlu2 %v483_v6, %s799_s11  ;;  %767 = vmatmul.msk.f32.vlgmr.msra.gmra.mxu3 %vm451_vm3, %v483_v6 }
  0xb2   : > { %v475_v8 = vpop.f32.mrf.mxu0 }
  0xb3   : > { %573 = vst.msk [vmem:[%s898_s15 + $0x10] sm:$0xf] %vm568_vm4, %v564_v7  ;;  %v561_v9 = vpack.c.bf16 %v475_v8, %v475_v8  ;;  %579 = vrot.lane.b32.xlu0 %v475_v8, %s799_s11  ;;  %764 = vmatmul.msk.f32.gmra.mxu1 %vm451_vm3, %v475_v8 }
  0xb5   : > { %570 = vst.msk [vmem:[%s898_s15 + $0x4] sm:$0xf] %vm568_vm4, %v561_v9 }
  0xb8   : > { %v485_v10 = vpop.f32.mrf.mxu2 }
  0xb9   : > { %v565_v11 = vpack.c.bf16 %v485_v10, %v485_v10  ;;  %587 = vrot.lane.b32.xlu2 %v485_v10, %s799_s11  ;;  %768 = vmatmul.msk.f32.gmra.mxu3 %vm451_vm3, %v485_v10 }
  0xba   : > { %v478_v12 = vpop.f32.mrf.mxu0 }
  0xbb   : > { %574 = vst.msk [vmem:[%s898_s15 + $0x14] sm:$0xf] %vm568_vm4, %v565_v11  ;;  %v562_v13 = vpack.c.bf16 %v478_v12, %v478_v12  ;;  %581 = vrot.lane.b32.xlu1 %v478_v12, %s799_s11  ;;  %765 = vmatmul.msk.f32.gmra.mxu1 %vm451_vm3, %v478_v12 }
  0xbd   : > { %571 = vst.msk [vmem:[%s898_s15 + $0x8] sm:$0xf] %vm568_vm4, %v562_v13 }
  0xc0   : > { %v488_v14 = vpop.f32.mrf.mxu2 }
  0xc1   : > { %v566_v15 = vpack.c.bf16 %v488_v14, %v488_v14  ;;  %769 = vmatmul.msk.f32.gmra.mxu3 %vm451_vm3, %v488_v14  ;;  %589 = vrot.lane.b32.xlu0 %v488_v14, %s799_s11 }
  0xc2   : > { %v480_v16 = vpop.f32.mrf.mxu0 }
  0xc3   : > { %575 = vst.msk [vmem:[%s898_s15 + $0x18] sm:$0xf] %vm568_vm4, %v566_v15  ;;  %v563_v17 = vpack.c.bf16 %v480_v16, %v480_v16  ;;  %583 = vrot.lane.b32.xlu1 %v480_v16, %s799_s11  ;;  %766 = vmatmul.msk.f32.gmra.mxu1 %vm451_vm3, %v480_v16 }
  0xc5   : > { %572 = vst.msk [vmem:[%s898_s15 + $0xc] sm:$0xf] %vm568_vm4, %v563_v17 }
  0xc8   : > { %v490_v18 = vpop.f32.mrf.mxu2 }
  0xc9   : > { %v567_v19 = vpack.c.bf16 %v490_v18, %v490_v18  ;;  %770 = vmatmul.msk.f32.gmra.mxu3 %vm451_vm3, %v490_v18 }
  0xcb   : > { %576 = vst.msk [vmem:[%s898_s15 + $0x1c] sm:$0xf] %vm568_vm4, %v567_v19  ;;  %591 = vrot.lane.b32.xlu1 %v490_v18, %s799_s11 }
 0x10b   : > { %v586_v20 = vpop.permute.xlu2 %585 }
 0x10c   : > { %605 = vst.msk [vmem:[%s355_s18 + $0x20] sm:$0xff] %vm451_vm3, %v586_v20 }
 0x113   : > { %v588_v21 = vpop.permute.xlu2 %587 }
 0x114   : > { %606 = vst.msk [vmem:[%s355_s18 + $0x28] sm:$0xff] %vm451_vm3, %v588_v21 }
 0x11d   : > { %v578_v22 = vpop.permute.xlu0 %577 }
 0x11e   : > { %601 = vst.msk [vmem:[%s355_s18] sm:$0xff] %vm451_vm3, %v578_v22 }
 0x125   : > { %v580_v23 = vpop.permute.xlu0 %579 }
 0x126   : > { %602 = vst.msk [vmem:[%s355_s18 + $0x8] sm:$0xff] %vm451_vm3, %v580_v23 }
 0x128   : > { %v536_v24 = vpop.f32.mrf.mxu1 }
 0x129   : > { %610 = vst.msk [vmem:[%s361_s21] sm:$0xff] %vm609_vm5, %v536_v24 }
 0x12d   : > { %v582_v25 = vpop.permute.xlu1 %581 }
 0x12e   : > { %603 = vst.msk [vmem:[%s355_s18 + $0x10] sm:$0xff] %vm451_vm3, %v582_v25 }
 0x130   : > { %v539_v26 = vpop.f32.mrf.mxu1 }
 0x131   : > { %611 = vst.msk [vmem:[%s361_s21 + $0x8] sm:$0xff] %vm609_vm5, %v539_v26 }
 0x133   : > { %v590_v27 = vpop.permute.xlu0 %589 }
 0x134   : > { %607 = vst.msk [vmem:[%s355_s18 + $0x30] sm:$0xff] %vm451_vm3, %v590_v27  ;;  %v548_v28 = vpop.f32.mrf.mxu3 }
 0x135   : > { %614 = vst.msk [vmem:[%s361_s21 + $0x20] sm:$0xff] %vm609_vm5, %v548_v28  ;;  %v584_v29 = vpop.permute.xlu1 %583 }
 0x136   : > { %604 = vst.msk [vmem:[%s355_s18 + $0x18] sm:$0xff] %vm451_vm3, %v584_v29 }
 0x138   : > { %v542_v30 = vpop.f32.mrf.mxu1 }
 0x139   : > { %612 = vst.msk [vmem:[%s361_s21 + $0x10] sm:$0xff] %vm609_vm5, %v542_v30 }
 0x13c   : > { %v551_v31 = vpop.f32.mrf.mxu3 }
 0x13d   : > { %615 = vst.msk [vmem:[%s361_s21 + $0x28] sm:$0xff] %vm609_vm5, %v551_v31  ;;  %v592_v32 = vpop.permute.xlu1 %591 }
 0x13e   : > { %608 = vst.msk [vmem:[%s355_s18 + $0x38] sm:$0xff] %vm451_vm3, %v592_v32 }
 0x140   : > { %v545_v33 = vpop.f32.mrf.mxu1 }
 0x141   : > { %613 = vst.msk [vmem:[%s361_s21 + $0x18] sm:$0xff] %vm609_vm5, %v545_v33 }
 0x144   : > { %v554_v34 = vpop.f32.mrf.mxu3 }
 0x145   : > { %616 = vst.msk [vmem:[%s361_s21 + $0x30] sm:$0xff] %vm609_vm5, %v554_v34 }
 0x14c   : > { %v557_v35 = vpop.f32.mrf.mxu3 }
 0x14d   : > { %617 = vst.msk [vmem:[%s361_s21 + $0x38] sm:$0xff] %vm609_vm5, %v557_v35 }
 0x14e PF: > { %s20_s30 = sadd.s32 1, %s797_s30  }
 0x14f   : > { %p17_p4 = scmp.ge.s32.totalorder %s20_s30, 4  }
 0x151   :  { %19 = sbr.rel (!%p17_p4) target bundleno = 1 (0x1), region = 102 }

// kernel: revgat_forward.11
= control target key start
LH: loop header
LB: loop body
LE: loop exit
PB: predicated region body
PF: predicated region fallthrough
CT: control target
= control target key end

     0   :  { %s1245_s21 = smov 0   ;;  %s1646_s0 = inlined_call_operand.vmem [shape: bf16[128,128], index: 0, kind: input, shape index: {}]   ;;  %s1647_s1 = inlined_call_operand.vmem [shape: f32[2,128], index: 1, kind: input, shape index: {}]   ;;  %s1648_s2 = inlined_call_operand.vmem [shape: f32[128,2], index: 2, kind: input, shape index: {}]   ;;  %s1649_s3 = inlined_call_operand.vmem [shape: bf16[128,16], index: 3, kind: input, shape index: {}]   ;;  %s1650_s4 = inlined_call_operand.vmem [shape: f32[128,16], index: 4, kind: input, shape index: {}]   ;;  %s1651_s5 = inlined_call_operand.vmem [shape: f32[128,16], index: 5, kind: input, shape index: {}]   ;;  %s1652_s6 = inlined_call_operand.vmem [shape: f32[128,16], index: 6, kind: output, shape index: {}]  }
   0x1 LB: > { %s997_s22 = sadd.s32 4294967295, %s1204_s21   ;;  %p1001_p0 = scmp.ge.s32.totalorder %s1204_s21, 1  ;;  %s1204_s21 = sphi %s1245_s21, %s16_s21  }
   0x2   : > { %p246_p1 = scmp.lt.s32.totalorder %s1204_s21, 3 }
   0x4   : > { %p247_p2 = pnand %p1001_p0, %p246_p1 }
   0x5   : > { %s1002_s23 = sshll.u32 (!%p247_p2), %s997_s22, 3  ;;  %s1207_s16 = smov (!%p247_p2), 120  }
   0x6   : > { %250 = sbr.rel (%p247_p2) target bundleno = 613 (0x265), region = 44  ;;  %p292_p3 = scmp.lt.s32.totalorder (!%p247_p2), %s1002_s23, 15 }
   0xb   : > { %v1077_v0 = vld [vmem:[%s1649_s3 + $0x38] sm:$0xff]  ;;  %v1206_v1 = vmov 1   ;;  %s1670_s23 = smov (!%p292_p3, %s1002_s23), 15  ;;  %v1076_v2 = vld [vmem:[%s1649_s3 + $0x30] sm:$0xff]  ;;  %v1075_v6 = vld [vmem:[%s1649_s3 + $0x28] sm:$0xff]  ;;  %v1208_v15 = vmov 0  }
   0xc   : > { %1126 = vset.pattern.permute.xlu1 %v1206_v1  ;;  %1125 = vset.pattern.permute.xlu0 %v1206_v1  ;;  %s1265_s28 = sshll.u32 %s1670_s23, 3  ;;  %v1074_v7 = vld [vmem:[%s1649_s3 + $0x20] sm:$0xff]  ;;  %v1073_v11 = vld [vmem:[%s1649_s3 + $0x18] sm:$0xff]  ;;  %v1072_v12 = vld [vmem:[%s1649_s3 + $0x10] sm:$0xff]  ;;  %s1003_s22 = sshll.u32 %s1670_s23, 2 }
   0xd   : > { %1127 = vset.pattern.permute.xlu2 %v1206_v1  ;;  %1097 = vmatpush.bf16.msra.mxu2 %v1077_v0  ;;  %s301_s7 = scalar_lea.vmem %s1648_s2, %s1265_s28  ;;  %v1071_v16 = vld [vmem:[%s1649_s3 + $0x8] sm:$0xff]  ;;  %v1302_v17 = vld [vmem:[%s1647_s1 + $0x1] ss:$0 sm:$0xff]  ;;  %s1314_s26 = scalar_lea.vmem %s1646_s0, %s1003_s22 }
   0xe   : > { %567 = vmatpush.bf16.msra.mxu0 %v1077_v0  ;;  %v366_v3 = vld [vmem:[%s301_s7 + $0x20] sm:$0xff]  ;;  %v368_v5 = vld [vmem:[%s301_s7 + $0x30] sm:$0xff]  ;;  %v367_v8 = vld [vmem:[%s301_s7 + $0x28] sm:$0xff]  ;;  %s1589_s10 = scalar_lea.vmem %s1650_s4, %s1265_s28  ;;  %s1595_s13 = scalar_lea.vmem %s1651_s5, %s1265_s28 }
   0xf   : > { %v362_v4 = vld [vmem:[%s301_s7] sm:$0xff]  ;;  %630 = vperm.xlu0 %1125, %v366_v3   ;;  %638 = vperm.xlu2 %1127, %v368_v5   ;;  %v363_v9 = vld [vmem:[%s301_s7 + $0x8] sm:$0xff]  ;;  %v369_v10 = vld [vmem:[%s301_s7 + $0x38] sm:$0xff] }
  0x10   : > { %614 = vperm.xlu1 %1126, %v362_v4   ;;  %v1283_v13 = vld [vmem:[%s301_s7 + $0x10] sm:$0xff]  ;;  %v1285_v14 = vld [vmem:[%s301_s7 + $0x18] sm:$0xff]  ;;  %v1079_v24 = vld [vmem:[%s1314_s26] sm:$0xff]   ;;  %s1209_s7 = smov 8  }
  0x11   : > { %1098 = vmatpush.bf16.msra.mxu2 %v1076_v2  ;;  %v1095_v23 = vld [vmem:[%s1314_s26 + $0x10] sm:$0xff]   ;;  %v1080_v26 = vunpack.c.l.bf16 %v1079_v24  ;;  %v1070_v35 = vld [vmem:[%s1649_s3] sm:$0xff]  ;;  %v1081_v41 = vunpack.c.h.bf16 %v1079_v24 }
  0x12   : > { %568 = vmatpush.bf16.msra.mxu0 %v1076_v2  ;;  %v1088_v25 = vunpack.c.l.bf16 %v1095_v23  ;;  %v1089_v40 = vunpack.c.h.bf16 %v1095_v23 }
  0x13   : > { %vm1324_vm1 = vcmp.gt.f32.partialorder %v1080_v26, 0.0  ;;  %vm1347_vm5 = vcmp.gt.f32.partialorder %v1081_v41, 0.0 }
  0x14   : > { %vm1320_vm0 = vcmp.gt.f32.partialorder %v1088_v25, 0.0  ;;  %vm1343_vm4 = vcmp.gt.f32.partialorder %v1089_v40, 0.0 }
  0x15   : > { %1099 = vmatpush.bf16.msra.mxu2 %v1075_v6 }
  0x16   : > { %569 = vmatpush.bf16.msra.mxu0 %v1075_v6 }
  0x17   : > { %634 = vperm.xlu0 %1125, %v367_v8   ;;  %642 = vperm.xlu2 %1127, %v369_v10  }
  0x18   : > { %618 = vperm.xlu1 %1126, %v363_v9  }
  0x19   : > { %1100 = vmatpush.bf16.msra.mxu2 %v1074_v7 }
  0x1a   : > { %570 = vmatpush.bf16.msra.mxu0 %v1074_v7 }
  0x1d   : > { %1101 = vmatpush.bf16.msra.mxu2 %v1073_v11 }
  0x1e   : > { %571 = vmatpush.bf16.msra.mxu0 %v1073_v11 }
  0x1f   : > { %622 = vperm.xlu0 %1125, %v1283_v13   ;;  %768 = vrot.lane.b32.xlu2 %v1077_v0, %s1207_s16 }
  0x20   : > { %626 = vperm.xlu1 %1126, %v1285_v14   ;;  %1128 = vset.pattern.permute.xlu2 %v1208_v15 }
  0x21   : > { %1102 = vmatpush.bf16.msra.mxu2 %v1072_v12 }
  0x22   : > { %572 = vmatpush.bf16.msra.mxu0 %v1072_v12 }
  0x25   : > { %1103 = vmatpush.bf16.msra.mxu2 %v1071_v16 }
  0x26   : > { %573 = vmatpush.bf16.msra.mxu0 %v1071_v16 }
  0x27   : > { %766 = vrot.lane.b32.xlu0 %v1076_v2, %s1207_s16  ;;  %392 = vperm.xlu2 %1128, %v366_v3  }
  0x28   : > { %764 = vrot.lane.b32.xlu1 %v1075_v6, %s1207_s16  ;;  %1129 = vset.pattern.permute.xlu0 %v1208_v15  ;;  %v1373_v6 = vld [vmem:[%s1647_s1] ss:$0 sm:$0xff] }
  0x29   : > { %1130 = vset.pattern.permute.xlu1 %v1208_v15  ;;  %1104 = vmatpush.bf16.msra.mxu2 %v1070_v35 }
  0x2a   : > { %574 = vmatpush.bf16.msra.mxu0 %v1070_v35 }
  0x2f   : > { %397 = vperm.xlu0 %1129, %v367_v8   ;;  %760 = vrot.lane.b32.xlu2 %v1073_v11, %s1207_s16 }
  0x30   : > { %762 = vrot.lane.b32.xlu1 %v1074_v7, %s1207_s16 }
  0x37   : > { %407 = vperm.xlu0 %1129, %v369_v10   ;;  %377 = vperm.xlu2 %1128, %v363_v9   ;;  %v1096_v10 = vld [vmem:[%s1314_s26 + $0x18] sm:$0xff]  }
  0x38   : > { %372 = vperm.xlu1 %1130, %v362_v4   ;;  %v1094_v4 = vld [vmem:[%s1314_s26 + $0x8] sm:$0xff]   ;;  %v1092_v24 = vunpack.c.l.bf16 %v1096_v10 }
  0x39   : > { %v1084_v8 = vunpack.c.l.bf16 %v1094_v4 }
  0x3a   : > { %vm1406_vm14 = vcmp.gt.f32.partialorder %v1092_v24, 0.0 }
  0x3b   : > { %vm1377_vm9 = vcmp.gt.f32.partialorder %v1084_v8, 0.0 }
  0x3f   : > { %758 = vrot.lane.b32.xlu2 %v1072_v12, %s1207_s16 }
  0x40   : > { %756 = vrot.lane.b32.xlu1 %v1071_v16, %s1207_s16 }
  0x47   : > { %402 = vperm.xlu2 %1128, %v368_v5  }
  0x69   : > { %v639_v18 = vpop.permute.xlu2 %638 }
  0x6a   : > { %v1305_v19 = vadd.f32 %v1302_v17, %v639_v18 }
  0x6c   : > { %vm660_vm13 = vcmp.gt.f32.partialorder %v1305_v19, 0.0 }
  0x71   : > { %v643_v20 = vpop.permute.xlu2 %642 }
  0x72   : > { %v1308_v21 = vadd.f32 %v1302_v17, %v643_v20 }
  0x74   : > { %v669_v12 = vmul.f32 0.2, %v1308_v21  ;;  %vm661_vm10 = vcmp.gt.f32.partialorder %v1308_v21, 0.0 }
  0x76   : > { %v677_v20 = vsel %vm661_vm10, %v1308_v21, %v669_v12 }
  0x79   : > { %v769_v22 = vpop.permute.xlu2 %768 }
  0x7a   : > { %778 = vmatpush.bf16.msra.mxu1 %v769_v22  ;;  %1105 = vmatpush.bf16.msra.mxu3 %v769_v22  ;;  %v668_v22 = vmul.f32 0.2, %v1305_v19 }
  0x81   : > { %v631_v27 = vpop.permute.xlu0 %630  ;;  %v393_v46 = vpop.permute.xlu2 %392 }
  0x82   : > { %v615_v28 = vpop.permute.xlu1 %614  ;;  %v650_v29 = vadd.f32 %v1302_v17, %v631_v27  ;;  %v415_v16 = vadd.f32 %v1373_v6, %v393_v46 }
  0x83   : > { %v646_v30 = vadd.f32 %v1302_v17, %v615_v28 }
  0x84   : > { %v666_v33 = vmul.f32 0.2, %v650_v29  ;;  %vm658_vm2 = vcmp.gt.f32.partialorder %v650_v29, 0.0  ;;  %v431_v27 = vmul.f32 0.2, %v415_v16  ;;  %vm423_vm15 = vcmp.gt.f32.partialorder %v415_v16, 0.0 }
  0x85   : > { %v662_v34 = vmul.f32 0.2, %v646_v30  ;;  %vm654_vm3 = vcmp.gt.f32.partialorder %v646_v30, 0.0 }
  0x86   : > { %v674_v36 = vsel %vm658_vm2, %v650_v29, %v666_v33  ;;  %v676_v29 = vsel %vm660_vm13, %v1305_v19, %v668_v22 }
  0x87   : > { %v670_v37 = vsel %vm654_vm3, %v646_v30, %v662_v34  ;;  %v1333_v38 = vsel %vm1320_vm0, %v674_v36, -1e+30  ;;  %v1415_v34 = vsel %vm1406_vm14, %v676_v29, -1e+30 }
  0x88   : > { %v1337_v39 = vsel %vm1324_vm1, %v670_v37, -1e+30  ;;  %694 = vmax.xlane.f32.xlu0 %v1333_v38  ;;  %v1085_v37 = vunpack.c.h.bf16 %v1094_v4 }
  0x89   : > { %686 = vmax.xlane.f32.xlu2 %v1337_v39  ;;  %v635_v42 = vpop.permute.xlu0 %634  ;;  %v761_v58 = vpop.permute.xlu2 %760 }
  0x8a   : > { %v619_v43 = vpop.permute.xlu1 %618  ;;  %v651_v44 = vadd.f32 %v1302_v17, %v635_v42 }
  0x8b   : > { %v647_v45 = vadd.f32 %v1302_v17, %v619_v43 }
  0x8c   : > { %v667_v49 = vmul.f32 0.2, %v651_v44  ;;  %vm659_vm6 = vcmp.gt.f32.partialorder %v651_v44, 0.0 }
  0x8d   : > { %v663_v50 = vmul.f32 0.2, %v647_v45  ;;  %vm655_vm7 = vcmp.gt.f32.partialorder %v647_v45, 0.0 }
  0x8e   : > { %v675_v51 = vsel %vm659_vm6, %v651_v44, %v667_v49  ;;  %vm1426_vm6 = vcmp.gt.f32.partialorder %v1085_v37, 0.0 }
  0x8f   : > { %v671_v52 = vsel %vm655_vm7, %v647_v45, %v663_v50  ;;  %v1353_v53 = vsel %vm1343_vm4, %v675_v51, -1e+30 }
  0x90   : > { %v1357_v54 = vsel %vm1347_vm5, %v671_v52, -1e+30  ;;  %696 = vmax.xlane.f32.xlu1 %v1353_v53 }
  0x91   : > { %688 = vmax.xlane.f32.xlu0 %v1357_v54  ;;  %v623_v55 = vpop.permute.xlu0 %622  ;;  %v378_v61 = vpop.permute.xlu2 %377 }
  0x92   : > { %v627_v56 = vpop.permute.xlu1 %626  ;;  %v648_v3 = vadd.f32 %v1302_v17, %v623_v55  ;;  %v412_v33 = vadd.f32 %v1373_v6, %v378_v61 }
  0x93   : > { %v1362_v57 = vadd.f32 %v1302_v17, %v627_v56 }
  0x94   : > { %v664_v7 = vmul.f32 0.2, %v648_v3  ;;  %vm656_vm8 = vcmp.gt.f32.partialorder %v648_v3, 0.0  ;;  %v428_v41 = vmul.f32 0.2, %v412_v33  ;;  %vm420_vm7 = vcmp.gt.f32.partialorder %v412_v33, 0.0 }
  0x95   : > { %v665_v36 = vmul.f32 0.2, %v1362_v57  ;;  %vm657_vm3 = vcmp.gt.f32.partialorder %v1362_v57, 0.0 }
  0x96   : > { %v672_v11 = vsel %vm656_vm8, %v648_v3, %v664_v7  ;;  %v436_v49 = vsel %vm420_vm7, %v412_v33, %v428_v41  ;;  %vm1047_vm7 = vmpackc.low %vm1426_vm6, %vm1377_vm9 }
  0x97   : > { %v1385_v15 = vsel %vm1377_vm9, %v672_v11, -1e+30  ;;  %v673_v44 = vsel %vm657_vm3, %v1362_v57, %v665_v36  ;;  %v1443_v52 = vsel %vm1347_vm5, %v436_v49, -1e+30 }
  0x98   : > { %v1438_v46 = vsel %vm1426_vm6, %v673_v44, -1e+30 }
  0x99   : > { %v767_v59 = vpop.permute.xlu0 %766  ;;  %v759_v63 = vpop.permute.xlu2 %758 }
  0x9a   : > { %v765_v60 = vpop.permute.xlu1 %764  ;;  %779 = vmatpush.bf16.msra.mxu1 %v767_v59  ;;  %1106 = vmatpush.bf16.msra.mxu3 %v767_v59 }
  0x9e   : > { %780 = vmatpush.bf16.msra.mxu1 %v765_v60  ;;  %1107 = vmatpush.bf16.msra.mxu3 %v765_v60 }
  0xa1   : > { %387 = vperm.xlu2 %1128, %v1285_v14   ;;  %v398_v5 = vpop.permute.xlu0 %397  ;;  %v403_v17 = vpop.permute.xlu2 %402 }
  0xa2   : > { %v763_v62 = vpop.permute.xlu1 %762  ;;  %v416_v9 = vadd.f32 %v1373_v6, %v398_v5  ;;  %v417_v25 = vadd.f32 %v1373_v6, %v403_v17 }
  0xa3   : > { %781 = vmatpush.bf16.msra.mxu1 %v763_v62  ;;  %1108 = vmatpush.bf16.msra.mxu3 %v763_v62 }
  0xa4   : > { %v432_v14 = vmul.f32 0.2, %v416_v9  ;;  %vm424_vm11 = vcmp.gt.f32.partialorder %v416_v9, 0.0  ;;  %v433_v30 = vmul.f32 0.2, %v417_v25  ;;  %vm425_vm2 = vcmp.gt.f32.partialorder %v417_v25, 0.0 }
  0xa5   : > { %382 = vperm.xlu0 %1129, %v1283_v13   ;;  %v1093_v13 = vunpack.c.h.bf16 %v1096_v10 }
  0xa6   : > { %v440_v23 = vsel %vm424_vm11, %v416_v9, %v432_v14  ;;  %v441_v40 = vsel %vm425_vm2, %v417_v25, %v433_v30  ;;  %vm1050_vm2 = vmpackc.low %vm1343_vm4, %vm1320_vm0 }
  0xa7   : > { %782 = vmatpush.bf16.msra.mxu1 %v761_v58  ;;  %1109 = vmatpush.bf16.msra.mxu3 %v761_v58  ;;  %vm1389_vm12 = vcmp.gt.f32.partialorder %v1093_v13, 0.0  ;;  %v1404_v28 = vsel %vm1343_vm4, %v440_v23, -1e+30  ;;  %v1433_v45 = vsel %vm1406_vm14, %v441_v40, -1e+30 }
  0xa8   : > { %v1399_v26 = vsel %vm1389_vm12, %v677_v20, -1e+30  ;;  %vm1053_vm3 = vmpackc.low %vm1389_vm12, %vm1406_vm14 }
  0xa9   : > { %754 = vrot.lane.b32.xlu1 %v1070_v35, %s1207_s16  ;;  %v439_v35 = vsel %vm423_vm15, %v415_v16, %v431_v27  ;;  %v408_v51 = vpop.permute.xlu0 %407  ;;  %vm1044_vm15 = vmpackc.low %vm1347_vm5, %vm1324_vm1  ;;  %s1604_s16 = scalar_lea.vmem %s1652_s6, %s1265_s28 }
  0xaa   : > { %v373_v0 = vpop.permute.xlu1 %372  ;;  %v1422_v19 = vsel %vm1320_vm0, %v439_v35, -1e+30  ;;  %v418_v55 = vadd.f32 %v1373_v6, %v408_v51 }
  0xab   : > { %783 = vmatpush.bf16.msra.mxu1 %v759_v63  ;;  %1110 = vmatpush.bf16.msra.mxu3 %v759_v63  ;;  %v411_v42 = vadd.f32 %v1373_v6, %v373_v0 }
  0xac   : > { %v434_v58 = vmul.f32 0.2, %v418_v55  ;;  %vm426_vm10 = vcmp.gt.f32.partialorder %v418_v55, 0.0 }
  0xad   : > { %1131 = vset.pattern.permute.xlu0 %v1206_v1  ;;  %v427_v50 = vmul.f32 0.2, %v411_v42  ;;  %vm419_vm8 = vcmp.gt.f32.partialorder %v411_v42, 0.0 }
  0xae   : > { %v442_v59 = vsel %vm426_vm10, %v418_v55, %v434_v58 }
  0xaf   : > { %v435_v56 = vsel %vm419_vm8, %v411_v42, %v427_v50  ;;  %v1454_v60 = vsel %vm1389_vm12, %v442_v59, -1e+30 }
  0xb0   : > { %v1449_v57 = vsel %vm1324_vm1, %v435_v56, -1e+30 }
  0xb2   : > { %v757_v2 = vpop.permute.xlu1 %756 }
  0xb3   : > { %784 = vmatpush.bf16.msra.mxu1 %v757_v2  ;;  %1111 = vmatpush.bf16.msra.mxu3 %v757_v2 }
  0xca   : > { %690 = vmax.xlane.f32.xlu2 %v1385_v15 }
  0xcf   : > { %700 = vmax.xlane.f32.xlu0 %v1399_v26 }
  0xd2   : > { %461 = vmax.xlane.f32.xlu2 %v1404_v28 }
  0xd3   : > { %698 = vmax.xlane.f32.xlu1 %v1415_v34 }
  0xd7   : > { %459 = vmax.xlane.f32.xlu0 %v1422_v19 }
  0xda   : > { %463 = vmax.xlane.f32.xlu2 %v1433_v45 }
  0xdb   : > { %692 = vmax.xlane.f32.xlu1 %v1438_v46 }
  0xdf   : > { %453 = vmax.xlane.f32.xlu0 %v1443_v52 }
  0xe3   : > { %451 = vmax.xlane.f32.xlu1 %v1449_v57 }
  0xeb   : > { %465 = vmax.xlane.f32.xlu1 %v1454_v60 }
  0xfb   : > { %v695_v0 = vpop.xlane.xlu0 %694 }
  0xfc   : > { %v687_v61 = vpop.xlane.xlu2 %686  ;;  %v706_v13 = vsub.f32 %v1333_v38, %v695_v0 }
  0xfd   : > { %v702_v62 = vsub.f32 %v1337_v39, %v687_v61 }
  0xfe   : > { %v718_v17 = vmul.f32 1.442695, %v706_v13 }
  0xff   : > { %v710_v63 = vmul.f32 1.442695, %v702_v62 }
 0x101   : > { %1134 = vpow2.f32 %v710_v63 }
 0x103   : > { %v697_v7 = vpop.xlane.xlu1 %696 }
 0x104   : > { %v388_v2 = vpop.permute.xlu2 %387  ;;  %v689_v9 = vpop.xlane.xlu0 %688  ;;  %v707_v39 = vsub.f32 %v1353_v53, %v697_v7 }
 0x105   : > { %v414_v3 = vadd.f32 %v1373_v6, %v388_v2  ;;  %v703_v12 = vsub.f32 %v1357_v54, %v689_v9 }
 0x106   : > { %v720_v14 = vmul.f32 1.442695, %v707_v39 }
 0x107   : > { %v1135_v4 = vpop.eup %1134  ;;  %v430_v5 = vmul.f32 0.2, %v414_v3  ;;  %vm422_vm11 = vcmp.gt.f32.partialorder %v414_v3, 0.0  ;;  %v712_v16 = vmul.f32 1.442695, %v703_v12 }
 0x108   : > { %v726_v8 = vsel %vm1324_vm1, %v1135_v4, 0.0  ;;  %1136 = vpow2.f32 %v720_v14 }
 0x109   : > { %734 = vadd.xlane.f32.xlu1 %v726_v8  ;;  %v438_v10 = vsel %vm422_vm11, %v414_v3, %v430_v5  ;;  %1138 = vpow2.f32 %v712_v16 }
 0x10a   : > { %v1463_v11 = vsel %vm1426_vm6, %v438_v10, -1e+30  ;;  %1140 = vpow2.f32 %v718_v17 }
 0x10b   : > { %457 = vmax.xlane.f32.xlu2 %v1463_v11 }
 0x10e   : > { %v1137_v23 = vpop.eup %1136 }
 0x10f   : > { %v1139_v25 = vpop.eup %1138  ;;  %v731_v0 = vsel %vm1343_vm4, %v1137_v23, 0.0 }
 0x110   : > { %v1141_v38 = vpop.eup %1140  ;;  %v727_v30 = vsel %vm1347_vm5, %v1139_v25, 0.0 }
 0x111   : > { %v1063_v29 = vpack.c.bf16 %v1137_v23, %v1141_v38  ;;  %v730_v33 = vsel %vm1320_vm0, %v1141_v38, 0.0 }
 0x117   : > { %v383_v20 = vpop.permute.xlu0 %382 }
 0x118   : > { %v413_v22 = vadd.f32 %v1373_v6, %v383_v20  ;;  %v1057_v6 = vpack.c.bf16 %v1139_v25, %v1135_v4 }
 0x11a   : > { %v429_v24 = vmul.f32 0.2, %v413_v22  ;;  %vm421_vm13 = vcmp.gt.f32.partialorder %v413_v22, 0.0 }
 0x11b   : > { %v755_v53 = vpop.permute.xlu1 %754 }
 0x11c   : > { %v437_v27 = vsel %vm421_vm13, %v413_v22, %v429_v24  ;;  %785 = vmatpush.bf16.msra.mxu1 %v755_v53  ;;  %1112 = vmatpush.bf16.msra.mxu3 %v755_v53 }
 0x11d   : > { %v1476_v54 = vsel %vm1377_vm9, %v437_v27, -1e+30 }
 0x11e   : > { %455 = vmax.xlane.f32.xlu0 %v1476_v54 }
 0x11f   : > { %1058 = vmatmul.msk.bf16.vlgmr.msra.gmra.mxu1 %vm1044_vm15, %v1057_v6  ;;  %1064 = vmatmul.msk.bf16.vlgmr.msra.gmra.mxu3 %vm1050_vm2, %v1063_v29 }
 0x126   : > { %736 = vadd.xlane.f32.xlu0 %v727_v30 }
 0x12e   : > { %742 = vadd.xlane.f32.xlu0 %v730_v33 }
 0x13d   : > { %v691_v35 = vpop.xlane.xlu2 %690 }
 0x13e   : > { %v704_v36 = vsub.f32 %v1385_v15, %v691_v35 }
 0x140   : > { %v714_v37 = vmul.f32 1.442695, %v704_v36 }
 0x142   : > { %1142 = vpow2.f32 %v714_v37  ;;  %v701_v40 = vpop.xlane.xlu0 %700 }
 0x143   : > { %v709_v41 = vsub.f32 %v1399_v26, %v701_v40 }
 0x145   : > { %v724_v42 = vmul.f32 1.442695, %v709_v41  ;;  %v462_v44 = vpop.xlane.xlu2 %461 }
 0x146   : > { %v472_v49 = vsub.f32 %v1404_v28, %v462_v44  ;;  %v699_v50 = vpop.xlane.xlu1 %698 }
 0x147   : > { %1144 = vpow2.f32 %v724_v42  ;;  %v708_v55 = vsub.f32 %v1415_v34, %v699_v50 }
 0x148   : > { %v1143_v51 = vpop.eup %1142  ;;  %v485_v58 = vmul.f32 1.442695, %v472_v49 }
 0x149   : > { %v728_v56 = vsel %vm1377_vm9, %v1143_v51, 0.0  ;;  %v722_v59 = vmul.f32 1.442695, %v708_v55 }
 0x14a   : > { %v460_v15 = vpop.xlane.xlu0 %459  ;;  %738 = vadd.xlane.f32.xlu2 %v728_v56 }
 0x14b   : > { %v471_v61 = vsub.f32 %v1422_v19, %v460_v15  ;;  %1146 = vpow2.f32 %v722_v59 }
 0x14c   : > { %1148 = vpow2.f32 %v485_v58 }
 0x14d   : > { %v1145_v26 = vpop.eup %1144  ;;  %v483_v62 = vmul.f32 1.442695, %v471_v61  ;;  %v464_v39 = vpop.xlane.xlu2 %463 }
 0x14e   : > { %v733_v28 = vsel %vm1389_vm12, %v1145_v26, 0.0  ;;  %v693_v63 = vpop.xlane.xlu1 %692  ;;  %v473_v14 = vsub.f32 %v1433_v45, %v464_v39 }
 0x14f   : > { %1150 = vpow2.f32 %v483_v62  ;;  %748 = vadd.xlane.f32.xlu0 %v733_v28  ;;  %v705_v34 = vsub.f32 %v1438_v46, %v693_v63 }
 0x150   : > { %v487_v17 = vmul.f32 1.442695, %v473_v14 }
 0x151   : > { %v1147_v2 = vpop.eup %1146  ;;  %v716_v3 = vmul.f32 1.442695, %v705_v34 }
 0x152   : > { %v454_v4 = vpop.xlane.xlu0 %453  ;;  %744 = vadd.xlane.f32.xlu2 %v731_v0  ;;  %v1066_v5 = vpack.c.bf16 %v1145_v26, %v1147_v2  ;;  %v1514_v7 = vpop.eup %1148  ;;  %v732_v25 = vsel %vm1406_vm14, %v1147_v2, 0.0 }
 0x153   : > { %v468_v19 = vsub.f32 %v1443_v52, %v454_v4  ;;  %1152 = vpow2.f32 %v716_v3  ;;  %v496_v50 = vsel %vm1343_vm4, %v1514_v7, 0.0 }
 0x154   : > { %1067 = vmatmul.msk.bf16.gmra.mxu3 %vm1053_vm3, %v1066_v5 }
 0x155   : > { %v1151_v8 = vpop.eup %1150  ;;  %v477_v9 = vmul.f32 1.442695, %v468_v19 }
 0x156   : > { %v1051_v46 = vpack.c.bf16 %v1514_v7, %v1151_v8  ;;  %v452_v10 = vpop.xlane.xlu1 %451  ;;  %v495_v30 = vsel %vm1320_vm0, %v1151_v8, 0.0  ;;  %vm855_vm0 = vcmask 64512  }
 0x157   : > { %v467_v12 = vsub.f32 %v1449_v57, %v452_v10  ;;  %1154 = vpow2.f32 %v477_v9 }
 0x158   : > { %1052 = vmatmul.msk.bf16.vlgmr.msra.gmra.mxu2 %vm1050_vm2, %v1051_v46 }
 0x159   : > { %v1153_v52 = vpop.eup %1152  ;;  %v475_v13 = vmul.f32 1.442695, %v467_v12 }
 0x15a   : > { %v729_v16 = vsel %vm1426_vm6, %v1153_v52, 0.0  ;;  %v1060_v57 = vpack.c.bf16 %v1153_v52, %v1143_v51 }
 0x15b   : > { %1156 = vpow2.f32 %v475_v13  ;;  %740 = vadd.xlane.f32.xlu1 %v729_v16 }
 0x15c   : > { %1061 = vmatmul.msk.bf16.gmra.mxu1 %vm1047_vm7, %v1060_v57  ;;  %1158 = vpow2.f32 %v487_v17 }
 0x15d   : > { %v1155_v23 = vpop.eup %1154 }
 0x15e   : > { %v466_v20 = vpop.xlane.xlu1 %465  ;;  %v492_v6 = vsel %vm1347_vm5, %v1155_v23, 0.0 }
 0x15f   : > { %v474_v22 = vsub.f32 %v1454_v60, %v466_v20 }
 0x161   : > { %v1157_v24 = vpop.eup %1156  ;;  %v489_v45 = vmul.f32 1.442695, %v474_v22 }
 0x162   : > { %v491_v53 = vsel %vm1324_vm1, %v1157_v24, 0.0  ;;  %v1045_v27 = vpack.c.bf16 %v1155_v23, %v1157_v24  ;;  %v1159_v60 = vpop.eup %1158  ;;  %v868_v24 = vld [vmem:[%s1589_s10 + $0x20] sm:$0xff]  ;;  %vm896_vm1 = vcmask 130048  }
 0x163   : > { %1160 = vpow2.f32 %v489_v45  ;;  %746 = vadd.xlane.f32.xlu1 %v732_v25  ;;  %499 = vadd.xlane.f32.xlu2 %v491_v53  ;;  %v497_v31 = vsel %vm1406_vm14, %v1159_v60, 0.0  ;;  %v884_v53 = vld [vmem:[%s1595_s13 + $0x20] sm:$0xff] }
 0x164   : > { %1046 = vmatmul.msk.bf16.vlgmr.msra.gmra.mxu0 %vm1044_vm15, %v1045_v27 }
 0x169   : > { %v1161_v38 = vpop.eup %1160 }
 0x16a   : > { %v1054_v29 = vpack.c.bf16 %v1161_v38, %v1159_v60  ;;  %v498_v32 = vsel %vm1389_vm12, %v1161_v38, 0.0 }
 0x16b   : > { %501 = vadd.xlane.f32.xlu1 %v492_v6 }
 0x16c   : > { %1055 = vmatmul.msk.bf16.gmra.mxu2 %vm1053_vm3, %v1054_v29 }
 0x173   : > { %507 = vadd.xlane.f32.xlu1 %v495_v30 }
 0x17b   : > { %513 = vadd.xlane.f32.xlu1 %v498_v32  ;;  %v865_v32 = vld [vmem:[%s1589_s10 + $0x8] sm:$0xff] }
 0x17c   : > { %v735_v43 = vpop.xlane.xlu1 %734 }
 0x17e   : > { %v458_v33 = vpop.xlane.xlu2 %457 }
 0x17f   : > { %v470_v48 = vsub.f32 %v1463_v11, %v458_v33 }
 0x181   : > { %v481_v35 = vmul.f32 1.442695, %v470_v48  ;;  %v881_v48 = vld [vmem:[%s1595_s13 + $0x8] sm:$0xff] }
 0x183   : > { %1162 = vpow2.f32 %v481_v35 }
 0x189   : > { %v1163_v36 = vpop.eup %1162 }
 0x18a   : > { %v494_v37 = vsel %vm1426_vm6, %v1163_v36, 0.0 }
 0x18b   : > { %505 = vadd.xlane.f32.xlu2 %v494_v37 }
 0x191   : > { %v456_v40 = vpop.xlane.xlu0 %455 }
 0x192   : > { %v469_v41 = vsub.f32 %v1476_v54, %v456_v40 }
 0x193   : > { %511 = vadd.xlane.f32.xlu2 %v497_v31 }
 0x194   : > { %v479_v42 = vmul.f32 1.442695, %v469_v41 }
 0x196   : > { %1164 = vpow2.f32 %v479_v42 }
 0x199   : > { %v737_v18 = vpop.xlane.xlu0 %736 }
 0x19c   : > { %v1165_v44 = vpop.eup %1164  ;;  %v787_v21 = vpop.f32.mrf.mxu1 }
 0x19d   : > { %v493_v11 = vsel %vm1377_vm9, %v1165_v44, 0.0  ;;  %v1048_v49 = vpack.c.bf16 %v1163_v36, %v1165_v44  ;;  %v864_v44 = vld [vmem:[%s1589_s10] sm:$0xff] }
 0x19e   : > { %503 = vadd.xlane.f32.xlu0 %v493_v11 }
 0x19f   : > { %1049 = vmatmul.msk.bf16.gmra.mxu0 %vm1047_vm7, %v1048_v49  ;;  %v880_v49 = vld [vmem:[%s1595_s13] sm:$0xff] }
 0x1a1   : > { %v743_v54 = vpop.xlane.xlu0 %742 }
 0x1a2   : > { %1166 = vrcp.f32 %v743_v54  ;;  %v797_v55 = vpop.f32.mrf.mxu3 }
 0x1a3   : > { %1168 = vrcp.f32 %v737_v18 }
 0x1a4   : > { %v789_v58 = vpop.f32.mrf.mxu1  ;;  %1170 = vrcp.f32 %v735_v43 }
 0x1a6   : > { %509 = vadd.xlane.f32.xlu0 %v496_v50 }
 0x1a8   : > { %v1167_v51 = vpop.eup %1166 }
 0x1a9   : > { %v819_v56 = vmul.f32 %v1167_v51, %v797_v55  ;;  %v1169_v1 = vpop.eup %1168 }
 0x1aa   : > { %v816_v59 = vmul.f32 %v1169_v1, %v789_v58  ;;  %v1171_v15 = vpop.eup %1170  ;;  %v799_v26 = vpop.f32.mrf.mxu3  ;;  %v871_v1 = vld [vmem:[%s1589_s10 + $0x38] sm:$0xff] }
 0x1ab   : > { %839 = vrot.lane.b32.xlu2 %v819_v56, %s1209_s7  ;;  %v815_v61 = vmul.f32 %v1171_v15, %v787_v21  ;;  %v887_v15 = vld [vmem:[%s1595_s13 + $0x38] sm:$0xff] }
 0x1b3   : > { %833 = vrot.lane.b32.xlu2 %v816_v59, %s1209_s7 }
 0x1ba   : > { %831 = vrot.lane.b32.xlu0 %v815_v61, %s1209_s7 }
 0x1bd   : > { %v739_v62 = vpop.xlane.xlu2 %738 }
 0x1be   : > { %1172 = vrcp.f32 %v739_v62 }
 0x1c2   : > { %v749_v28 = vpop.xlane.xlu0 %748 }
 0x1c3   : > { %1174 = vrcp.f32 %v749_v28 }
 0x1c4   : > { %v1173_v0 = vpop.eup %1172 }
 0x1c5   : > { %v745_v19 = vpop.xlane.xlu2 %744 }
 0x1c9   : > { %v1175_v4 = vpop.eup %1174 }
 0x1ce   : > { %v741_v47 = vpop.xlane.xlu1 %740 }
 0x1d6   : > { %v747_v63 = vpop.xlane.xlu1 %746  ;;  %v500_v13 = vpop.xlane.xlu2 %499 }
 0x1d7   : > { %v802_v34 = vpop.f32.mrf.mxu3  ;;  %1176 = vrcp.f32 %v747_v63 }
 0x1d8   : > { %1178 = vrcp.f32 %v741_v47 }
 0x1d9   : > { %v792_v2 = vpop.f32.mrf.mxu1  ;;  %1180 = vrcp.f32 %v745_v19 }
 0x1da   : > { %v817_v3 = vmul.f32 %v1173_v0, %v792_v2  ;;  %v882_v2 = vld [vmem:[%s1595_s13 + $0x10] sm:$0xff] }
 0x1db   : > { %v586_v23 = vpop.f32.mrf.mxu2 }
 0x1dc   : > { %835 = vrot.lane.b32.xlu1 %v817_v3, %s1209_s7 }
 0x1dd   : > { %v1177_v5 = vpop.eup %1176 }
 0x1de   : > { %v1179_v46 = vpop.eup %1178  ;;  %v821_v10 = vmul.f32 %v1177_v5, %v802_v34  ;;  %v502_v14 = vpop.xlane.xlu1 %501  ;;  %v866_v34 = vld [vmem:[%s1589_s10 + $0x10] sm:$0xff] }
 0x1df   : > { %v804_v7 = vpop.f32.mrf.mxu3  ;;  %v1181_v12 = vpop.eup %1180 }
 0x1e0   : > { %v822_v8 = vmul.f32 %v1175_v4, %v804_v7  ;;  %v820_v52 = vmul.f32 %v1181_v12, %v799_v26 }
 0x1e1   : > { %v794_v9 = vpop.f32.mrf.mxu1  ;;  %v576_v20 = vpop.f32.mrf.mxu0 }
 0x1e2   : > { %v818_v39 = vmul.f32 %v1179_v46, %v794_v9  ;;  %845 = vrot.lane.b32.xlu2 %v822_v8, %s1209_s7  ;;  %v867_v9 = vld [vmem:[%s1589_s10 + $0x18] sm:$0xff] }
 0x1e3   : > { %v588_v31 = vpop.f32.mrf.mxu2 }
 0x1e4   : > { %837 = vrot.lane.b32.xlu0 %v818_v39, %s1209_s7  ;;  %843 = vrot.lane.b32.xlu1 %v821_v10, %s1209_s7  ;;  %v870_v39 = vld [vmem:[%s1589_s10 + $0x30] sm:$0xff] }
 0x1e6   : > { %v508_v57 = vpop.xlane.xlu1 %507 }
 0x1e7   : > { %1182 = vrcp.f32 %v508_v57 }
 0x1e8   : > { %1184 = vrcp.f32 %v502_v14 }
 0x1e9   : > { %v578_v38 = vpop.f32.mrf.mxu0  ;;  %1186 = vrcp.f32 %v500_v13  ;;  %v883_v13 = vld [vmem:[%s1595_s13 + $0x18] sm:$0xff] }
 0x1ec   : > { %841 = vrot.lane.b32.xlu0 %v820_v52, %s1209_s7 }
 0x1ed   : > { %v1183_v22 = vpop.eup %1182 }
 0x1ee   : > { %v608_v45 = vmul.f32 %v1183_v22, %v586_v23  ;;  %v1185_v29 = vpop.eup %1184  ;;  %v514_v55 = vpop.xlane.xlu1 %513 }
 0x1ef   : > { %v605_v30 = vmul.f32 %v1185_v29, %v578_v38  ;;  %v1187_v42 = vpop.eup %1186  ;;  %v591_v50 = vpop.f32.mrf.mxu2  ;;  %1188 = vrcp.f32 %v514_v55 }
 0x1f0   : > { %v604_v18 = vmul.f32 %v1187_v42, %v576_v20 }
 0x1f5   : > { %v1189_v43 = vpop.eup %1188 }
 0x1f7   : > { %v593_v56 = vpop.f32.mrf.mxu2 }
 0x1f8   : > { %v611_v58 = vmul.f32 %v1189_v43, %v593_v56 }
 0x1fe   : > { %v506_v16 = vpop.xlane.xlu2 %505 }
 0x206   : > { %v512_v17 = vpop.xlane.xlu2 %511 }
 0x20e   : > { %v840_v25 = vpop.permute.xlu2 %839 }
 0x20f   : > { %v860_v27 = vsel %vm855_vm0, %v608_v45, %v840_v25  ;;  %v869_v25 = vld [vmem:[%s1589_s10 + $0x28] sm:$0xff] }
 0x210   : > { %v876_v60 = vadd.f32 %v868_v24, %v860_v27  ;;  %v885_v27 = vld [vmem:[%s1595_s13 + $0x28] sm:$0xff] }
 0x211   : > { %v504_v37 = vpop.xlane.xlu0 %503 }
 0x212   : > { %v892_v6 = vadd.f32 %v884_v53, %v876_v60  ;;  %1190 = vrcp.f32 %v504_v37 }
 0x213   : > { %1192 = vrcp.f32 %v512_v17 }
 0x214   : > { %901 = vst.msk [vmem:[%s1604_s16 + $0x20] sm:$0xff] %vm896_vm1, %v892_v6  ;;  %1194 = vrcp.f32 %v506_v16  ;;  %v886_v16 = vld [vmem:[%s1595_s13 + $0x30] sm:$0xff] }
 0x216   : > { %v834_v33 = vpop.permute.xlu2 %833 }
 0x217   : > { %v857_v35 = vsel %vm855_vm0, %v605_v30, %v834_v33 }
 0x218   : > { %v873_v36 = vadd.f32 %v865_v32, %v857_v35  ;;  %v1191_v28 = vpop.eup %1190 }
 0x219   : > { %v510_v41 = vpop.xlane.xlu0 %509  ;;  %v1193_v19 = vpop.eup %1192 }
 0x21a   : > { %v889_v40 = vadd.f32 %v881_v48, %v873_v36  ;;  %v1195_v8 = vpop.eup %1194  ;;  %1196 = vrcp.f32 %v510_v41  ;;  %v610_v10 = vmul.f32 %v1193_v19, %v591_v50 }
 0x21c   : > { %898 = vst.msk [vmem:[%s1604_s16 + $0x8] sm:$0xff] %vm896_vm1, %v889_v40  ;;  %v581_v62 = vpop.f32.mrf.mxu0 }
 0x21d   : > { %v606_v63 = vmul.f32 %v1191_v28, %v581_v62 }
 0x220   : > { %v1197_v22 = vpop.eup %1196 }
 0x221   : > { %v609_v45 = vmul.f32 %v1197_v22, %v588_v31 }
 0x224   : > { %v583_v5 = vpop.f32.mrf.mxu0 }
 0x225   : > { %v607_v46 = vmul.f32 %v1195_v8, %v583_v5 }
 0x22c   : > { %v832_v11 = vpop.permute.xlu0 %831 }
 0x22d   : > { %v856_v54 = vsel %vm855_vm0, %v604_v18, %v832_v11 }
 0x22e   : > { %v872_v21 = vadd.f32 %v864_v44, %v856_v54 }
 0x230   : > { %v888_v51 = vadd.f32 %v880_v49, %v872_v21 }
 0x232   : > { %897 = vst.msk [vmem:[%s1604_s16] sm:$0xff] %vm896_vm1, %v888_v51 }
 0x23c   : > { %v846_v59 = vpop.permute.xlu2 %845 }
 0x23d   : > { %v863_v61 = vsel %vm855_vm0, %v611_v58, %v846_v59 }
 0x23e   : > { %v879_v47 = vadd.f32 %v871_v1, %v863_v61 }
 0x240   : > { %v895_v26 = vadd.f32 %v887_v15, %v879_v47 }
 0x242   : > { %904 = vst.msk [vmem:[%s1604_s16 + $0x38] sm:$0xff] %vm896_vm1, %v895_v26 }
 0x24e   : > { %v836_v0 = vpop.permute.xlu1 %835 }
 0x24f   : > { %v858_v3 = vsel %vm855_vm0, %v606_v63, %v836_v0 }
 0x250   : > { %v874_v4 = vadd.f32 %v866_v34, %v858_v3 }
 0x252   : > { %v890_v7 = vadd.f32 %v882_v2, %v874_v4 }
 0x254   : > { %899 = vst.msk [vmem:[%s1604_s16 + $0x10] sm:$0xff] %vm896_vm1, %v890_v7 }
 0x256   : > { %v838_v12 = vpop.permute.xlu0 %837  ;;  %v844_v52 = vpop.permute.xlu1 %843 }
 0x257   : > { %v859_v14 = vsel %vm855_vm0, %v607_v46, %v838_v12  ;;  %v862_v57 = vsel %vm855_vm0, %v610_v10, %v844_v52 }
 0x258   : > { %v875_v17 = vadd.f32 %v867_v9, %v859_v14  ;;  %v878_v20 = vadd.f32 %v870_v39, %v862_v57 }
 0x25a   : > { %v891_v23 = vadd.f32 %v883_v13, %v875_v17  ;;  %v894_v24 = vadd.f32 %v886_v16, %v878_v20 }
 0x25c   : > { %900 = vst.msk [vmem:[%s1604_s16 + $0x18] sm:$0xff] %vm896_vm1, %v891_v23 }
 0x25d   : > { %903 = vst.msk [vmem:[%s1604_s16 + $0x30] sm:$0xff] %vm896_vm1, %v894_v24 }
 0x25e   : > { %v842_v53 = vpop.permute.xlu0 %841 }
 0x25f   : > { %v861_v60 = vsel %vm855_vm0, %v609_v45, %v842_v53 }
 0x260   : > { %v877_v38 = vadd.f32 %v869_v25, %v861_v60 }
 0x262   : > { %v893_v6 = vadd.f32 %v885_v27, %v877_v38 }
 0x264   : > { %902 = vst.msk [vmem:[%s1604_s16 + $0x28] sm:$0xff] %vm896_vm1, %v893_v6 }
 0x265 PF: > { %s16_s21 = sadd.s32 1, %s1204_s21  }
 0x266   : > { %p13_p4 = scmp.ge.s32.totalorder %s16_s21, 4  }
 0x268   :  { %15 = sbr.rel (!%p13_p4) target bundleno = 1 (0x1), region = 83 }

// kernel: revgat_forward.14
= control target key start
LH: loop header
LB: loop body
LE: loop exit
PB: predicated region body
PF: predicated region fallthrough
CT: control target
= control target key end

     0   :  { %s863_s30 = smov 0   ;;  %s970_s0 = inlined_call_operand.vmem [shape: f32[128,32], index: 0, kind: input, shape index: {}]   ;;  %s971_s1 = inlined_call_operand.vmem [shape: f32[1,32], index: 1, kind: input, shape index: {}]   ;;  %s972_s2 = inlined_call_operand.vmem [shape: f32[1,32], index: 2, kind: input, shape index: {}]   ;;  %s973_s3 = inlined_call_operand.vmem [shape: f32[1,32], index: 3, kind: input, shape index: {}]   ;;  %s974_s4 = inlined_call_operand.vmem [shape: f32[1,32], index: 4, kind: input, shape index: {}]   ;;  %s975_s5 = inlined_call_operand.vmem [shape: bf16[32,16], index: 5, kind: input, shape index: {}]   ;;  %s976_s6 = inlined_call_operand.vmem [shape: f32[8,2], index: 6, kind: input, shape index: {}]   ;;  %s977_s7 = inlined_call_operand.vmem [shape: bf16[128,8], index: 7, kind: output, shape index: {0}]   ;;  %s978_s8 = inlined_call_operand.vmem [shape: f32[128,8], index: 8, kind: output, shape index: {1}]   ;;  %s979_s9 = inlined_call_operand.vmem [shape: f32[128,2], index: 9, kind: output, shape index: {2}]  }
   0x1 LB: > { %s750_s10 = sadd.s32 4294967295, %s810_s30   ;;  %p754_p0 = scmp.ge.s32.totalorder %s810_s30, 1  ;;  %s810_s30 = sphi %s863_s30, %s20_s30  }
   0x2   : > { %p293_p1 = scmp.lt.s32.totalorder %s810_s30, 3 }
   0x4   : > { %p294_p2 = pnand %p754_p0, %p293_p1 }
   0x5   : > { %s755_s13 = sshll.u32 (!%p294_p2), %s750_s10, 3  ;;  %s812_s15 = smov (!%p294_p2), 120  }
   0x6   : > { %297 = sbr.rel (%p294_p2) target bundleno = 333 (0x14d), region = 48  ;;  %p340_p3 = scmp.lt.s32.totalorder (!%p294_p2), %s755_s13, 15 }
   0xb   : > { %v786_v0 = vld [vmem:[%s975_s5 + $0x8] sm:$0xff]  ;;  %v372_v1 = vld [vmem:[%s974_s4] sm:$0x1]  ;;  %s981_s13 = smov (!%p340_p3, %s755_s13), 15  ;;  %vm459_vm3 = vcmask 261120   ;;  %vm502_vm4 = vcmask 64512  }
   0xc   : > { %v373_v2 = vadd.f32 1e-05, %v372_v1  ;;  %478 = vmatpush.bf16.msra.mxu0 %v786_v0  ;;  %787 = vmatpush.bf16.msra.mxu2 %v786_v0  ;;  %v785_v3 = vld [vmem:[%s975_s5] sm:$0xff]  ;;  %s883_s18 = sshll.u32 %s981_s13, 3  ;;  %s758_s10 = sshll.u32 %s981_s13, 2  ;;  %vm576_vm5 = vcmask 60416  }
   0xd   : > { %s343_s21 = scalar_lea.vmem %s970_s0, %s883_s18  ;;  %v799_v9 = vld [vmem:[%s973_s3] ss:$0 sm:$0xff]  ;;  %s909_s14 = scalar_lea.vmem %s977_s7, %s758_s10  ;;  %vm617_vm6 = vcmask 15360  }
   0xe   : > { %802 = vrsqrt.f32 %v373_v2  ;;  %vm380_vm0 = vweird.f32 %v373_v2  ;;  %v364_v8 = vld [vmem:[%s343_s21] sm:$0xff]  ;;  %v365_v10 = vld [vmem:[%s343_s21 + $0x8] sm:$0xff]  ;;  %v366_v21 = vld [vmem:[%s343_s21 + $0x10] sm:$0xff]  ;;  %s355_s17 = scalar_lea.vmem %s978_s8, %s883_s18 }
   0xf   : > { %v368_v12 = vld [vmem:[%s343_s21 + $0x20] sm:$0xff]  ;;  %v369_v13 = vld [vmem:[%s343_s21 + $0x28] sm:$0xff]  ;;  %v388_v15 = vsub.f32 %v364_v8, %v799_v9  ;;  %v389_v16 = vsub.f32 %v365_v10, %v799_v9  ;;  %v367_v23 = vld [vmem:[%s343_s21 + $0x18] sm:$0xff]  ;;  %v390_v31 = vsub.f32 %v366_v21, %v799_v9 }
  0x10   : > { %479 = vmatpush.bf16.msra.mxu0 %v785_v3  ;;  %788 = vmatpush.bf16.msra.mxu2 %v785_v3  ;;  %v392_v17 = vsub.f32 %v368_v12, %v799_v9  ;;  %v393_v18 = vsub.f32 %v369_v13, %v799_v9  ;;  %v800_v20 = vld [vmem:[%s971_s1] ss:$0 sm:$0xff]  ;;  %v370_v24 = vld [vmem:[%s343_s21 + $0x30] sm:$0xff]  ;;  %v371_v25 = vld [vmem:[%s343_s21 + $0x38] sm:$0xff]  ;;  %v391_v32 = vsub.f32 %v367_v23, %v799_v9  ;;  %s361_s21 = scalar_lea.vmem %s979_s9, %s883_s18 }
  0x11   : > { %v801_v28 = vld [vmem:[%s972_s2] ss:$0 sm:$0xff]  ;;  %v394_v33 = vsub.f32 %v370_v24, %v799_v9  ;;  %v395_v34 = vsub.f32 %v371_v25, %v799_v9 }
  0x12   : > { %v501_v3 = vld [vmem:[%s976_s6] sm:$0xff] }
  0x13   : > { %542 = vmatpush.msra.mxu1 %v501_v3  ;;  %789 = vmatpush.msra.mxu3 %v501_v3 }
  0x14   : > { %v803_v4 = vpop.eup %802 }
  0x15   : > { %v375_v5 = vmul.f32 %v803_v4, %v373_v2  ;;  %vm381_vm1 = vweird.f32 %v803_v4 }
  0x16   : > { %vm382_vm2 = vmor %vm380_vm0, %vm381_vm1 }
  0x17   : > { %v376_v6 = vmul.f32 %v803_v4, %v375_v5 }
  0x19   : > { %v377_v7 = vmul.f32 0.5, %v376_v6 }
  0x1b   : > { %v378_v11 = vsub.f32 1.5, %v377_v7 }
  0x1d   : > { %v379_v14 = vmul.f32 %v803_v4, %v378_v11 }
  0x1f   : > { %v383_v19 = vsel %vm382_vm2, %v803_v4, %v379_v14 }
  0x20   : > { %v397_v22 = vperm.slane %v383_v19, 0 }
  0x22   : > { %v399_v26 = vmul.f32 %v397_v22, %v388_v15  ;;  %v400_v27 = vmul.f32 %v397_v22, %v389_v16  ;;  %v403_v29 = vmul.f32 %v397_v22, %v392_v17  ;;  %v404_v30 = vmul.f32 %v397_v22, %v393_v18 }
  0x23   : > { %v401_v43 = vmul.f32 %v397_v22, %v390_v31  ;;  %v402_v44 = vmul.f32 %v397_v22, %v391_v32  ;;  %v405_v45 = vmul.f32 %v397_v22, %v394_v33  ;;  %v406_v46 = vmul.f32 %v397_v22, %v395_v34 }
  0x24   : > { %v411_v35 = vmul.f32 %v800_v20, %v399_v26  ;;  %v412_v36 = vmul.f32 %v800_v20, %v400_v27  ;;  %v415_v37 = vmul.f32 %v800_v20, %v403_v29  ;;  %v416_v38 = vmul.f32 %v800_v20, %v404_v30 }
  0x25   : > { %v413_v53 = vmul.f32 %v800_v20, %v401_v43  ;;  %v414_v54 = vmul.f32 %v800_v20, %v402_v44  ;;  %v417_v55 = vmul.f32 %v800_v20, %v405_v45  ;;  %v418_v56 = vmul.f32 %v800_v20, %v406_v46 }
  0x26   : > { %v423_v39 = vadd.f32 %v801_v28, %v411_v35  ;;  %v424_v40 = vadd.f32 %v801_v28, %v412_v36  ;;  %v427_v41 = vadd.f32 %v801_v28, %v415_v37  ;;  %v428_v42 = vadd.f32 %v801_v28, %v416_v38 }
  0x27   : > { %v425_v57 = vadd.f32 %v801_v28, %v413_v53  ;;  %v426_v58 = vadd.f32 %v801_v28, %v414_v54  ;;  %v429_v59 = vadd.f32 %v801_v28, %v417_v55  ;;  %v430_v60 = vadd.f32 %v801_v28, %v418_v56 }
  0x28   : > { %v431_v47 = vmax.f32 %v423_v39, 0.0  ;;  %v432_v48 = vmax.f32 %v424_v40, 0.0  ;;  %v435_v49 = vmax.f32 %v427_v41, 0.0  ;;  %v436_v50 = vmax.f32 %v428_v42, 0.0 }
  0x29   : > { %v433_v61 = vmax.f32 %v425_v57, 0.0  ;;  %v434_v62 = vmax.f32 %v426_v58, 0.0  ;;  %v437_v63 = vmax.f32 %v429_v59, 0.0  ;;  %v438_v0 = vmax.f32 %v430_v60, 0.0 }
  0x2a   : > { %v439_v51 = vpack.c.bf16 %v432_v48, %v431_v47  ;;  %v441_v52 = vpack.c.bf16 %v436_v50, %v435_v49 }
  0x2b   : > { %v440_v1 = vpack.c.bf16 %v434_v62, %v433_v61  ;;  %v442_v2 = vpack.c.bf16 %v438_v0, %v437_v63 }
  0x2c   : > { %771 = vmatmul.msk.bf16.vlgmr.msra.gmra.mxu0 %vm459_vm3, %v439_v51  ;;  %773 = vmatmul.msk.bf16.vlgmr.msra.gmra.mxu2 %vm459_vm3, %v441_v52 }
  0x3c   : > { %772 = vmatmul.msk.bf16.gmra.mxu0 %vm459_vm3, %v440_v1  ;;  %774 = vmatmul.msk.bf16.gmra.mxu2 %vm459_vm3, %v442_v2 }
  0xa9   : > { %v481_v4 = vpop.f32.mrf.mxu0 }
  0xaa   : > { %v568_v5 = vpack.c.bf16 %v481_v4, %v481_v4  ;;  %585 = vrot.lane.b32.xlu0 %v481_v4, %s812_s15  ;;  %775 = vmatmul.msk.f32.vlgmr.msra.gmra.mxu1 %vm502_vm4, %v481_v4 }
  0xac   : > { %577 = vst.msk [vmem:[%s909_s14] sm:$0xf] %vm576_vm5, %v568_v5 }
  0xaf   : > { %v491_v6 = vpop.f32.mrf.mxu2 }
  0xb0   : > { %v572_v7 = vpack.c.bf16 %v491_v6, %v491_v6  ;;  %593 = vrot.lane.b32.xlu2 %v491_v6, %s812_s15 }
  0xb1   : > { %v483_v8 = vpop.f32.mrf.mxu0 }
  0xb2   : > { %581 = vst.msk [vmem:[%s909_s14 + $0x10] sm:$0xf] %vm576_vm5, %v572_v7  ;;  %v569_v9 = vpack.c.bf16 %v483_v8, %v483_v8  ;;  %587 = vrot.lane.b32.xlu0 %v483_v8, %s812_s15  ;;  %776 = vmatmul.msk.f32.gmra.mxu1 %vm502_vm4, %v483_v8 }
  0xb4   : > { %578 = vst.msk [vmem:[%s909_s14 + $0x4] sm:$0xf] %vm576_vm5, %v569_v9 }
  0xb7   : > { %v493_v10 = vpop.f32.mrf.mxu2 }
  0xb8   : > { %v573_v11 = vpack.c.bf16 %v493_v10, %v493_v10  ;;  %595 = vrot.lane.b32.xlu2 %v493_v10, %s812_s15  ;;  %780 = vmatmul.msk.f32.vlgmr.msra.gmra.mxu3 %vm502_vm4, %v493_v10 }
  0xb9   : > { %v486_v12 = vpop.f32.mrf.mxu0 }
  0xba   : > { %582 = vst.msk [vmem:[%s909_s14 + $0x14] sm:$0xf] %vm576_vm5, %v573_v11  ;;  %v570_v13 = vpack.c.bf16 %v486_v12, %v486_v12  ;;  %589 = vrot.lane.b32.xlu1 %v486_v12, %s812_s15  ;;  %777 = vmatmul.msk.f32.gmra.mxu1 %vm502_vm4, %v486_v12 }
  0xbc   : > { %579 = vst.msk [vmem:[%s909_s14 + $0x8] sm:$0xf] %vm576_vm5, %v570_v13 }
  0xbf   : > { %v496_v14 = vpop.f32.mrf.mxu2 }
  0xc0   : > { %v574_v15 = vpack.c.bf16 %v496_v14, %v496_v14  ;;  %781 = vmatmul.msk.f32.gmra.mxu3 %vm502_vm4, %v496_v14  ;;  %597 = vrot.lane.b32.xlu0 %v496_v14, %s812_s15 }
  0xc1   : > { %v488_v16 = vpop.f32.mrf.mxu0 }
  0xc2   : > { %583 = vst.msk [vmem:[%s909_s14 + $0x18] sm:$0xf] %vm576_vm5, %v574_v15  ;;  %v571_v17 = vpack.c.bf16 %v488_v16, %v488_v16  ;;  %591 = vrot.lane.b32.xlu1 %v488_v16, %s812_s15  ;;  %778 = vmatmul.msk.f32.gmra.mxu1 %vm502_vm4, %v488_v16 }
  0xc4   : > { %580 = vst.msk [vmem:[%s909_s14 + $0xc] sm:$0xf] %vm576_vm5, %v571_v17 }
  0xc7   : > { %v498_v18 = vpop.f32.mrf.mxu2 }
  0xc8   : > { %v575_v19 = vpack.c.bf16 %v498_v18, %v498_v18  ;;  %782 = vmatmul.msk.f32.gmra.mxu3 %vm502_vm4, %v498_v18 }
  0xca   : > { %584 = vst.msk [vmem:[%s909_s14 + $0x1c] sm:$0xf] %vm576_vm5, %v575_v19  ;;  %599 = vrot.lane.b32.xlu1 %v498_v18, %s812_s15  ;;  %779 = vmatmul.msk.f32.gmra.mxu1 %vm502_vm4, %v491_v6 }
 0x10a   : > { %v594_v20 = vpop.permute.xlu2 %593 }
 0x10b   : > { %613 = vst.msk [vmem:[%s355_s17 + $0x20] sm:$0xff] %vm502_vm4, %v594_v20 }
 0x112   : > { %v596_v21 = vpop.permute.xlu2 %595 }
 0x113   : > { %614 = vst.msk [vmem:[%s355_s17 + $0x28] sm:$0xff] %vm502_vm4, %v596_v21 }
 0x11c   : > { %v586_v22 = vpop.permute.xlu0 %585 }
 0x11d   : > { %609 = vst.msk [vmem:[%s355_s17] sm:$0xff] %vm502_vm4, %v586_v22 }
 0x124   : > { %v588_v23 = vpop.permute.xlu0 %587 }
 0x125   : > { %610 = vst.msk [vmem:[%s355_s17 + $0x8] sm:$0xff] %vm502_vm4, %v588_v23 }
 0x127   : > { %v544_v24 = vpop.f32.mrf.mxu1 }
 0x128   : > { %618 = vst.msk [vmem:[%s361_s21] sm:$0xff] %vm617_vm6, %v544_v24 }
 0x12c   : > { %v590_v25 = vpop.permute.xlu1 %589 }
 0x12d   : > { %611 = vst.msk [vmem:[%s355_s17 + $0x10] sm:$0xff] %vm502_vm4, %v590_v25 }
 0x12f   : > { %v547_v26 = vpop.f32.mrf.mxu1 }
 0x130   : > { %619 = vst.msk [vmem:[%s361_s21 + $0x8] sm:$0xff] %vm617_vm6, %v547_v26 }
 0x132   : > { %v598_v27 = vpop.permute.xlu0 %597 }
 0x133   : > { %615 = vst.msk [vmem:[%s355_s17 + $0x30] sm:$0xff] %vm502_vm4, %v598_v27 }
 0x134   : > { %v592_v28 = vpop.permute.xlu1 %591 }
 0x135   : > { %612 = vst.msk [vmem:[%s355_s17 + $0x18] sm:$0xff] %vm502_vm4, %v592_v28 }
 0x137   : > { %v550_v29 = vpop.f32.mrf.mxu1 }
 0x138   : > { %620 = vst.msk [vmem:[%s361_s21 + $0x10] sm:$0xff] %vm617_vm6, %v550_v29 }
 0x13b   : > { %v559_v30 = vpop.f32.mrf.mxu3 }
 0x13c   : > { %623 = vst.msk [vmem:[%s361_s21 + $0x28] sm:$0xff] %vm617_vm6, %v559_v30  ;;  %v600_v31 = vpop.permute.xlu1 %599 }
 0x13d   : > { %616 = vst.msk [vmem:[%s355_s17 + $0x38] sm:$0xff] %vm502_vm4, %v600_v31 }
 0x13f   : > { %v553_v32 = vpop.f32.mrf.mxu1 }
 0x140   : > { %621 = vst.msk [vmem:[%s361_s21 + $0x18] sm:$0xff] %vm617_vm6, %v553_v32 }
 0x143   : > { %v562_v33 = vpop.f32.mrf.mxu3 }
 0x144   : > { %624 = vst.msk [vmem:[%s361_s21 + $0x30] sm:$0xff] %vm617_vm6, %v562_v33 }
 0x147   : > { %v556_v34 = vpop.f32.mrf.mxu1 }
 0x148   : > { %622 = vst.msk [vmem:[%s361_s21 + $0x20] sm:$0xff] %vm617_vm6, %v556_v34 }
 0x14b   : > { %v565_v35 = vpop.f32.mrf.mxu3 }
 0x14c   : > { %625 = vst.msk [vmem:[%s361_s21 + $0x38] sm:$0xff] %vm617_vm6, %v565_v35 }
 0x14d PF: > { %s20_s30 = sadd.s32 1, %s810_s30  }
 0x14e   : > { %p17_p4 = scmp.ge.s32.totalorder %s20_s30, 4  }
 0x150   :  { %19 = sbr.rel (!%p17_p4) target bundleno = 1 (0x1), region = 102 }

// kernel: revgat_forward.15
= control target key start
LH: loop header
LB: loop body
LE: loop exit
PB: predicated region body
PF: predicated region fallthrough
CT: control target
= control target key end

     0   :  { %s864_s18 = smov 0   ;;  %s1075_s0 = inlined_call_operand.vmem [shape: bf16[128,128], index: 0, kind: input, shape index: {}]   ;;  %s1076_s1 = inlined_call_operand.vmem [shape: f32[1,128], index: 1, kind: input, shape index: {}]   ;;  %s1077_s2 = inlined_call_operand.vmem [shape: f32[128,1], index: 2, kind: input, shape index: {}]   ;;  %s1078_s3 = inlined_call_operand.vmem [shape: bf16[128,8], index: 3, kind: input, shape index: {}]   ;;  %s1079_s4 = inlined_call_operand.vmem [shape: f32[128,8], index: 4, kind: input, shape index: {}]   ;;  %s1080_s5 = inlined_call_operand.vmem [shape: f32[128,8], index: 5, kind: output, shape index: {}]  }
   0x1 LB: > { %s670_s19 = sadd.s32 4294967295, %s831_s18   ;;  %p674_p0 = scmp.ge.s32.totalorder %s831_s18, 1  ;;  %s831_s18 = sphi %s864_s18, %s15_s18  }
   0x2   : > { %p210_p1 = scmp.lt.s32.totalorder %s831_s18, 3 }
   0x4   : > { %p211_p2 = pnand %p674_p0, %p210_p1 }
   0x5   : > { %s675_s20 = sshll.u32 (!%p211_p2), %s670_s19, 3 }
   0x6   : > { %214 = sbr.rel (%p211_p2) target bundleno = 429 (0x1ad), region = 40  ;;  %p249_p3 = scmp.lt.s32.totalorder (!%p211_p2), %s675_s20, 15 }
   0xb   : > { %v833_v0 = vmov 0   ;;  %s1098_s20 = smov (!%p249_p3, %s675_s20), 15  ;;  %v888_v11 = vld [vmem:[%s1076_s1] ss:$0 sm:$0xff]  ;;  %v736_v17 = vld [vmem:[%s1078_s3 + $0x38] sm:$0xff]  ;;  %v735_v22 = vld [vmem:[%s1078_s3 + $0x30] sm:$0xff] }
   0xc   : > { %790 = vset.pattern.permute.xlu1 %v833_v0  ;;  %789 = vset.pattern.permute.xlu0 %v833_v0  ;;  %s872_s21 = sshll.u32 %s1098_s20, 3  ;;  %s676_s25 = sshll.u32 %s1098_s20, 2  ;;  %v734_v31 = vld [vmem:[%s1078_s3 + $0x28] sm:$0xff] }
   0xd   : > { %791 = vset.pattern.permute.xlu2 %v833_v0  ;;  %s258_s24 = scalar_lea.vmem %s1077_s2, %s872_s21  ;;  %s881_s28 = scalar_lea.vmem %s1075_s0, %s676_s25  ;;  %757 = vmatpush.bf16.msra.mxu2 %v736_v17 }
   0xe   : > { %v319_v1 = vld [vmem:[%s258_s24 + $0x30] sm:$0xff]  ;;  %v317_v2 = vld [vmem:[%s258_s24 + $0x20] sm:$0xff]  ;;  %v320_v4 = vld [vmem:[%s258_s24 + $0x38] sm:$0xff]  ;;  %758 = vmatpush.bf16.msra.mxu3 %v736_v17  ;;  %520 = vmatpush.bf16.msra.mxu0 %v736_v17  ;;  %s1040_s26 = scalar_lea.vmem %s1079_s4, %s872_s21  ;;  %s1047_s29 = scalar_lea.vmem %s1080_s5, %s872_s21 }
   0xf   : > { %353 = vperm.xlu1 %790, %v319_v1   ;;  %343 = vperm.xlu0 %789, %v317_v2   ;;  %v313_v3 = vld [vmem:[%s258_s24] sm:$0xff]  ;;  %v318_v5 = vld [vmem:[%s258_s24 + $0x28] sm:$0xff]  ;;  %v316_v7 = vld [vmem:[%s258_s24 + $0x18] sm:$0xff] }
  0x10   : > { %323 = vperm.xlu2 %791, %v313_v3   ;;  %v314_v6 = vld [vmem:[%s258_s24 + $0x8] sm:$0xff]  ;;  %v315_v8 = vld [vmem:[%s258_s24 + $0x10] sm:$0xff]  ;;  %v755_v9 = vld [vmem:[%s881_s28 + $0x18] sm:$0xff]   ;;  %756 = vmatpush.bf16.msra.mxu1 %v736_v17 }
  0x11   : > { %v754_v10 = vld [vmem:[%s881_s28 + $0x10] sm:$0xff]   ;;  %v751_v13 = vunpack.c.l.bf16 %v755_v9  ;;  %v752_v30 = vunpack.c.h.bf16 %v755_v9  ;;  %760 = vmatpush.bf16.msra.mxu2 %v735_v22  ;;  %v738_v40 = vld [vmem:[%s881_s28] sm:$0xff]   ;;  %v753_v44 = vld [vmem:[%s881_s28 + $0x8] sm:$0xff]  }
  0x12   : > { %v747_v14 = vunpack.c.l.bf16 %v754_v10  ;;  %v748_v29 = vunpack.c.h.bf16 %v754_v10  ;;  %761 = vmatpush.bf16.msra.mxu3 %v735_v22  ;;  %521 = vmatpush.bf16.msra.mxu0 %v735_v22  ;;  %v740_v49 = vunpack.c.h.bf16 %v738_v40  ;;  %v743_v51 = vunpack.c.l.bf16 %v753_v44  ;;  %v733_v9 = vld [vmem:[%s1078_s3 + $0x20] sm:$0xff]  ;;  %v732_v10 = vld [vmem:[%s1078_s3 + $0x18] sm:$0xff] }
  0x13   : > { %vm895_vm0 = vcmp.gt.f32.partialorder %v751_v13, 0.0  ;;  %vm926_vm5 = vcmp.gt.f32.partialorder %v752_v30, 0.0  ;;  %v739_v54 = vunpack.c.l.bf16 %v738_v40  ;;  %v729_v13 = vld [vmem:[%s1078_s3] sm:$0xff] }
  0x14   : > { %vm899_vm1 = vcmp.gt.f32.partialorder %v747_v14, 0.0  ;;  %759 = vmatpush.bf16.msra.mxu1 %v735_v22  ;;  %vm922_vm4 = vcmp.gt.f32.partialorder %v748_v29, 0.0  ;;  %vm944_vm10 = vcmp.gt.f32.partialorder %v740_v49, 0.0  ;;  %vm948_vm11 = vcmp.gt.f32.partialorder %v743_v51, 0.0 }
  0x15   : > { %763 = vmatpush.bf16.msra.mxu2 %v734_v31  ;;  %vm953_vm13 = vcmp.gt.f32.partialorder %v739_v54, 0.0 }
  0x16   : > { %764 = vmatpush.bf16.msra.mxu3 %v734_v31  ;;  %522 = vmatpush.bf16.msra.mxu0 %v734_v31 }
  0x17   : > { %358 = vperm.xlu1 %790, %v320_v4   ;;  %348 = vperm.xlu0 %789, %v318_v5   ;;  %v744_v5 = vunpack.c.h.bf16 %v753_v44 }
  0x18   : > { %328 = vperm.xlu2 %791, %v314_v6   ;;  %762 = vmatpush.bf16.msra.mxu1 %v734_v31 }
  0x19   : > { %vm972_vm15 = vcmp.gt.f32.partialorder %v744_v5, 0.0  ;;  %766 = vmatpush.bf16.msra.mxu2 %v733_v9 }
  0x1a   : > { %767 = vmatpush.bf16.msra.mxu3 %v733_v9  ;;  %523 = vmatpush.bf16.msra.mxu0 %v733_v9 }
  0x1c   : > { %765 = vmatpush.bf16.msra.mxu1 %v733_v9 }
  0x1d   : > { %769 = vmatpush.bf16.msra.mxu2 %v732_v10 }
  0x1e   : > { %770 = vmatpush.bf16.msra.mxu3 %v732_v10  ;;  %524 = vmatpush.bf16.msra.mxu0 %v732_v10 }
  0x1f   : > { %338 = vperm.xlu1 %790, %v316_v7   ;;  %333 = vperm.xlu0 %789, %v315_v8  }
  0x20   : > { %768 = vmatpush.bf16.msra.mxu1 %v732_v10 }
  0x6a   : > { %v324_v12 = vpop.permute.xlu2 %323 }
  0x6b   : > { %v364_v43 = vadd.f32 %v888_v11, %v324_v12  ;;  %v730_v12 = vld [vmem:[%s1078_s3 + $0x8] sm:$0xff] }
  0x6d   : > { %v380_v52 = vmul.f32 0.2, %v364_v43  ;;  %vm372_vm9 = vcmp.gt.f32.partialorder %v364_v43, 0.0 }
  0x6f   : > { %v388_v63 = vsel %vm372_vm9, %v364_v43, %v380_v52 }
  0x70   : > { %v969_v3 = vsel %vm953_vm13, %v388_v63, -1e+30 }
  0x72   : > { %v329_v32 = vpop.permute.xlu2 %328 }
  0x73   : > { %v365_v37 = vadd.f32 %v888_v11, %v329_v32 }
  0x75   : > { %v381_v50 = vmul.f32 0.2, %v365_v37  ;;  %vm373_vm8 = vcmp.gt.f32.partialorder %v365_v37, 0.0 }
  0x77   : > { %v389_v60 = vsel %vm373_vm8, %v365_v37, %v381_v50 }
  0x78   : > { %v963_v2 = vsel %vm944_vm10, %v389_v60, -1e+30 }
  0x81   : > { %v354_v15 = vpop.permute.xlu1 %353  ;;  %v344_v16 = vpop.permute.xlu0 %343 }
  0x82   : > { %v370_v18 = vadd.f32 %v888_v11, %v354_v15  ;;  %v368_v19 = vadd.f32 %v888_v11, %v344_v16 }
  0x84   : > { %v386_v23 = vmul.f32 0.2, %v370_v18  ;;  %v384_v24 = vmul.f32 0.2, %v368_v19  ;;  %vm378_vm2 = vcmp.gt.f32.partialorder %v370_v18, 0.0  ;;  %vm376_vm3 = vcmp.gt.f32.partialorder %v368_v19, 0.0 }
  0x86   : > { %v394_v25 = vsel %vm378_vm2, %v370_v18, %v386_v23  ;;  %v392_v26 = vsel %vm376_vm3, %v368_v19, %v384_v24  ;;  %vm721_vm2 = vmpackc.low %vm922_vm4, %vm899_vm1 }
  0x87   : > { %v908_v27 = vsel %vm895_vm0, %v394_v25, -1e+30  ;;  %v912_v28 = vsel %vm899_vm1, %v392_v26, -1e+30  ;;  %vm724_vm3 = vmpackc.low %vm926_vm5, %vm895_vm0 }
  0x88   : > { %416 = vmax.xlane.f32.xlu1 %v908_v27  ;;  %412 = vmax.xlane.f32.xlu2 %v912_v28 }
  0x89   : > { %v359_v33 = vpop.permute.xlu1 %358  ;;  %v349_v34 = vpop.permute.xlu0 %348 }
  0x8a   : > { %v371_v35 = vadd.f32 %v888_v11, %v359_v33  ;;  %v369_v36 = vadd.f32 %v888_v11, %v349_v34 }
  0x8c   : > { %v387_v41 = vmul.f32 0.2, %v371_v35  ;;  %v385_v42 = vmul.f32 0.2, %v369_v36  ;;  %vm377_vm6 = vcmp.gt.f32.partialorder %v369_v36, 0.0  ;;  %vm379_vm7 = vcmp.gt.f32.partialorder %v371_v35, 0.0 }
  0x8e   : > { %v393_v45 = vsel %vm377_vm6, %v369_v36, %v385_v42  ;;  %v395_v46 = vsel %vm379_vm7, %v371_v35, %v387_v41  ;;  %vm715_vm6 = vmpackc.low %vm944_vm10, %vm953_vm13 }
  0x8f   : > { %v935_v47 = vsel %vm922_vm4, %v393_v45, -1e+30  ;;  %v939_v48 = vsel %vm926_vm5, %v395_v46, -1e+30  ;;  %vm718_vm7 = vmpackc.low %vm972_vm15, %vm948_vm11 }
  0x90   : > { %414 = vmax.xlane.f32.xlu0 %v935_v47  ;;  %418 = vmax.xlane.f32.xlu2 %v939_v48 }
  0x91   : > { %v334_v53 = vpop.permute.xlu0 %333  ;;  %v339_v55 = vpop.permute.xlu1 %338 }
  0x92   : > { %v366_v56 = vadd.f32 %v888_v11, %v334_v53  ;;  %v367_v61 = vadd.f32 %v888_v11, %v339_v55  ;;  %v731_v11 = vld [vmem:[%s1078_s3 + $0x10] sm:$0xff] }
  0x93   : > { %772 = vmatpush.bf16.msra.mxu2 %v731_v11  ;;  %773 = vmatpush.bf16.msra.mxu3 %v731_v11 }
  0x94   : > { %v382_v58 = vmul.f32 0.2, %v366_v56  ;;  %vm374_vm12 = vcmp.gt.f32.partialorder %v366_v56, 0.0  ;;  %v383_v4 = vmul.f32 0.2, %v367_v61  ;;  %vm375_vm14 = vcmp.gt.f32.partialorder %v367_v61, 0.0  ;;  %525 = vmatpush.bf16.msra.mxu0 %v731_v11  ;;  %771 = vmatpush.bf16.msra.mxu1 %v731_v11 }
  0x96   : > { %v390_v0 = vsel %vm374_vm12, %v366_v56, %v382_v58  ;;  %v391_v7 = vsel %vm375_vm14, %v367_v61, %v383_v4 }
  0x97   : > { %v959_v1 = vsel %vm948_vm11, %v390_v0, -1e+30  ;;  %v978_v8 = vsel %vm972_vm15, %v391_v7, -1e+30  ;;  %775 = vmatpush.bf16.msra.mxu2 %v730_v12  ;;  %776 = vmatpush.bf16.msra.mxu3 %v730_v12  ;;  %v569_v7 = vld [vmem:[%s1040_s26 + $0x20] sm:$0xff] }
  0x98   : > { %408 = vmax.xlane.f32.xlu1 %v959_v1  ;;  %406 = vmax.xlane.f32.xlu0 %v963_v2 }
  0x99   : > { %404 = vmax.xlane.f32.xlu2 %v969_v3  ;;  %526 = vmatpush.bf16.msra.mxu0 %v730_v12 }
  0x9a   : > { %774 = vmatpush.bf16.msra.mxu1 %v730_v12 }
  0x9b   : > { %778 = vmatpush.bf16.msra.mxu2 %v729_v13  ;;  %779 = vmatpush.bf16.msra.mxu3 %v729_v13 }
  0x9d   : > { %527 = vmatpush.bf16.msra.mxu0 %v729_v13 }
  0x9e   : > { %777 = vmatpush.bf16.msra.mxu1 %v729_v13  ;;  %v570_v13 = vld [vmem:[%s1040_s26 + $0x28] sm:$0xff] }
  0xa1   : > { %410 = vmax.xlane.f32.xlu2 %v978_v8 }
  0xfb   : > { %v417_v14 = vpop.xlane.xlu1 %416  ;;  %v413_v15 = vpop.xlane.xlu2 %412 }
  0xfc   : > { %v426_v16 = vsub.f32 %v908_v27, %v417_v14  ;;  %v424_v17 = vsub.f32 %v912_v28, %v413_v15 }
  0xfe   : > { %v440_v18 = vmul.f32 1.442695, %v426_v16  ;;  %v436_v19 = vmul.f32 1.442695, %v424_v17 }
 0x100   : > { %793 = vpow2.f32 %v440_v18 }
 0x101   : > { %795 = vpow2.f32 %v436_v19 }
 0x103   : > { %v415_v22 = vpop.xlane.xlu0 %414  ;;  %v419_v23 = vpop.xlane.xlu2 %418 }
 0x104   : > { %v425_v24 = vsub.f32 %v935_v47, %v415_v22  ;;  %v427_v25 = vsub.f32 %v939_v48, %v419_v23  ;;  %v567_v22 = vld [vmem:[%s1040_s26 + $0x10] sm:$0xff] }
 0x106   : > { %v438_v26 = vmul.f32 1.442695, %v425_v24  ;;  %v442_v29 = vmul.f32 1.442695, %v427_v25  ;;  %v794_v32 = vpop.eup %793  ;;  %v566_v25 = vld [vmem:[%s1040_s26 + $0x8] sm:$0xff] }
 0x107   : > { %v796_v34 = vpop.eup %795  ;;  %v450_v59 = vsel %vm895_vm0, %v794_v32, 0.0  ;;  %vm581_vm0 = vcmask 64512  }
 0x108   : > { %797 = vpow2.f32 %v438_v26  ;;  %v448_v57 = vsel %vm899_vm1, %v796_v34, 0.0 }
 0x109   : > { %799 = vpow2.f32 %v442_v29 }
 0x10b   : > { %v409_v30 = vpop.xlane.xlu1 %408  ;;  %v407_v31 = vpop.xlane.xlu0 %406 }
 0x10c   : > { %v422_v27 = vsub.f32 %v959_v1, %v409_v30  ;;  %v421_v28 = vsub.f32 %v963_v2, %v407_v31  ;;  %v405_v33 = vpop.xlane.xlu2 %404 }
 0x10d   : > { %v420_v35 = vsub.f32 %v969_v3, %v405_v33  ;;  %v565_v3 = vld [vmem:[%s1040_s26] sm:$0xff] }
 0x10e   : > { %v798_v36 = vpop.eup %797  ;;  %v432_v37 = vmul.f32 1.442695, %v422_v27  ;;  %v430_v40 = vmul.f32 1.442695, %v421_v28  ;;  %v572_v27 = vld [vmem:[%s1040_s26 + $0x38] sm:$0xff] }
 0x10f   : > { %v800_v41 = vpop.eup %799  ;;  %v428_v42 = vmul.f32 1.442695, %v420_v35  ;;  %v722_v43 = vpack.c.bf16 %v798_v36, %v796_v34  ;;  %v449_v56 = vsel %vm922_vm4, %v798_v36, 0.0  ;;  %v571_v34 = vld [vmem:[%s1040_s26 + $0x30] sm:$0xff] }
 0x110   : > { %801 = vpow2.f32 %v432_v37  ;;  %v725_v44 = vpack.c.bf16 %v800_v41, %v794_v32  ;;  %v451_v38 = vsel %vm926_vm5, %v800_v41, 0.0 }
 0x111   : > { %803 = vpow2.f32 %v430_v40  ;;  %723 = vmatmul.msk.bf16.vlgmr.msra.gmra.mxu2 %vm721_vm2, %v722_v43  ;;  %v568_v43 = vld [vmem:[%s1040_s26 + $0x18] sm:$0xff] }
 0x112   : > { %805 = vpow2.f32 %v428_v42  ;;  %726 = vmatmul.msk.bf16.vlgmr.msra.gmra.mxu3 %vm724_vm3, %v725_v44 }
 0x114   : > { %v411_v45 = vpop.xlane.xlu2 %410 }
 0x115   : > { %v423_v46 = vsub.f32 %v978_v8, %v411_v45 }
 0x116   : > { %v802_v47 = vpop.eup %801 }
 0x117   : > { %v804_v48 = vpop.eup %803  ;;  %v434_v49 = vmul.f32 1.442695, %v423_v46  ;;  %v446_v50 = vsel %vm948_vm11, %v802_v47, 0.0 }
 0x118   : > { %v806_v51 = vpop.eup %805  ;;  %v445_v52 = vsel %vm944_vm10, %v804_v48, 0.0  ;;  %456 = vadd.xlane.f32.xlu2 %v446_v50 }
 0x119   : > { %807 = vpow2.f32 %v434_v49  ;;  %454 = vadd.xlane.f32.xlu1 %v445_v52  ;;  %v444_v53 = vsel %vm953_vm13, %v806_v51, 0.0  ;;  %v716_v54 = vpack.c.bf16 %v804_v48, %v806_v51 }
 0x11a   : > { %452 = vadd.xlane.f32.xlu0 %v444_v53 }
 0x11b   : > { %717 = vmatmul.msk.bf16.vlgmr.msra.gmra.mxu0 %vm715_vm6, %v716_v54 }
 0x11f   : > { %v808_v55 = vpop.eup %807 }
 0x120   : > { %462 = vadd.xlane.f32.xlu2 %v449_v56  ;;  %v447_v58 = vsel %vm972_vm15, %v808_v55, 0.0  ;;  %v719_v60 = vpack.c.bf16 %v808_v55, %v802_v47 }
 0x121   : > { %460 = vadd.xlane.f32.xlu1 %v448_v57 }
 0x122   : > { %458 = vadd.xlane.f32.xlu0 %v447_v58  ;;  %720 = vmatmul.msk.bf16.vlgmr.msra.gmra.mxu1 %vm718_vm7, %v719_v60 }
 0x129   : > { %466 = vadd.xlane.f32.xlu1 %v451_v38 }
 0x12a   : > { %464 = vadd.xlane.f32.xlu0 %v450_v59 }
 0x18b   : > { %v457_v61 = vpop.xlane.xlu2 %456 }
 0x18c   : > { %v455_v21 = vpop.xlane.xlu1 %454 }
 0x18d   : > { %v453_v62 = vpop.xlane.xlu0 %452 }
 0x18e   : > { %809 = vrcp.f32 %v453_v62 }
 0x193   : > { %v463_v63 = vpop.xlane.xlu2 %462 }
 0x194   : > { %v461_v0 = vpop.xlane.xlu1 %460  ;;  %v539_v1 = vpop.f32.mrf.mxu2 }
 0x195   : > { %811 = vrcp.f32 %v461_v0  ;;  %v459_v2 = vpop.xlane.xlu0 %458  ;;  %v810_v20 = vpop.eup %809 }
 0x196   : > { %813 = vrcp.f32 %v463_v63  ;;  %v544_v4 = vpop.f32.mrf.mxu3 }
 0x197   : > { %815 = vrcp.f32 %v457_v61 }
 0x198   : > { %v529_v39 = vpop.f32.mrf.mxu0  ;;  %817 = vrcp.f32 %v455_v21 }
 0x199   : > { %v557_v5 = vmul.f32 %v810_v20, %v529_v39 }
 0x19b   : > { %v812_v6 = vpop.eup %811  ;;  %v573_v8 = vadd.f32 %v565_v3, %v557_v5 }
 0x19c   : > { %v814_v9 = vpop.eup %813  ;;  %v561_v10 = vmul.f32 %v812_v6, %v539_v1  ;;  %v467_v11 = vpop.xlane.xlu1 %466 }
 0x19d   : > { %v541_v12 = vpop.f32.mrf.mxu2  ;;  %582 = vst.msk [vmem:[%s1047_s29] sm:$0xff] %vm581_vm0, %v573_v8  ;;  %819 = vrcp.f32 %v467_v11  ;;  %v465_v14 = vpop.xlane.xlu0 %464 }
 0x19e   : > { %v562_v15 = vmul.f32 %v814_v9, %v541_v12  ;;  %v577_v16 = vadd.f32 %v569_v7, %v561_v10  ;;  %821 = vrcp.f32 %v465_v14  ;;  %v816_v17 = vpop.eup %815  ;;  %v546_v32 = vpop.f32.mrf.mxu3 }
 0x19f   : > { %v534_v19 = vpop.f32.mrf.mxu1  ;;  %v818_v23 = vpop.eup %817  ;;  %823 = vrcp.f32 %v459_v2 }
 0x1a0   : > { %v578_v18 = vadd.f32 %v570_v13, %v562_v15  ;;  %586 = vst.msk [vmem:[%s1047_s29 + $0x20] sm:$0xff] %vm581_vm0, %v577_v16  ;;  %v531_v24 = vpop.f32.mrf.mxu0  ;;  %v559_v26 = vmul.f32 %v816_v17, %v534_v19 }
 0x1a1   : > { %v558_v29 = vmul.f32 %v818_v23, %v531_v24 }
 0x1a2   : > { %587 = vst.msk [vmem:[%s1047_s29 + $0x28] sm:$0xff] %vm581_vm0, %v578_v18  ;;  %v575_v30 = vadd.f32 %v567_v22, %v559_v26 }
 0x1a3   : > { %v820_v31 = vpop.eup %819  ;;  %v574_v28 = vadd.f32 %v566_v25, %v558_v29 }
 0x1a4   : > { %v822_v33 = vpop.eup %821  ;;  %v564_v35 = vmul.f32 %v820_v31, %v546_v32  ;;  %584 = vst.msk [vmem:[%s1047_s29 + $0x10] sm:$0xff] %vm581_vm0, %v575_v30 }
 0x1a5   : > { %v563_v36 = vmul.f32 %v822_v33, %v544_v4  ;;  %583 = vst.msk [vmem:[%s1047_s29 + $0x8] sm:$0xff] %vm581_vm0, %v574_v28  ;;  %v824_v40 = vpop.eup %823 }
 0x1a6   : > { %v580_v37 = vadd.f32 %v572_v27, %v564_v35 }
 0x1a7   : > { %v579_v41 = vadd.f32 %v571_v34, %v563_v36  ;;  %v536_v42 = vpop.f32.mrf.mxu1 }
 0x1a8   : > { %589 = vst.msk [vmem:[%s1047_s29 + $0x38] sm:$0xff] %vm581_vm0, %v580_v37  ;;  %v560_v44 = vmul.f32 %v824_v40, %v536_v42 }
 0x1a9   : > { %588 = vst.msk [vmem:[%s1047_s29 + $0x30] sm:$0xff] %vm581_vm0, %v579_v41 }
 0x1aa   : > { %v576_v45 = vadd.f32 %v568_v43, %v560_v44 }
 0x1ac   : > { %585 = vst.msk [vmem:[%s1047_s29 + $0x18] sm:$0xff] %vm581_vm0, %v576_v45 }
 0x1ad PF: > { %s15_s18 = sadd.s32 1, %s831_s18  }
 0x1ae   : > { %p12_p4 = scmp.ge.s32.totalorder %s15_s18, 4  }
 0x1b0   :  { %14 = sbr.rel (!%p12_p4) target bundleno = 1 (0x1), region = 76 }

</bundles_post_ra>
